<compile_context>
chip_gen: v5e
topology: v5e:2x2
jax: 0.10.0
libtpu: 0.0.40
codegen_flags: <defaults>
</compile_context>

<pallas_src>
import jax
import jax.numpy as jnp
from jax.experimental import pallas as pl
from jax.experimental.pallas import tpu as pltpu

HIGHEST = jax.lax.Precision.HIGHEST   # used only by the pure-JAX reference


# ----------------------------------------------------------------------------
# Fused kernel. Per batch element, activations are (C, H*W): channels on
# sublanes, flattened spatial on lanes.
# ----------------------------------------------------------------------------
def _make_agf_kernel(H, W, c_main, list_c_sp, c_sp_out, use_conv2):
    HW = H * W
    HALO = W + 1                              # +-1 row / +-1 col in flat space
    DATA_OFF = ((HALO + 127) // 128) * 128    # 128-aligned start of data window
    n_br = len(list_c_sp)

    def kernel(*refs):
        it = iter(refs)
        x_ref = next(it)
        side_refs = [next(it) for _ in range(n_br)]
        w1_ref, s1_ref, b1_ref = next(it), next(it), next(it)
        wse1t_ref, bse1_ref, wse2_ref, bse2_ref = (next(it), next(it),
                                                   next(it), next(it))
        spw_refs = [next(it) for _ in range(n_br)]
        sps_refs = [next(it) for _ in range(n_br)]
        spb_refs = [next(it) for _ in range(n_br)]
        if use_conv2:
            w2_refs = [next(it) for _ in range(n_br)]
            s2_ref, b2_ref = next(it), next(it)
        saw_ref, sab_ref = next(it), next(it)
        o_ref = next(it)
        halo_ref = next(it)
        patch_ref = next(it)

        # Zero the halo scratch once; only the aligned data window is rewritten
        # per conv, so the halo columns stay zero.  This replaces wrapper-side
        # jnp.pad (no extra HBM pass of the activations).
        halo_ref[...] = jnp.zeros_like(halo_ref)

        # Column validity masks (row halo handled by the zero padding above).
        col = jax.lax.broadcasted_iota(jnp.int32, (1, HW), 1) % W
        mask_l = col >= 1          # taps reading x[.., w-1]
        mask_r = col <= W - 2      # taps reading x[.., w+1]

        def conv3x3(x_flat, cin, wk_ref, scale, bias):
            """3x3 conv + folded BN + ReLU on a (cin, HW) activation."""
            halo_ref[0:cin, DATA_OFF:DATA_OFF + HW] = x_flat
            # im2col: 9 shifted windows -> one (cout, 9*cin)x(9*cin, HW) matmul.
            for sy in (-1, 0, 1):
                for sx in (-1, 0, 1):
                    t = (sy + 1) * 3 + (sx + 1)
                    off = DATA_OFF + sy * W + sx
                    win = halo_ref[0:cin, off:off + HW]
                    if sx == -1:
                        win = jnp.where(mask_l, win, 0.0)
                    elif sx == 1:
                        win = jnp.where(mask_r, win, 0.0)
                    patch_ref[t * cin:(t + 1) * cin, :] = win
            acc = jnp.dot(wk_ref[...], patch_ref[0:9 * cin, :],
                          preferred_element_type=jnp.float32)
            return jnp.maximum(acc * scale + bias, 0.0)

        # ---- conv1 (3x3 + BN + ReLU) with SE fused into the epilogue --------
        x1 = conv3x3(x_ref[0], c_main, w1_ref, s1_ref[...], b1_ref[...])
        pooled = jnp.mean(x1, axis=1, keepdims=True)                   # (Cm, 1)
        # SE FC layers on the VPU (broadcast-multiply + reductions).
        h1 = jnp.maximum(
            jnp.sum(wse1t_ref[...] * pooled, axis=0, keepdims=True)
            + bse1_ref[...], 0.0)                                       # (1, Cs)
        gate = jax.nn.sigmoid(
            jnp.sum(wse2_ref[...] * h1, axis=1, keepdims=True)
            + bse2_ref[...])                                            # (Cm, 1)
        x_se = x1 * gate                                                # (Cm, HW)

        # ---- side branches; 1x1 conv2 distributed over them (no concat) -----
        if use_conv2:
            acc2 = jnp.zeros((c_main, HW), jnp.float32)
            for i in range(n_br):
                bi = conv3x3(side_refs[i][0], list_c_sp[i], spw_refs[i],
                             sps_refs[i][...], spb_refs[i][...])
                acc2 = acc2 + jnp.dot(w2_refs[i][...], bi,
                                      preferred_element_type=jnp.float32)
            y = jnp.maximum(acc2 * s2_ref[...] + b2_ref[...], 0.0)      # (Cm, HW)
        else:
            outs = [conv3x3(side_refs[i][0], list_c_sp[i], spw_refs[i],
                            sps_refs[i][...], spb_refs[i][...])
                    for i in range(n_br)]
            y = outs[0] if n_br == 1 else jnp.concatenate(outs, axis=0)

        # ---- CBAM spatial attention + residual add ---------------------------
        avg_map = jnp.mean(y, axis=0, keepdims=True)                    # (1, HW)
        max_map = jnp.max(y, axis=0, keepdims=True)                     # (1, HW)
        halo_ref[0:1, DATA_OFF:DATA_OFF + HW] = avg_map
        halo_ref[1:2, DATA_OFF:DATA_OFF + HW] = max_map
        logit = jnp.zeros((1, HW), jnp.float32) + sab_ref[0]
        for sy in (-1, 0, 1):
            for sx in (-1, 0, 1):
                t = (sy + 1) * 3 + (sx + 1)
                off = DATA_OFF + sy * W + sx
                win = halo_ref[0:2, off:off + HW]
                if sx == -1:
                    win = jnp.where(mask_l, win, 0.0)
                elif sx == 1:
                    win = jnp.where(mask_r, win, 0.0)
                logit = (logit + win[0:1, :] * saw_ref[t, 0]
                         + win[1:2, :] * saw_ref[t, 1])
        attn = jax.nn.sigmoid(logit)                                    # (1, HW)
        o_ref[...] = (x_se + y * attn).reshape(1, c_main, HW)

    return kernel


# ----------------------------------------------------------------------------
# Wrapper-side glue (layout-free: only weight reshapes + the nearest resize).
# ----------------------------------------------------------------------------
def nearest_resize_nchw(x, H, W):
    # matches F.interpolate(x, size=(H, W)) (default mode='nearest').
    _, _, Hin, Win = x.shape
    ih = (jnp.arange(H) * Hin) // H
    iw = (jnp.arange(W) * Win) // W
    return x[:, :, ih[:, None], iw[None, :]]


def _hwio_to_im2col(w_hwio):
    # (3,3,Cin,Cout) -> (Cout, 9*Cin) with K ordered (tap, cin), matching the
    # patch matrix built inside the kernel.
    kh, kw, cin, cout = w_hwio.shape
    return jnp.transpose(w_hwio.reshape(kh * kw, cin, cout),
                         (2, 0, 1)).reshape(cout, kh * kw * cin)


def _colv(v):
    return v.reshape(-1, 1).astype(jnp.float32)


def agf_forward(params, main_nchw, list_inputs_nchw):
    N, Cm, H, W = main_nchw.shape
    HW = H * W
    n_br = len(list_inputs_nchw)
    use_conv2 = n_br == 3
    c_sp_out = Cm if n_br == 1 else Cm // 2
    list_c_sp = [int(x.shape[1]) for x in list_inputs_nchw]
    c_se = params["se_w1"].shape[0]

    # NCHW stays the native layout: (N,C,H,W)->(N,C,H*W) is a free reshape and
    # makes every Pallas DMA lane-dense (last dim H*W is a multiple of 128).
    main_flat = main_nchw.astype(jnp.float32).reshape(N, Cm, HW)
    sides_flat = []
    for xi in list_inputs_nchw:
        # TODO(synk): nearest-neighbour interpolate stays as an XLA gather.
        xi = nearest_resize_nchw(xi.astype(jnp.float32), H, W)
        sides_flat.append(xi.reshape(N, xi.shape[1], HW))

    operands = [main_flat] + sides_flat + [
        _hwio_to_im2col(params["w1"]), _colv(params["s1"]), _colv(params["b1"]),
        params["se_w1"].T,                       # (Cm, Cs)
        params["se_b1"].reshape(1, c_se),        # (1, Cs)
        params["se_w2"],                         # (Cm, Cs)
        _colv(params["se_b2"]),                  # (Cm, 1)
    ]
    operands += [_hwio_to_im2col(w) for w in params["sp_w"]]
    operands += [_colv(s) for s in params["sp_s"]]
    operands += [_colv(b) for b in params["sp_b"]]
    if use_conv2:
        w2 = params["w2"]                        # (Cm, 1.5*Cm)  (out, in)
        operands += [w2[:, i * c_sp_out:(i + 1) * c_sp_out] for i in range(n_br)]
        operands += [_colv(params["s2"]), _colv(params["b2"])]
    operands += [params["sa_w"].reshape(9, 2), params["sa_b"]]

    def act_spec(c):
        return pl.BlockSpec((1, c, HW), lambda b: (b, 0, 0))

    def full_spec(arr):
        nd = arr.ndim
        return pl.BlockSpec(arr.shape, lambda b, _nd=nd: (0,) * _nd)

    in_specs = [act_spec(Cm)] + [act_spec(c) for c in list_c_sp]
    in_specs += [full_spec(a) for a in operands[1 + n_br:-2]]
    in_specs += [pl.BlockSpec(memory_space=pltpu.MemorySpace.SMEM)] * 2

    halo = W + 1
    data_off = ((halo + 127) // 128) * 128
    c_max = max([Cm, 2] + list_c_sp)
    kernel = _make_agf_kernel(H, W, Cm, list_c_sp, c_sp_out, use_conv2)

    out_flat = pl.pallas_call(
        kernel,
        out_shape=jax.ShapeDtypeStruct((N, Cm, HW), jnp.float32),
        grid=(N,),
        in_specs=in_specs,
        out_specs=pl.BlockSpec((1, Cm, HW), lambda b: (b, 0, 0)),
        scratch_shapes=[
            pltpu.VMEM((c_max, data_off + HW + halo), jnp.float32),  # zero halo
            pltpu.VMEM((9 * c_max, HW), jnp.float32),                # im2col
        ],
        compiler_params=pltpu.CompilerParams(dimension_semantics=("parallel",)),
    )(*operands)
    # TODO(synk): for large H*W add an H-tile grid axis (halo rows via index_map)
    # plus a cross-tile SE reduction so v7x's 64 MiB VMEM / 2 TCs are respected.
    return out_flat.reshape(N, Cm, H, W)


# ----------------------------------------------------------------------------
# Parameter init (BN folded into scale/bias) and pure-JAX reference.
# ----------------------------------------------------------------------------
def init_params(key, c_main, list_c_sp):
    def nrm(k, shape, scale=0.1):
        return jax.random.normal(k, shape, jnp.float32) * scale

    ks = list(jax.random.split(key, 8 + len(list_c_sp)))
    p = {}
    p["w1"] = nrm(ks[0], (3, 3, c_main, c_main))
    p["s1"] = 1.0 + nrm(ks[1], (c_main,))
    p["b1"] = nrm(ks[2], (c_main,))
    cs = c_main // 2
    p["se_w1"] = nrm(ks[3], (cs, c_main))
    p["se_b1"] = nrm(ks[4], (cs,))
    p["se_w2"] = nrm(ks[5], (c_main, cs))
    p["se_b2"] = nrm(ks[6], (c_main,))
    out_dim = c_main if len(list_c_sp) == 1 else c_main // 2
    p["sp_w"], p["sp_s"], p["sp_b"] = [], [], []
    for i, c_sp in enumerate(list_c_sp):
        kk = jax.random.split(ks[7 + i], 3)
        p["sp_w"].append(nrm(kk[0], (3, 3, c_sp, out_dim)))
        p["sp_s"].append(1.0 + nrm(kk[1], (out_dim,)))
        p["sp_b"].append(nrm(kk[2], (out_dim,)))
    if len(list_c_sp) == 3:
        cin2 = int(c_main * 1.5)
        kk = jax.random.split(jax.random.fold_in(key, 17), 3)
        p["w2"] = nrm(kk[0], (c_main, cin2))
        p["s2"] = 1.0 + nrm(kk[1], (c_main,))
        p["b2"] = nrm(kk[2], (c_main,))
    kk = jax.random.split(jax.random.fold_in(key, 99), 2)
    p["sa_w"] = nrm(kk[0], (3, 3, 2, 1))
    p["sa_b"] = nrm(kk[1], (1,))
    return p


def _conv_nhwc(x, w, pad):
    return jax.lax.conv_general_dilated(
        x, w, (1, 1), ((pad, pad), (pad, pad)),
        dimension_numbers=("NHWC", "HWIO", "NHWC"), precision=HIGHEST)


def agf_reference(params, main_nchw, list_inputs_nchw):
    x = jnp.transpose(main_nchw.astype(jnp.float32), (0, 2, 3, 1))
    H, W = x.shape[1], x.shape[2]
    x = jnp.maximum(_conv_nhwc(x, params["w1"], 1) * params["s1"]
                    + params["b1"], 0.0)
    pooled = jnp.mean(x, axis=(1, 2))                              # (N, Cm)
    h1 = jnp.maximum(
        jnp.einsum("nc,sc->ns", pooled, params["se_w1"], precision=HIGHEST)
        + params["se_b1"], 0.0)
    gate = jax.nn.sigmoid(
        jnp.einsum("ns,cs->nc", h1, params["se_w2"], precision=HIGHEST)
        + params["se_b2"])
    x = x * gate[:, None, None, :]
    branches = []
    for i, xi in enumerate(list_inputs_nchw):
        xi = nearest_resize_nchw(xi.astype(jnp.float32), H, W)
        xi = jnp.transpose(xi, (0, 2, 3, 1))
        xi = jnp.maximum(_conv_nhwc(xi, params["sp_w"][i], 1) * params["sp_s"][i]
                         + params["sp_b"][i], 0.0)
        branches.append(xi)
    xcat = jnp.concatenate(branches, axis=-1)
    if len(list_inputs_nchw) == 3:
        xcat = jnp.maximum(
            jnp.einsum("nhwc,oc->nhwo", xcat, params["w2"], precision=HIGHEST)
            * params["s2"] + params["b2"], 0.0)
    am = jnp.concatenate([jnp.mean(xcat, axis=-1, keepdims=True),
                          jnp.max(xcat, axis=-1, keepdims=True)], axis=-1)
    attn = jax.nn.sigmoid(_conv_nhwc(am, params["sa_w"], 1) + params["sa_b"])
    out = x + xcat * attn
    return jnp.transpose(out, (0, 3, 1, 2))


if __name__ == "__main__":
    key = jax.random.PRNGKey(0)
    k_main, k_sp1, k_sp2, k_sp3, k_params = jax.random.split(key, 5)

    N, Cm, H, W = 2, 16, 16, 16
    list_c_sp = [8, 12, 6]                       # 3 side inputs -> conv2 active
    main_inputs = jax.random.normal(k_main, (N, Cm, H, W), jnp.float32)
    list_inputs = [
        jax.random.normal(k_sp1, (N, 8, 8, 8), jnp.float32),     # upsample x2
        jax.random.normal(k_sp2, (N, 12, 32, 32), jnp.float32),  # downsample x2
        jax.random.normal(k_sp3, (N, 6, 16, 16), jnp.float32),   # same size
    ]

    params = init_params(k_params, Cm, list_c_sp)

    out = jax.block_until_ready(agf_forward(params, main_inputs, list_inputs))
    ref = jax.block_until_ready(agf_reference(params, main_inputs, list_inputs))

    assert out.shape == (N, Cm, H, W), out.shape
    max_err = float(jnp.max(jnp.abs(out - ref)))
    # Kernel matmuls run at default (single-pass bf16) MXU precision while the
    # reference runs at HIGHEST, so the tolerance is relaxed accordingly.
    assert jnp.allclose(out, ref, rtol=5e-2, atol=5e-2), max_err

    print("KERNEL_OK")
</pallas_src>

<mosaic_0001>
module attributes {stable_mosaic.version = 11 : i64} {
  func.func @kernel(%arg0: i32, %arg1: memref<1x16x256xf32, #tpu.memory_space<vmem>>, %arg2: memref<1x8x256xf32, #tpu.memory_space<vmem>>, %arg3: memref<1x12x256xf32, #tpu.memory_space<vmem>>, %arg4: memref<1x6x256xf32, #tpu.memory_space<vmem>>, %arg5: memref<16x144xf32, #tpu.memory_space<vmem>>, %arg6: memref<16x1xf32, #tpu.memory_space<vmem>>, %arg7: memref<16x1xf32, #tpu.memory_space<vmem>>, %arg8: memref<16x8xf32, #tpu.memory_space<vmem>>, %arg9: memref<1x8xf32, #tpu.memory_space<vmem>>, %arg10: memref<16x8xf32, #tpu.memory_space<vmem>>, %arg11: memref<16x1xf32, #tpu.memory_space<vmem>>, %arg12: memref<8x72xf32, #tpu.memory_space<vmem>>, %arg13: memref<8x108xf32, #tpu.memory_space<vmem>>, %arg14: memref<8x54xf32, #tpu.memory_space<vmem>>, %arg15: memref<8x1xf32, #tpu.memory_space<vmem>>, %arg16: memref<8x1xf32, #tpu.memory_space<vmem>>, %arg17: memref<8x1xf32, #tpu.memory_space<vmem>>, %arg18: memref<8x1xf32, #tpu.memory_space<vmem>>, %arg19: memref<8x1xf32, #tpu.memory_space<vmem>>, %arg20: memref<8x1xf32, #tpu.memory_space<vmem>>, %arg21: memref<16x8xf32, #tpu.memory_space<vmem>>, %arg22: memref<16x8xf32, #tpu.memory_space<vmem>>, %arg23: memref<16x8xf32, #tpu.memory_space<vmem>>, %arg24: memref<16x1xf32, #tpu.memory_space<vmem>>, %arg25: memref<16x1xf32, #tpu.memory_space<vmem>>, %arg26: memref<9x2xf32, #tpu.memory_space<smem>>, %arg27: memref<1xf32, #tpu.memory_space<smem>>, %arg28: memref<1x16x256xf32, #tpu.memory_space<vmem>>, %arg29: memref<16x401xf32, #tpu.memory_space<vmem>>, %arg30: memref<144x256xf32, #tpu.memory_space<vmem>>) attributes {dimension_semantics = [#tpu.dimension_semantics<parallel>], iteration_bounds = array<i64: 2>, scalar_prefetch = 0 : i64, scratch_operands = 2 : i64, tpu.core_type = #tpu.core_type<tc>, window_params = [{transform_indices = @transform_0, window_bounds = array<i64: 1, 16, 256>}, {transform_indices = @transform_1, window_bounds = array<i64: 1, 8, 256>}, {transform_indices = @transform_2, window_bounds = array<i64: 1, 12, 256>}, {transform_indices = @transform_3, window_bounds = array<i64: 1, 6, 256>}, {pipeline_mode = #tpu.pipeline_mode<synchronous>, transform_indices = @transform_4, window_bounds = array<i64: 16, 144>}, {pipeline_mode = #tpu.pipeline_mode<synchronous>, transform_indices = @transform_5, window_bounds = array<i64: 16, 1>}, {pipeline_mode = #tpu.pipeline_mode<synchronous>, transform_indices = @transform_6, window_bounds = array<i64: 16, 1>}, {pipeline_mode = #tpu.pipeline_mode<synchronous>, transform_indices = @transform_7, window_bounds = array<i64: 16, 8>}, {pipeline_mode = #tpu.pipeline_mode<synchronous>, transform_indices = @transform_8, window_bounds = array<i64: 1, 8>}, {pipeline_mode = #tpu.pipeline_mode<synchronous>, transform_indices = @transform_9, window_bounds = array<i64: 16, 8>}, {pipeline_mode = #tpu.pipeline_mode<synchronous>, transform_indices = @transform_10, window_bounds = array<i64: 16, 1>}, {pipeline_mode = #tpu.pipeline_mode<synchronous>, transform_indices = @transform_11, window_bounds = array<i64: 8, 72>}, {pipeline_mode = #tpu.pipeline_mode<synchronous>, transform_indices = @transform_12, window_bounds = array<i64: 8, 108>}, {pipeline_mode = #tpu.pipeline_mode<synchronous>, transform_indices = @transform_13, window_bounds = array<i64: 8, 54>}, {pipeline_mode = #tpu.pipeline_mode<synchronous>, transform_indices = @transform_14, window_bounds = array<i64: 8, 1>}, {pipeline_mode = #tpu.pipeline_mode<synchronous>, transform_indices = @transform_15, window_bounds = array<i64: 8, 1>}, {pipeline_mode = #tpu.pipeline_mode<synchronous>, transform_indices = @transform_16, window_bounds = array<i64: 8, 1>}, {pipeline_mode = #tpu.pipeline_mode<synchronous>, transform_indices = @transform_17, window_bounds = array<i64: 8, 1>}, {pipeline_mode = #tpu.pipeline_mode<synchronous>, transform_indices = @transform_18, window_bounds = array<i64: 8, 1>}, {pipeline_mode = #tpu.pipeline_mode<synchronous>, transform_indices = @transform_19, window_bounds = array<i64: 8, 1>}, {pipeline_mode = #tpu.pipeline_mode<synchronous>, transform_indices = @transform_20, window_bounds = array<i64: 16, 8>}, {pipeline_mode = #tpu.pipeline_mode<synchronous>, transform_indices = @transform_21, window_bounds = array<i64: 16, 8>}, {pipeline_mode = #tpu.pipeline_mode<synchronous>, transform_indices = @transform_22, window_bounds = array<i64: 16, 8>}, {pipeline_mode = #tpu.pipeline_mode<synchronous>, transform_indices = @transform_23, window_bounds = array<i64: 16, 1>}, {pipeline_mode = #tpu.pipeline_mode<synchronous>, transform_indices = @transform_24, window_bounds = array<i64: 16, 1>}, {transform_indices = @transform_25, window_bounds = array<i64: 9, 2>}, {transform_indices = @transform_26, window_bounds = array<i64: 1>}, {transform_indices = @transform_27, window_bounds = array<i64: 1, 16, 256>}]} {
    %cst = arith.constant 0.000000e+00 : f32
    %0 = vector.broadcast %cst : f32 to vector<16x401xf32>
    %c0 = arith.constant 0 : index
    %c0_0 = arith.constant 0 : index
    %1 = vector.load %arg29[%c0, %c0_0] : memref<16x401xf32, #tpu.memory_space<vmem>>, vector<16x401xf32>
    tpu.vector_store %arg29[%c0, %c0_0], %0 {strides = array<i32>} : memref<16x401xf32, #tpu.memory_space<vmem>>, vector<16x401xf32>,
    %2 = tpu.iota {dimensions = array<i32: 1>} : vector<1x256xi32>
    %c16_i32 = arith.constant 16 : i32
    %c0_i32 = arith.constant 0 : i32
    %3 = arith.cmpi eq, %c16_i32, %c0_i32 : i32
    %c1_i32 = arith.constant 1 : i32
    %4 = arith.select %3, %c1_i32, %c16_i32 : i32
    %5 = vector.broadcast %4 : i32 to vector<1x256xi32>
    %6 = arith.remsi %2, %5 : vector<1x256xi32>
    %c0_i32_1 = arith.constant 0 : i32
    %7 = vector.broadcast %c0_i32_1 : i32 to vector<1x256xi32>
    %8 = arith.cmpi ne, %6, %7 : vector<1x256xi32>
    %c0_i32_2 = arith.constant 0 : i32
    %9 = vector.broadcast %c0_i32_2 : i32 to vector<1x256xi32>
    %10 = arith.cmpi slt, %6, %9 : vector<1x256xi32>
    %c0_i32_3 = arith.constant 0 : i32
    %11 = arith.cmpi slt, %4, %c0_i32_3 : i32
    %12 = vector.broadcast %11 : i1 to vector<1x256xi1>
    %13 = vector.broadcast %12 : vector<1x256xi1> to vector<1x256xi1>
    %14 = arith.xori %10, %13 : vector<1x256xi1>
    %15 = arith.andi %14, %8 : vector<1x256xi1>
    %16 = vector.broadcast %4 : i32 to vector<1x256xi32>
    %17 = arith.addi %6, %16 : vector<1x256xi32>
    %18 = arith.select %15, %17, %6 : vector<1x256xi1>, vector<1x256xi32>
    %c1_i32_4 = arith.constant 1 : i32
    %19 = vector.broadcast %c1_i32_4 : i32 to vector<1x256xi32>
    %20 = arith.cmpi sge, %18, %19 : vector<1x256xi32>
    %c14_i32 = arith.constant 14 : i32
    %21 = vector.broadcast %c14_i32 : i32 to vector<1x256xi32>
    %22 = arith.cmpi sle, %18, %21 : vector<1x256xi32>
    %c0_5 = arith.constant 0 : index
    %c0_6 = arith.constant 0 : index
    %c0_7 = arith.constant 0 : index
    %23 = vector.load %arg1[%c0_5, %c0_6, %c0_7] : memref<1x16x256xf32, #tpu.memory_space<vmem>>, vector<1x16x256xf32>
    %24 = vector.shape_cast %23 : vector<1x16x256xf32> to vector<16x256xf32>
    %c0_8 = arith.constant 0 : index
    %c0_9 = arith.constant 0 : index
    %25 = vector.load %arg6[%c0_8, %c0_9] : memref<16x1xf32, #tpu.memory_space<vmem>>, vector<16x1xf32>
    %c0_10 = arith.constant 0 : index
    %c0_11 = arith.constant 0 : index
    %26 = vector.load %arg7[%c0_10, %c0_11] : memref<16x1xf32, #tpu.memory_space<vmem>>, vector<16x1xf32>
    %c0_12 = arith.constant 0 : index
    %c128 = arith.constant 128 : index
    %27 = vector.load %arg29[%c0_12, %c128] : memref<16x401xf32, #tpu.memory_space<vmem>>, vector<16x256xf32>
    tpu.vector_store %arg29[%c0_12, %c128], %24 {strides = array<i32>} : memref<16x401xf32, #tpu.memory_space<vmem>>, vector<16x256xf32>,
    %c0_13 = arith.constant 0 : index
    %c111 = arith.constant 111 : index
    %28 = vector.load %arg29[%c0_13, %c111] : memref<16x401xf32, #tpu.memory_space<vmem>>, vector<16x256xf32>
    %cst_14 = arith.constant 0.000000e+00 : f32
    %29 = vector.shape_cast %20 : vector<1x256xi1> to vector<1x256xi1>
    %30 = vector.broadcast %29 : vector<1x256xi1> to vector<16x256xi1>
    %31 = vector.broadcast %cst_14 : f32 to vector<16x256xf32>
    %32 = arith.select %30, %28, %31 : vector<16x256xi1>, vector<16x256xf32>
    %c0_15 = arith.constant 0 : index
    %c0_16 = arith.constant 0 : index
    %33 = vector.load %arg30[%c0_15, %c0_16] : memref<144x256xf32, #tpu.memory_space<vmem>>, vector<16x256xf32>
    tpu.vector_store %arg30[%c0_15, %c0_16], %32 {strides = array<i32>} : memref<144x256xf32, #tpu.memory_space<vmem>>, vector<16x256xf32>,
    %c0_17 = arith.constant 0 : index
    %c112 = arith.constant 112 : index
    %34 = vector.load %arg29[%c0_17, %c112] : memref<16x401xf32, #tpu.memory_space<vmem>>, vector<16x256xf32>
    %c16 = arith.constant 16 : index
    %c0_18 = arith.constant 0 : index
    %35 = vector.load %arg30[%c16, %c0_18] : memref<144x256xf32, #tpu.memory_space<vmem>>, vector<16x256xf32>
    tpu.vector_store %arg30[%c16, %c0_18], %34 {strides = array<i32>} : memref<144x256xf32, #tpu.memory_space<vmem>>, vector<16x256xf32>,
    %c0_19 = arith.constant 0 : index
    %c113 = arith.constant 113 : index
    %36 = vector.load %arg29[%c0_19, %c113] : memref<16x401xf32, #tpu.memory_space<vmem>>, vector<16x256xf32>
    %cst_20 = arith.constant 0.000000e+00 : f32
    %37 = vector.shape_cast %22 : vector<1x256xi1> to vector<1x256xi1>
    %38 = vector.broadcast %37 : vector<1x256xi1> to vector<16x256xi1>
    %39 = vector.broadcast %cst_20 : f32 to vector<16x256xf32>
    %40 = arith.select %38, %36, %39 : vector<16x256xi1>, vector<16x256xf32>
    %c32 = arith.constant 32 : index
    %c0_21 = arith.constant 0 : index
    %41 = vector.load %arg30[%c32, %c0_21] : memref<144x256xf32, #tpu.memory_space<vmem>>, vector<16x256xf32>
    tpu.vector_store %arg30[%c32, %c0_21], %40 {strides = array<i32>} : memref<144x256xf32, #tpu.memory_space<vmem>>, vector<16x256xf32>,
    %c0_22 = arith.constant 0 : index
    %c127 = arith.constant 127 : index
    %42 = vector.load %arg29[%c0_22, %c127] : memref<16x401xf32, #tpu.memory_space<vmem>>, vector<16x256xf32>
    %cst_23 = arith.constant 0.000000e+00 : f32
    %43 = vector.shape_cast %20 : vector<1x256xi1> to vector<1x256xi1>
    %44 = vector.broadcast %43 : vector<1x256xi1> to vector<16x256xi1>
    %45 = vector.broadcast %cst_23 : f32 to vector<16x256xf32>
    %46 = arith.select %44, %42, %45 : vector<16x256xi1>, vector<16x256xf32>
    %c48 = arith.constant 48 : index
    %c0_24 = arith.constant 0 : index
    %47 = vector.load %arg30[%c48, %c0_24] : memref<144x256xf32, #tpu.memory_space<vmem>>, vector<16x256xf32>
    tpu.vector_store %arg30[%c48, %c0_24], %46 {strides = array<i32>} : memref<144x256xf32, #tpu.memory_space<vmem>>, vector<16x256xf32>,
    %c0_25 = arith.constant 0 : index
    %c128_26 = arith.constant 128 : index
    %48 = vector.load %arg29[%c0_25, %c128_26] : memref<16x401xf32, #tpu.memory_space<vmem>>, vector<16x256xf32>
    %c64 = arith.constant 64 : index
    %c0_27 = arith.constant 0 : index
    %49 = vector.load %arg30[%c64, %c0_27] : memref<144x256xf32, #tpu.memory_space<vmem>>, vector<16x256xf32>
    tpu.vector_store %arg30[%c64, %c0_27], %48 {strides = array<i32>} : memref<144x256xf32, #tpu.memory_space<vmem>>, vector<16x256xf32>,
    %c0_28 = arith.constant 0 : index
    %c129 = arith.constant 129 : index
    %50 = vector.load %arg29[%c0_28, %c129] : memref<16x401xf32, #tpu.memory_space<vmem>>, vector<16x256xf32>
    %cst_29 = arith.constant 0.000000e+00 : f32
    %51 = vector.shape_cast %22 : vector<1x256xi1> to vector<1x256xi1>
    %52 = vector.broadcast %51 : vector<1x256xi1> to vector<16x256xi1>
    %53 = vector.broadcast %cst_29 : f32 to vector<16x256xf32>
    %54 = arith.select %52, %50, %53 : vector<16x256xi1>, vector<16x256xf32>
    %c80 = arith.constant 80 : index
    %c0_30 = arith.constant 0 : index
    %55 = vector.load %arg30[%c80, %c0_30] : memref<144x256xf32, #tpu.memory_space<vmem>>, vector<16x256xf32>
    tpu.vector_store %arg30[%c80, %c0_30], %54 {strides = array<i32>} : memref<144x256xf32, #tpu.memory_space<vmem>>, vector<16x256xf32>,
    %c0_31 = arith.constant 0 : index
    %c143 = arith.constant 143 : index
    %56 = vector.load %arg29[%c0_31, %c143] : memref<16x401xf32, #tpu.memory_space<vmem>>, vector<16x256xf32>
    %cst_32 = arith.constant 0.000000e+00 : f32
    %57 = vector.shape_cast %20 : vector<1x256xi1> to vector<1x256xi1>
    %58 = vector.broadcast %57 : vector<1x256xi1> to vector<16x256xi1>
    %59 = vector.broadcast %cst_32 : f32 to vector<16x256xf32>
    %60 = arith.select %58, %56, %59 : vector<16x256xi1>, vector<16x256xf32>
    %c96 = arith.constant 96 : index
    %c0_33 = arith.constant 0 : index
    %61 = vector.load %arg30[%c96, %c0_33] : memref<144x256xf32, #tpu.memory_space<vmem>>, vector<16x256xf32>
    tpu.vector_store %arg30[%c96, %c0_33], %60 {strides = array<i32>} : memref<144x256xf32, #tpu.memory_space<vmem>>, vector<16x256xf32>,
    %c0_34 = arith.constant 0 : index
    %c144 = arith.constant 144 : index
    %62 = vector.load %arg29[%c0_34, %c144] : memref<16x401xf32, #tpu.memory_space<vmem>>, vector<16x256xf32>
    %c112_35 = arith.constant 112 : index
    %c0_36 = arith.constant 0 : index
    %63 = vector.load %arg30[%c112_35, %c0_36] : memref<144x256xf32, #tpu.memory_space<vmem>>, vector<16x256xf32>
    tpu.vector_store %arg30[%c112_35, %c0_36], %62 {strides = array<i32>} : memref<144x256xf32, #tpu.memory_space<vmem>>, vector<16x256xf32>,
    %c0_37 = arith.constant 0 : index
    %c145 = arith.constant 145 : index
    %64 = vector.load %arg29[%c0_37, %c145] : memref<16x401xf32, #tpu.memory_space<vmem>>, vector<16x256xf32>
    %cst_38 = arith.constant 0.000000e+00 : f32
    %65 = vector.shape_cast %22 : vector<1x256xi1> to vector<1x256xi1>
    %66 = vector.broadcast %65 : vector<1x256xi1> to vector<16x256xi1>
    %67 = vector.broadcast %cst_38 : f32 to vector<16x256xf32>
    %68 = arith.select %66, %64, %67 : vector<16x256xi1>, vector<16x256xf32>
    %c128_39 = arith.constant 128 : index
    %c0_40 = arith.constant 0 : index
    %69 = vector.load %arg30[%c128_39, %c0_40] : memref<144x256xf32, #tpu.memory_space<vmem>>, vector<16x256xf32>
    tpu.vector_store %arg30[%c128_39, %c0_40], %68 {strides = array<i32>} : memref<144x256xf32, #tpu.memory_space<vmem>>, vector<16x256xf32>,
    %c0_41 = arith.constant 0 : index
    %c0_42 = arith.constant 0 : index
    %70 = vector.load %arg5[%c0_41, %c0_42] : memref<16x144xf32, #tpu.memory_space<vmem>>, vector<16x144xf32>
    %c0_43 = arith.constant 0 : index
    %c0_44 = arith.constant 0 : index
    %71 = vector.load %arg30[%c0_43, %c0_44] : memref<144x256xf32, #tpu.memory_space<vmem>>, vector<144x256xf32>
    %cst_45 = arith.constant dense<0.000000e+00> : vector<16x256xf32>
    %72 = tpu.matmul %70, %71, %cst_45 {dimension_numbers = #tpu.dot_dimension_numbers<[1], [0], [0], [1], [0, 0, 1, 1], [], []>} : vector<16x144xf32>, vector<144x256xf32>, vector<16x256xf32> -> vector<16x256xf32>
    %73 = vector.broadcast %25 : vector<16x1xf32> to vector<16x256xf32>
    %74 = arith.mulf %72, %73 : vector<16x256xf32>
    %75 = vector.broadcast %26 : vector<16x1xf32> to vector<16x256xf32>
    %76 = arith.addf %74, %75 : vector<16x256xf32>
    %cst_46 = arith.constant 0.000000e+00 : f32
    %77 = vector.broadcast %cst_46 : f32 to vector<16x256xf32>
    %78 = arith.maximumf %76, %77 : vector<16x256xf32>
    %cst_47 = arith.constant dense<0.000000e+00> : vector<16xf32>
    %79 = vector.multi_reduction <add>, %78, %cst_47 [1] : vector<16x256xf32> to vector<16xf32>
    %80 = vector.shape_cast %79 : vector<16xf32> to vector<16x1xf32>
    %cst_48 = arith.constant 2.560000e+02 : f32
    %81 = vector.broadcast %cst_48 : f32 to vector<16x1xf32>
    %82 = arith.divf %80, %81 : vector<16x1xf32>
    %c0_49 = arith.constant 0 : index
    %c0_50 = arith.constant 0 : index
    %83 = vector.load %arg8[%c0_49, %c0_50] : memref<16x8xf32, #tpu.memory_space<vmem>>, vector<16x8xf32>
    %84 = vector.broadcast %82 : vector<16x1xf32> to vector<16x8xf32>
    %85 = arith.mulf %83, %84 : vector<16x8xf32>
    %cst_51 = arith.constant dense<0.000000e+00> : vector<8xf32>
    %86 = vector.multi_reduction <add>, %85, %cst_51 [0] : vector<16x8xf32> to vector<8xf32>
    %87 = vector.shape_cast %86 : vector<8xf32> to vector<1x8xf32>
    %c0_52 = arith.constant 0 : index
    %c0_53 = arith.constant 0 : index
    %88 = vector.load %arg9[%c0_52, %c0_53] : memref<1x8xf32, #tpu.memory_space<vmem>>, vector<1x8xf32>
    %89 = arith.addf %87, %88 : vector<1x8xf32>
    %cst_54 = arith.constant 0.000000e+00 : f32
    %90 = vector.broadcast %cst_54 : f32 to vector<1x8xf32>
    %91 = arith.maximumf %89, %90 : vector<1x8xf32>
    %c0_55 = arith.constant 0 : index
    %c0_56 = arith.constant 0 : index
    %92 = vector.load %arg10[%c0_55, %c0_56] : memref<16x8xf32, #tpu.memory_space<vmem>>, vector<16x8xf32>
    %93 = vector.broadcast %91 : vector<1x8xf32> to vector<16x8xf32>
    %94 = arith.mulf %92, %93 : vector<16x8xf32>
    %cst_57 = arith.constant dense<0.000000e+00> : vector<16xf32>
    %95 = vector.multi_reduction <add>, %94, %cst_57 [1] : vector<16x8xf32> to vector<16xf32>
    %96 = vector.shape_cast %95 : vector<16xf32> to vector<16x1xf32>
    %c0_58 = arith.constant 0 : index
    %c0_59 = arith.constant 0 : index
    %97 = vector.load %arg11[%c0_58, %c0_59] : memref<16x1xf32, #tpu.memory_space<vmem>>, vector<16x1xf32>
    %98 = arith.addf %96, %97 : vector<16x1xf32>
    %99 = arith.negf %98 : vector<16x1xf32>
    %100 = math.exp %99 : vector<16x1xf32>
    %cst_60 = arith.constant 1.000000e+00 : f32
    %101 = vector.broadcast %cst_60 : f32 to vector<16x1xf32>
    %102 = arith.addf %101, %100 : vector<16x1xf32>
    %103 = arith.divf %101, %102 : vector<16x1xf32>
    %104 = vector.broadcast %103 : vector<16x1xf32> to vector<16x256xf32>
    %105 = arith.mulf %78, %104 : vector<16x256xf32>
    %cst_61 = arith.constant 0.000000e+00 : f32
    %106 = vector.broadcast %cst_61 : f32 to vector<16x256xf32>
    %c0_62 = arith.constant 0 : index
    %c0_63 = arith.constant 0 : index
    %c0_64 = arith.constant 0 : index
    %107 = vector.load %arg2[%c0_62, %c0_63, %c0_64] : memref<1x8x256xf32, #tpu.memory_space<vmem>>, vector<1x8x256xf32>
    %108 = vector.shape_cast %107 : vector<1x8x256xf32> to vector<8x256xf32>
    %c0_65 = arith.constant 0 : index
    %c0_66 = arith.constant 0 : index
    %109 = vector.load %arg15[%c0_65, %c0_66] : memref<8x1xf32, #tpu.memory_space<vmem>>, vector<8x1xf32>
    %c0_67 = arith.constant 0 : index
    %c0_68 = arith.constant 0 : index
    %110 = vector.load %arg18[%c0_67, %c0_68] : memref<8x1xf32, #tpu.memory_space<vmem>>, vector<8x1xf32>
    %c0_69 = arith.constant 0 : index
    %c128_70 = arith.constant 128 : index
    %111 = vector.load %arg29[%c0_69, %c128_70] : memref<16x401xf32, #tpu.memory_space<vmem>>, vector<8x256xf32>
    tpu.vector_store %arg29[%c0_69, %c128_70], %108 {strides = array<i32>} : memref<16x401xf32, #tpu.memory_space<vmem>>, vector<8x256xf32>,
    %c0_71 = arith.constant 0 : index
    %c111_72 = arith.constant 111 : index
    %112 = vector.load %arg29[%c0_71, %c111_72] : memref<16x401xf32, #tpu.memory_space<vmem>>, vector<8x256xf32>
    %cst_73 = arith.constant 0.000000e+00 : f32
    %113 = vector.shape_cast %20 : vector<1x256xi1> to vector<1x256xi1>
    %114 = vector.broadcast %113 : vector<1x256xi1> to vector<8x256xi1>
    %115 = vector.broadcast %cst_73 : f32 to vector<8x256xf32>
    %116 = arith.select %114, %112, %115 : vector<8x256xi1>, vector<8x256xf32>
    %c0_74 = arith.constant 0 : index
    %c0_75 = arith.constant 0 : index
    %117 = vector.load %arg30[%c0_74, %c0_75] : memref<144x256xf32, #tpu.memory_space<vmem>>, vector<8x256xf32>
    tpu.vector_store %arg30[%c0_74, %c0_75], %116 {strides = array<i32>} : memref<144x256xf32, #tpu.memory_space<vmem>>, vector<8x256xf32>,
    %c0_76 = arith.constant 0 : index
    %c112_77 = arith.constant 112 : index
    %118 = vector.load %arg29[%c0_76, %c112_77] : memref<16x401xf32, #tpu.memory_space<vmem>>, vector<8x256xf32>
    %c8 = arith.constant 8 : index
    %c0_78 = arith.constant 0 : index
    %119 = vector.load %arg30[%c8, %c0_78] : memref<144x256xf32, #tpu.memory_space<vmem>>, vector<8x256xf32>
    tpu.vector_store %arg30[%c8, %c0_78], %118 {strides = array<i32>} : memref<144x256xf32, #tpu.memory_space<vmem>>, vector<8x256xf32>,
    %c0_79 = arith.constant 0 : index
    %c113_80 = arith.constant 113 : index
    %120 = vector.load %arg29[%c0_79, %c113_80] : memref<16x401xf32, #tpu.memory_space<vmem>>, vector<8x256xf32>
    %cst_81 = arith.constant 0.000000e+00 : f32
    %121 = vector.shape_cast %22 : vector<1x256xi1> to vector<1x256xi1>
    %122 = vector.broadcast %121 : vector<1x256xi1> to vector<8x256xi1>
    %123 = vector.broadcast %cst_81 : f32 to vector<8x256xf32>
    %124 = arith.select %122, %120, %123 : vector<8x256xi1>, vector<8x256xf32>
    %c16_82 = arith.constant 16 : index
    %c0_83 = arith.constant 0 : index
    %125 = vector.load %arg30[%c16_82, %c0_83] : memref<144x256xf32, #tpu.memory_space<vmem>>, vector<8x256xf32>
    tpu.vector_store %arg30[%c16_82, %c0_83], %124 {strides = array<i32>} : memref<144x256xf32, #tpu.memory_space<vmem>>, vector<8x256xf32>,
    %c0_84 = arith.constant 0 : index
    %c127_85 = arith.constant 127 : index
    %126 = vector.load %arg29[%c0_84, %c127_85] : memref<16x401xf32, #tpu.memory_space<vmem>>, vector<8x256xf32>
    %cst_86 = arith.constant 0.000000e+00 : f32
    %127 = vector.shape_cast %20 : vector<1x256xi1> to vector<1x256xi1>
    %128 = vector.broadcast %127 : vector<1x256xi1> to vector<8x256xi1>
    %129 = vector.broadcast %cst_86 : f32 to vector<8x256xf32>
    %130 = arith.select %128, %126, %129 : vector<8x256xi1>, vector<8x256xf32>
    %c24 = arith.constant 24 : index
    %c0_87 = arith.constant 0 : index
    %131 = vector.load %arg30[%c24, %c0_87] : memref<144x256xf32, #tpu.memory_space<vmem>>, vector<8x256xf32>
    tpu.vector_store %arg30[%c24, %c0_87], %130 {strides = array<i32>} : memref<144x256xf32, #tpu.memory_space<vmem>>, vector<8x256xf32>,
    %c0_88 = arith.constant 0 : index
    %c128_89 = arith.constant 128 : index
    %132 = vector.load %arg29[%c0_88, %c128_89] : memref<16x401xf32, #tpu.memory_space<vmem>>, vector<8x256xf32>
    %c32_90 = arith.constant 32 : index
    %c0_91 = arith.constant 0 : index
    %133 = vector.load %arg30[%c32_90, %c0_91] : memref<144x256xf32, #tpu.memory_space<vmem>>, vector<8x256xf32>
    tpu.vector_store %arg30[%c32_90, %c0_91], %132 {strides = array<i32>} : memref<144x256xf32, #tpu.memory_space<vmem>>, vector<8x256xf32>,
    %c0_92 = arith.constant 0 : index
    %c129_93 = arith.constant 129 : index
    %134 = vector.load %arg29[%c0_92, %c129_93] : memref<16x401xf32, #tpu.memory_space<vmem>>, vector<8x256xf32>
    %cst_94 = arith.constant 0.000000e+00 : f32
    %135 = vector.shape_cast %22 : vector<1x256xi1> to vector<1x256xi1>
    %136 = vector.broadcast %135 : vector<1x256xi1> to vector<8x256xi1>
    %137 = vector.broadcast %cst_94 : f32 to vector<8x256xf32>
    %138 = arith.select %136, %134, %137 : vector<8x256xi1>, vector<8x256xf32>
    %c40 = arith.constant 40 : index
    %c0_95 = arith.constant 0 : index
    %139 = vector.load %arg30[%c40, %c0_95] : memref<144x256xf32, #tpu.memory_space<vmem>>, vector<8x256xf32>
    tpu.vector_store %arg30[%c40, %c0_95], %138 {strides = array<i32>} : memref<144x256xf32, #tpu.memory_space<vmem>>, vector<8x256xf32>,
    %c0_96 = arith.constant 0 : index
    %c143_97 = arith.constant 143 : index
    %140 = vector.load %arg29[%c0_96, %c143_97] : memref<16x401xf32, #tpu.memory_space<vmem>>, vector<8x256xf32>
    %cst_98 = arith.constant 0.000000e+00 : f32
    %141 = vector.shape_cast %20 : vector<1x256xi1> to vector<1x256xi1>
    %142 = vector.broadcast %141 : vector<1x256xi1> to vector<8x256xi1>
    %143 = vector.broadcast %cst_98 : f32 to vector<8x256xf32>
    %144 = arith.select %142, %140, %143 : vector<8x256xi1>, vector<8x256xf32>
    %c48_99 = arith.constant 48 : index
    %c0_100 = arith.constant 0 : index
    %145 = vector.load %arg30[%c48_99, %c0_100] : memref<144x256xf32, #tpu.memory_space<vmem>>, vector<8x256xf32>
    tpu.vector_store %arg30[%c48_99, %c0_100], %144 {strides = array<i32>} : memref<144x256xf32, #tpu.memory_space<vmem>>, vector<8x256xf32>,
    %c0_101 = arith.constant 0 : index
    %c144_102 = arith.constant 144 : index
    %146 = vector.load %arg29[%c0_101, %c144_102] : memref<16x401xf32, #tpu.memory_space<vmem>>, vector<8x256xf32>
    %c56 = arith.constant 56 : index
    %c0_103 = arith.constant 0 : index
    %147 = vector.load %arg30[%c56, %c0_103] : memref<144x256xf32, #tpu.memory_space<vmem>>, vector<8x256xf32>
    tpu.vector_store %arg30[%c56, %c0_103], %146 {strides = array<i32>} : memref<144x256xf32, #tpu.memory_space<vmem>>, vector<8x256xf32>,
    %c0_104 = arith.constant 0 : index
    %c145_105 = arith.constant 145 : index
    %148 = vector.load %arg29[%c0_104, %c145_105] : memref<16x401xf32, #tpu.memory_space<vmem>>, vector<8x256xf32>
    %cst_106 = arith.constant 0.000000e+00 : f32
    %149 = vector.shape_cast %22 : vector<1x256xi1> to vector<1x256xi1>
    %150 = vector.broadcast %149 : vector<1x256xi1> to vector<8x256xi1>
    %151 = vector.broadcast %cst_106 : f32 to vector<8x256xf32>
    %152 = arith.select %150, %148, %151 : vector<8x256xi1>, vector<8x256xf32>
    %c64_107 = arith.constant 64 : index
    %c0_108 = arith.constant 0 : index
    %153 = vector.load %arg30[%c64_107, %c0_108] : memref<144x256xf32, #tpu.memory_space<vmem>>, vector<8x256xf32>
    tpu.vector_store %arg30[%c64_107, %c0_108], %152 {strides = array<i32>} : memref<144x256xf32, #tpu.memory_space<vmem>>, vector<8x256xf32>,
    %c0_109 = arith.constant 0 : index
    %c0_110 = arith.constant 0 : index
    %154 = vector.load %arg12[%c0_109, %c0_110] : memref<8x72xf32, #tpu.memory_space<vmem>>, vector<8x72xf32>
    %c0_111 = arith.constant 0 : index
    %c0_112 = arith.constant 0 : index
    %155 = vector.load %arg30[%c0_111, %c0_112] : memref<144x256xf32, #tpu.memory_space<vmem>>, vector<72x256xf32>
    %cst_113 = arith.constant dense<0.000000e+00> : vector<8x256xf32>
    %156 = tpu.matmul %154, %155, %cst_113 {dimension_numbers = #tpu.dot_dimension_numbers<[1], [0], [0], [1], [0, 0, 1, 1], [], []>} : vector<8x72xf32>, vector<72x256xf32>, vector<8x256xf32> -> vector<8x256xf32>
    %157 = vector.broadcast %109 : vector<8x1xf32> to vector<8x256xf32>
    %158 = arith.mulf %156, %157 : vector<8x256xf32>
    %159 = vector.broadcast %110 : vector<8x1xf32> to vector<8x256xf32>
    %160 = arith.addf %158, %159 : vector<8x256xf32>
    %cst_114 = arith.constant 0.000000e+00 : f32
    %161 = vector.broadcast %cst_114 : f32 to vector<8x256xf32>
    %162 = arith.maximumf %160, %161 : vector<8x256xf32>
    %c0_115 = arith.constant 0 : index
    %c0_116 = arith.constant 0 : index
    %163 = vector.load %arg21[%c0_115, %c0_116] : memref<16x8xf32, #tpu.memory_space<vmem>>, vector<16x8xf32>
    %cst_117 = arith.constant dense<0.000000e+00> : vector<16x256xf32>
    %164 = tpu.matmul %163, %162, %cst_117 {dimension_numbers = #tpu.dot_dimension_numbers<[1], [0], [0], [1], [0, 0, 1, 1], [], []>} : vector<16x8xf32>, vector<8x256xf32>, vector<16x256xf32> -> vector<16x256xf32>
    %165 = arith.addf %106, %164 : vector<16x256xf32>
    %c0_118 = arith.constant 0 : index
    %c0_119 = arith.constant 0 : index
    %c0_120 = arith.constant 0 : index
    %166 = vector.load %arg3[%c0_118, %c0_119, %c0_120] : memref<1x12x256xf32, #tpu.memory_space<vmem>>, vector<1x12x256xf32>
    %167 = vector.shape_cast %166 : vector<1x12x256xf32> to vector<12x256xf32>
    %c0_121 = arith.constant 0 : index
    %c0_122 = arith.constant 0 : index
    %168 = vector.load %arg16[%c0_121, %c0_122] : memref<8x1xf32, #tpu.memory_space<vmem>>, vector<8x1xf32>
    %c0_123 = arith.constant 0 : index
    %c0_124 = arith.constant 0 : index
    %169 = vector.load %arg19[%c0_123, %c0_124] : memref<8x1xf32, #tpu.memory_space<vmem>>, vector<8x1xf32>
    %c0_125 = arith.constant 0 : index
    %c128_126 = arith.constant 128 : index
    %170 = vector.load %arg29[%c0_125, %c128_126] : memref<16x401xf32, #tpu.memory_space<vmem>>, vector<12x256xf32>
    tpu.vector_store %arg29[%c0_125, %c128_126], %167 {strides = array<i32>} : memref<16x401xf32, #tpu.memory_space<vmem>>, vector<12x256xf32>,
    %c0_127 = arith.constant 0 : index
    %c111_128 = arith.constant 111 : index
    %171 = vector.load %arg29[%c0_127, %c111_128] : memref<16x401xf32, #tpu.memory_space<vmem>>, vector<12x256xf32>
    %cst_129 = arith.constant 0.000000e+00 : f32
    %172 = vector.shape_cast %20 : vector<1x256xi1> to vector<1x256xi1>
    %173 = vector.broadcast %172 : vector<1x256xi1> to vector<12x256xi1>
    %174 = vector.broadcast %cst_129 : f32 to vector<12x256xf32>
    %175 = arith.select %173, %171, %174 : vector<12x256xi1>, vector<12x256xf32>
    %c0_130 = arith.constant 0 : index
    %c0_131 = arith.constant 0 : index
    %176 = vector.load %arg30[%c0_130, %c0_131] : memref<144x256xf32, #tpu.memory_space<vmem>>, vector<12x256xf32>
    tpu.vector_store %arg30[%c0_130, %c0_131], %175 {strides = array<i32>} : memref<144x256xf32, #tpu.memory_space<vmem>>, vector<12x256xf32>,
    %c0_132 = arith.constant 0 : index
    %c112_133 = arith.constant 112 : index
    %177 = vector.load %arg29[%c0_132, %c112_133] : memref<16x401xf32, #tpu.memory_space<vmem>>, vector<12x256xf32>
    %c12 = arith.constant 12 : index
    %c0_134 = arith.constant 0 : index
    %178 = vector.load %arg30[%c12, %c0_134] : memref<144x256xf32, #tpu.memory_space<vmem>>, vector<12x256xf32>
    tpu.vector_store %arg30[%c12, %c0_134], %177 {strides = array<i32>} : memref<144x256xf32, #tpu.memory_space<vmem>>, vector<12x256xf32>,
    %c0_135 = arith.constant 0 : index
    %c113_136 = arith.constant 113 : index
    %179 = vector.load %arg29[%c0_135, %c113_136] : memref<16x401xf32, #tpu.memory_space<vmem>>, vector<12x256xf32>
    %cst_137 = arith.constant 0.000000e+00 : f32
    %180 = vector.shape_cast %22 : vector<1x256xi1> to vector<1x256xi1>
    %181 = vector.broadcast %180 : vector<1x256xi1> to vector<12x256xi1>
    %182 = vector.broadcast %cst_137 : f32 to vector<12x256xf32>
    %183 = arith.select %181, %179, %182 : vector<12x256xi1>, vector<12x256xf32>
    %c24_138 = arith.constant 24 : index
    %c0_139 = arith.constant 0 : index
    %184 = vector.load %arg30[%c24_138, %c0_139] : memref<144x256xf32, #tpu.memory_space<vmem>>, vector<12x256xf32>
    tpu.vector_store %arg30[%c24_138, %c0_139], %183 {strides = array<i32>} : memref<144x256xf32, #tpu.memory_space<vmem>>, vector<12x256xf32>,
    %c0_140 = arith.constant 0 : index
    %c127_141 = arith.constant 127 : index
    %185 = vector.load %arg29[%c0_140, %c127_141] : memref<16x401xf32, #tpu.memory_space<vmem>>, vector<12x256xf32>
    %cst_142 = arith.constant 0.000000e+00 : f32
    %186 = vector.shape_cast %20 : vector<1x256xi1> to vector<1x256xi1>
    %187 = vector.broadcast %186 : vector<1x256xi1> to vector<12x256xi1>
    %188 = vector.broadcast %cst_142 : f32 to vector<12x256xf32>
    %189 = arith.select %187, %185, %188 : vector<12x256xi1>, vector<12x256xf32>
    %c36 = arith.constant 36 : index
    %c0_143 = arith.constant 0 : index
    %190 = vector.load %arg30[%c36, %c0_143] : memref<144x256xf32, #tpu.memory_space<vmem>>, vector<12x256xf32>
    tpu.vector_store %arg30[%c36, %c0_143], %189 {strides = array<i32>} : memref<144x256xf32, #tpu.memory_space<vmem>>, vector<12x256xf32>,
    %c0_144 = arith.constant 0 : index
    %c128_145 = arith.constant 128 : index
    %191 = vector.load %arg29[%c0_144, %c128_145] : memref<16x401xf32, #tpu.memory_space<vmem>>, vector<12x256xf32>
    %c48_146 = arith.constant 48 : index
    %c0_147 = arith.constant 0 : index
    %192 = vector.load %arg30[%c48_146, %c0_147] : memref<144x256xf32, #tpu.memory_space<vmem>>, vector<12x256xf32>
    tpu.vector_store %arg30[%c48_146, %c0_147], %191 {strides = array<i32>} : memref<144x256xf32, #tpu.memory_space<vmem>>, vector<12x256xf32>,
    %c0_148 = arith.constant 0 : index
    %c129_149 = arith.constant 129 : index
    %193 = vector.load %arg29[%c0_148, %c129_149] : memref<16x401xf32, #tpu.memory_space<vmem>>, vector<12x256xf32>
    %cst_150 = arith.constant 0.000000e+00 : f32
    %194 = vector.shape_cast %22 : vector<1x256xi1> to vector<1x256xi1>
    %195 = vector.broadcast %194 : vector<1x256xi1> to vector<12x256xi1>
    %196 = vector.broadcast %cst_150 : f32 to vector<12x256xf32>
    %197 = arith.select %195, %193, %196 : vector<12x256xi1>, vector<12x256xf32>
    %c60 = arith.constant 60 : index
    %c0_151 = arith.constant 0 : index
    %198 = vector.load %arg30[%c60, %c0_151] : memref<144x256xf32, #tpu.memory_space<vmem>>, vector<12x256xf32>
    tpu.vector_store %arg30[%c60, %c0_151], %197 {strides = array<i32>} : memref<144x256xf32, #tpu.memory_space<vmem>>, vector<12x256xf32>,
    %c0_152 = arith.constant 0 : index
    %c143_153 = arith.constant 143 : index
    %199 = vector.load %arg29[%c0_152, %c143_153] : memref<16x401xf32, #tpu.memory_space<vmem>>, vector<12x256xf32>
    %cst_154 = arith.constant 0.000000e+00 : f32
    %200 = vector.shape_cast %20 : vector<1x256xi1> to vector<1x256xi1>
    %201 = vector.broadcast %200 : vector<1x256xi1> to vector<12x256xi1>
    %202 = vector.broadcast %cst_154 : f32 to vector<12x256xf32>
    %203 = arith.select %201, %199, %202 : vector<12x256xi1>, vector<12x256xf32>
    %c72 = arith.constant 72 : index
    %c0_155 = arith.constant 0 : index
    %204 = vector.load %arg30[%c72, %c0_155] : memref<144x256xf32, #tpu.memory_space<vmem>>, vector<12x256xf32>
    tpu.vector_store %arg30[%c72, %c0_155], %203 {strides = array<i32>} : memref<144x256xf32, #tpu.memory_space<vmem>>, vector<12x256xf32>,
    %c0_156 = arith.constant 0 : index
    %c144_157 = arith.constant 144 : index
    %205 = vector.load %arg29[%c0_156, %c144_157] : memref<16x401xf32, #tpu.memory_space<vmem>>, vector<12x256xf32>
    %c84 = arith.constant 84 : index
    %c0_158 = arith.constant 0 : index
    %206 = vector.load %arg30[%c84, %c0_158] : memref<144x256xf32, #tpu.memory_space<vmem>>, vector<12x256xf32>
    tpu.vector_store %arg30[%c84, %c0_158], %205 {strides = array<i32>} : memref<144x256xf32, #tpu.memory_space<vmem>>, vector<12x256xf32>,
    %c0_159 = arith.constant 0 : index
    %c145_160 = arith.constant 145 : index
    %207 = vector.load %arg29[%c0_159, %c145_160] : memref<16x401xf32, #tpu.memory_space<vmem>>, vector<12x256xf32>
    %cst_161 = arith.constant 0.000000e+00 : f32
    %208 = vector.shape_cast %22 : vector<1x256xi1> to vector<1x256xi1>
    %209 = vector.broadcast %208 : vector<1x256xi1> to vector<12x256xi1>
    %210 = vector.broadcast %cst_161 : f32 to vector<12x256xf32>
    %211 = arith.select %209, %207, %210 : vector<12x256xi1>, vector<12x256xf32>
    %c96_162 = arith.constant 96 : index
    %c0_163 = arith.constant 0 : index
    %212 = vector.load %arg30[%c96_162, %c0_163] : memref<144x256xf32, #tpu.memory_space<vmem>>, vector<12x256xf32>
    tpu.vector_store %arg30[%c96_162, %c0_163], %211 {strides = array<i32>} : memref<144x256xf32, #tpu.memory_space<vmem>>, vector<12x256xf32>,
    %c0_164 = arith.constant 0 : index
    %c0_165 = arith.constant 0 : index
    %213 = vector.load %arg13[%c0_164, %c0_165] : memref<8x108xf32, #tpu.memory_space<vmem>>, vector<8x108xf32>
    %c0_166 = arith.constant 0 : index
    %c0_167 = arith.constant 0 : index
    %214 = vector.load %arg30[%c0_166, %c0_167] : memref<144x256xf32, #tpu.memory_space<vmem>>, vector<108x256xf32>
    %cst_168 = arith.constant dense<0.000000e+00> : vector<8x256xf32>
    %215 = tpu.matmul %213, %214, %cst_168 {dimension_numbers = #tpu.dot_dimension_numbers<[1], [0], [0], [1], [0, 0, 1, 1], [], []>} : vector<8x108xf32>, vector<108x256xf32>, vector<8x256xf32> -> vector<8x256xf32>
    %216 = vector.broadcast %168 : vector<8x1xf32> to vector<8x256xf32>
    %217 = arith.mulf %215, %216 : vector<8x256xf32>
    %218 = vector.broadcast %169 : vector<8x1xf32> to vector<8x256xf32>
    %219 = arith.addf %217, %218 : vector<8x256xf32>
    %cst_169 = arith.constant 0.000000e+00 : f32
    %220 = vector.broadcast %cst_169 : f32 to vector<8x256xf32>
    %221 = arith.maximumf %219, %220 : vector<8x256xf32>
    %c0_170 = arith.constant 0 : index
    %c0_171 = arith.constant 0 : index
    %222 = vector.load %arg22[%c0_170, %c0_171] : memref<16x8xf32, #tpu.memory_space<vmem>>, vector<16x8xf32>
    %cst_172 = arith.constant dense<0.000000e+00> : vector<16x256xf32>
    %223 = tpu.matmul %222, %221, %cst_172 {dimension_numbers = #tpu.dot_dimension_numbers<[1], [0], [0], [1], [0, 0, 1, 1], [], []>} : vector<16x8xf32>, vector<8x256xf32>, vector<16x256xf32> -> vector<16x256xf32>
    %224 = arith.addf %165, %223 : vector<16x256xf32>
    %c0_173 = arith.constant 0 : index
    %c0_174 = arith.constant 0 : index
    %c0_175 = arith.constant 0 : index
    %225 = vector.load %arg4[%c0_173, %c0_174, %c0_175] : memref<1x6x256xf32, #tpu.memory_space<vmem>>, vector<1x6x256xf32>
    %226 = vector.shape_cast %225 : vector<1x6x256xf32> to vector<6x256xf32>
    %c0_176 = arith.constant 0 : index
    %c0_177 = arith.constant 0 : index
    %227 = vector.load %arg17[%c0_176, %c0_177] : memref<8x1xf32, #tpu.memory_space<vmem>>, vector<8x1xf32>
    %c0_178 = arith.constant 0 : index
    %c0_179 = arith.constant 0 : index
    %228 = vector.load %arg20[%c0_178, %c0_179] : memref<8x1xf32, #tpu.memory_space<vmem>>, vector<8x1xf32>
    %c0_180 = arith.constant 0 : index
    %c128_181 = arith.constant 128 : index
    %229 = vector.load %arg29[%c0_180, %c128_181] : memref<16x401xf32, #tpu.memory_space<vmem>>, vector<6x256xf32>
    tpu.vector_store %arg29[%c0_180, %c128_181], %226 {strides = array<i32>} : memref<16x401xf32, #tpu.memory_space<vmem>>, vector<6x256xf32>,
    %c0_182 = arith.constant 0 : index
    %c111_183 = arith.constant 111 : index
    %230 = vector.load %arg29[%c0_182, %c111_183] : memref<16x401xf32, #tpu.memory_space<vmem>>, vector<6x256xf32>
    %cst_184 = arith.constant 0.000000e+00 : f32
    %231 = vector.shape_cast %20 : vector<1x256xi1> to vector<1x256xi1>
    %232 = vector.broadcast %231 : vector<1x256xi1> to vector<6x256xi1>
    %233 = vector.broadcast %cst_184 : f32 to vector<6x256xf32>
    %234 = arith.select %232, %230, %233 : vector<6x256xi1>, vector<6x256xf32>
    %c0_185 = arith.constant 0 : index
    %c0_186 = arith.constant 0 : index
    %235 = vector.load %arg30[%c0_185, %c0_186] : memref<144x256xf32, #tpu.memory_space<vmem>>, vector<6x256xf32>
    tpu.vector_store %arg30[%c0_185, %c0_186], %234 {strides = array<i32>} : memref<144x256xf32, #tpu.memory_space<vmem>>, vector<6x256xf32>,
    %c0_187 = arith.constant 0 : index
    %c112_188 = arith.constant 112 : index
    %236 = vector.load %arg29[%c0_187, %c112_188] : memref<16x401xf32, #tpu.memory_space<vmem>>, vector<6x256xf32>
    %c6 = arith.constant 6 : index
    %c0_189 = arith.constant 0 : index
    %237 = vector.load %arg30[%c6, %c0_189] : memref<144x256xf32, #tpu.memory_space<vmem>>, vector<6x256xf32>
    tpu.vector_store %arg30[%c6, %c0_189], %236 {strides = array<i32>} : memref<144x256xf32, #tpu.memory_space<vmem>>, vector<6x256xf32>,
    %c0_190 = arith.constant 0 : index
    %c113_191 = arith.constant 113 : index
    %238 = vector.load %arg29[%c0_190, %c113_191] : memref<16x401xf32, #tpu.memory_space<vmem>>, vector<6x256xf32>
    %cst_192 = arith.constant 0.000000e+00 : f32
    %239 = vector.shape_cast %22 : vector<1x256xi1> to vector<1x256xi1>
    %240 = vector.broadcast %239 : vector<1x256xi1> to vector<6x256xi1>
    %241 = vector.broadcast %cst_192 : f32 to vector<6x256xf32>
    %242 = arith.select %240, %238, %241 : vector<6x256xi1>, vector<6x256xf32>
    %c12_193 = arith.constant 12 : index
    %c0_194 = arith.constant 0 : index
    %243 = vector.load %arg30[%c12_193, %c0_194] : memref<144x256xf32, #tpu.memory_space<vmem>>, vector<6x256xf32>
    tpu.vector_store %arg30[%c12_193, %c0_194], %242 {strides = array<i32>} : memref<144x256xf32, #tpu.memory_space<vmem>>, vector<6x256xf32>,
    %c0_195 = arith.constant 0 : index
    %c127_196 = arith.constant 127 : index
    %244 = vector.load %arg29[%c0_195, %c127_196] : memref<16x401xf32, #tpu.memory_space<vmem>>, vector<6x256xf32>
    %cst_197 = arith.constant 0.000000e+00 : f32
    %245 = vector.shape_cast %20 : vector<1x256xi1> to vector<1x256xi1>
    %246 = vector.broadcast %245 : vector<1x256xi1> to vector<6x256xi1>
    %247 = vector.broadcast %cst_197 : f32 to vector<6x256xf32>
    %248 = arith.select %246, %244, %247 : vector<6x256xi1>, vector<6x256xf32>
    %c18 = arith.constant 18 : index
    %c0_198 = arith.constant 0 : index
    %249 = vector.load %arg30[%c18, %c0_198] : memref<144x256xf32, #tpu.memory_space<vmem>>, vector<6x256xf32>
    tpu.vector_store %arg30[%c18, %c0_198], %248 {strides = array<i32>} : memref<144x256xf32, #tpu.memory_space<vmem>>, vector<6x256xf32>,
    %c0_199 = arith.constant 0 : index
    %c128_200 = arith.constant 128 : index
    %250 = vector.load %arg29[%c0_199, %c128_200] : memref<16x401xf32, #tpu.memory_space<vmem>>, vector<6x256xf32>
    %c24_201 = arith.constant 24 : index
    %c0_202 = arith.constant 0 : index
    %251 = vector.load %arg30[%c24_201, %c0_202] : memref<144x256xf32, #tpu.memory_space<vmem>>, vector<6x256xf32>
    tpu.vector_store %arg30[%c24_201, %c0_202], %250 {strides = array<i32>} : memref<144x256xf32, #tpu.memory_space<vmem>>, vector<6x256xf32>,
    %c0_203 = arith.constant 0 : index
    %c129_204 = arith.constant 129 : index
    %252 = vector.load %arg29[%c0_203, %c129_204] : memref<16x401xf32, #tpu.memory_space<vmem>>, vector<6x256xf32>
    %cst_205 = arith.constant 0.000000e+00 : f32
    %253 = vector.shape_cast %22 : vector<1x256xi1> to vector<1x256xi1>
    %254 = vector.broadcast %253 : vector<1x256xi1> to vector<6x256xi1>
    %255 = vector.broadcast %cst_205 : f32 to vector<6x256xf32>
    %256 = arith.select %254, %252, %255 : vector<6x256xi1>, vector<6x256xf32>
    %c30 = arith.constant 30 : index
    %c0_206 = arith.constant 0 : index
    %257 = vector.load %arg30[%c30, %c0_206] : memref<144x256xf32, #tpu.memory_space<vmem>>, vector<6x256xf32>
    tpu.vector_store %arg30[%c30, %c0_206], %256 {strides = array<i32>} : memref<144x256xf32, #tpu.memory_space<vmem>>, vector<6x256xf32>,
    %c0_207 = arith.constant 0 : index
    %c143_208 = arith.constant 143 : index
    %258 = vector.load %arg29[%c0_207, %c143_208] : memref<16x401xf32, #tpu.memory_space<vmem>>, vector<6x256xf32>
    %cst_209 = arith.constant 0.000000e+00 : f32
    %259 = vector.shape_cast %20 : vector<1x256xi1> to vector<1x256xi1>
    %260 = vector.broadcast %259 : vector<1x256xi1> to vector<6x256xi1>
    %261 = vector.broadcast %cst_209 : f32 to vector<6x256xf32>
    %262 = arith.select %260, %258, %261 : vector<6x256xi1>, vector<6x256xf32>
    %c36_210 = arith.constant 36 : index
    %c0_211 = arith.constant 0 : index
    %263 = vector.load %arg30[%c36_210, %c0_211] : memref<144x256xf32, #tpu.memory_space<vmem>>, vector<6x256xf32>
    tpu.vector_store %arg30[%c36_210, %c0_211], %262 {strides = array<i32>} : memref<144x256xf32, #tpu.memory_space<vmem>>, vector<6x256xf32>,
    %c0_212 = arith.constant 0 : index
    %c144_213 = arith.constant 144 : index
    %264 = vector.load %arg29[%c0_212, %c144_213] : memref<16x401xf32, #tpu.memory_space<vmem>>, vector<6x256xf32>
    %c42 = arith.constant 42 : index
    %c0_214 = arith.constant 0 : index
    %265 = vector.load %arg30[%c42, %c0_214] : memref<144x256xf32, #tpu.memory_space<vmem>>, vector<6x256xf32>
    tpu.vector_store %arg30[%c42, %c0_214], %264 {strides = array<i32>} : memref<144x256xf32, #tpu.memory_space<vmem>>, vector<6x256xf32>,
    %c0_215 = arith.constant 0 : index
    %c145_216 = arith.constant 145 : index
    %266 = vector.load %arg29[%c0_215, %c145_216] : memref<16x401xf32, #tpu.memory_space<vmem>>, vector<6x256xf32>
    %cst_217 = arith.constant 0.000000e+00 : f32
    %267 = vector.shape_cast %22 : vector<1x256xi1> to vector<1x256xi1>
    %268 = vector.broadcast %267 : vector<1x256xi1> to vector<6x256xi1>
    %269 = vector.broadcast %cst_217 : f32 to vector<6x256xf32>
    %270 = arith.select %268, %266, %269 : vector<6x256xi1>, vector<6x256xf32>
    %c48_218 = arith.constant 48 : index
    %c0_219 = arith.constant 0 : index
    %271 = vector.load %arg30[%c48_218, %c0_219] : memref<144x256xf32, #tpu.memory_space<vmem>>, vector<6x256xf32>
    tpu.vector_store %arg30[%c48_218, %c0_219], %270 {strides = array<i32>} : memref<144x256xf32, #tpu.memory_space<vmem>>, vector<6x256xf32>,
    %c0_220 = arith.constant 0 : index
    %c0_221 = arith.constant 0 : index
    %272 = vector.load %arg14[%c0_220, %c0_221] : memref<8x54xf32, #tpu.memory_space<vmem>>, vector<8x54xf32>
    %c0_222 = arith.constant 0 : index
    %c0_223 = arith.constant 0 : index
    %273 = vector.load %arg30[%c0_222, %c0_223] : memref<144x256xf32, #tpu.memory_space<vmem>>, vector<54x256xf32>
    %cst_224 = arith.constant dense<0.000000e+00> : vector<8x256xf32>
    %274 = tpu.matmul %272, %273, %cst_224 {dimension_numbers = #tpu.dot_dimension_numbers<[1], [0], [0], [1], [0, 0, 1, 1], [], []>} : vector<8x54xf32>, vector<54x256xf32>, vector<8x256xf32> -> vector<8x256xf32>
    %275 = vector.broadcast %227 : vector<8x1xf32> to vector<8x256xf32>
    %276 = arith.mulf %274, %275 : vector<8x256xf32>
    %277 = vector.broadcast %228 : vector<8x1xf32> to vector<8x256xf32>
    %278 = arith.addf %276, %277 : vector<8x256xf32>
    %cst_225 = arith.constant 0.000000e+00 : f32
    %279 = vector.broadcast %cst_225 : f32 to vector<8x256xf32>
    %280 = arith.maximumf %278, %279 : vector<8x256xf32>
    %c0_226 = arith.constant 0 : index
    %c0_227 = arith.constant 0 : index
    %281 = vector.load %arg23[%c0_226, %c0_227] : memref<16x8xf32, #tpu.memory_space<vmem>>, vector<16x8xf32>
    %cst_228 = arith.constant dense<0.000000e+00> : vector<16x256xf32>
    %282 = tpu.matmul %281, %280, %cst_228 {dimension_numbers = #tpu.dot_dimension_numbers<[1], [0], [0], [1], [0, 0, 1, 1], [], []>} : vector<16x8xf32>, vector<8x256xf32>, vector<16x256xf32> -> vector<16x256xf32>
    %283 = arith.addf %224, %282 : vector<16x256xf32>
    %c0_229 = arith.constant 0 : index
    %c0_230 = arith.constant 0 : index
    %284 = vector.load %arg24[%c0_229, %c0_230] : memref<16x1xf32, #tpu.memory_space<vmem>>, vector<16x1xf32>
    %285 = vector.broadcast %284 : vector<16x1xf32> to vector<16x256xf32>
    %286 = arith.mulf %283, %285 : vector<16x256xf32>
    %c0_231 = arith.constant 0 : index
    %c0_232 = arith.constant 0 : index
    %287 = vector.load %arg25[%c0_231, %c0_232] : memref<16x1xf32, #tpu.memory_space<vmem>>, vector<16x1xf32>
    %288 = vector.broadcast %287 : vector<16x1xf32> to vector<16x256xf32>
    %289 = arith.addf %286, %288 : vector<16x256xf32>
    %cst_233 = arith.constant 0.000000e+00 : f32
    %290 = vector.broadcast %cst_233 : f32 to vector<16x256xf32>
    %291 = arith.maximumf %289, %290 : vector<16x256xf32>
    %cst_234 = arith.constant dense<0.000000e+00> : vector<256xf32>
    %292 = vector.multi_reduction <add>, %291, %cst_234 [0] : vector<16x256xf32> to vector<256xf32>
    %293 = vector.shape_cast %292 : vector<256xf32> to vector<1x256xf32>
    %cst_235 = arith.constant 1.600000e+01 : f32
    %294 = vector.broadcast %cst_235 : f32 to vector<1x256xf32>
    %295 = arith.divf %293, %294 : vector<1x256xf32>
    %cst_236 = arith.constant dense<0xFF800000> : vector<256xf32>
    %296 = vector.multi_reduction <maximumf>, %291, %cst_236 [0] : vector<16x256xf32> to vector<256xf32>
    %297 = vector.shape_cast %296 : vector<256xf32> to vector<1x256xf32>
    %c0_237 = arith.constant 0 : index
    %c128_238 = arith.constant 128 : index
    %298 = vector.load %arg29[%c0_237, %c128_238] : memref<16x401xf32, #tpu.memory_space<vmem>>, vector<1x256xf32>
    tpu.vector_store %arg29[%c0_237, %c128_238], %295 {strides = array<i32>} : memref<16x401xf32, #tpu.memory_space<vmem>>, vector<1x256xf32>,
    %c1 = arith.constant 1 : index
    %c128_239 = arith.constant 128 : index
    %299 = vector.load %arg29[%c1, %c128_239] : memref<16x401xf32, #tpu.memory_space<vmem>>, vector<1x256xf32>
    tpu.vector_store %arg29[%c1, %c128_239], %297 {strides = array<i32>} : memref<16x401xf32, #tpu.memory_space<vmem>>, vector<1x256xf32>,
    %cst_240 = arith.constant 0.000000e+00 : f32
    %300 = vector.broadcast %cst_240 : f32 to vector<1x256xf32>
    %c0_241 = arith.constant 0 : index
    %301 = memref.load %arg27[%c0_241] : memref<1xf32, #tpu.memory_space<smem>>
    %302 = vector.broadcast %301 : f32 to vector<1x256xf32>
    %303 = arith.addf %300, %302 : vector<1x256xf32>
    %c0_242 = arith.constant 0 : index
    %c111_243 = arith.constant 111 : index
    %304 = vector.load %arg29[%c0_242, %c111_243] : memref<16x401xf32, #tpu.memory_space<vmem>>, vector<2x256xf32>
    %cst_244 = arith.constant 0.000000e+00 : f32
    %305 = vector.shape_cast %20 : vector<1x256xi1> to vector<1x256xi1>
    %306 = vector.broadcast %305 : vector<1x256xi1> to vector<2x256xi1>
    %307 = vector.broadcast %cst_244 : f32 to vector<2x256xf32>
    %308 = arith.select %306, %304, %307 : vector<2x256xi1>, vector<2x256xf32>
    %309 = vector.extract_strided_slice %308 {offsets = [0, 0], sizes = [1, 256], strides = [1, 1]} : vector<2x256xf32> to vector<1x256xf32>
    %c0_245 = arith.constant 0 : index
    %c0_246 = arith.constant 0 : index
    %310 = memref.load %arg26[%c0_245, %c0_246] : memref<9x2xf32, #tpu.memory_space<smem>>
    %311 = vector.broadcast %310 : f32 to vector<1x256xf32>
    %312 = arith.mulf %309, %311 : vector<1x256xf32>
    %313 = arith.addf %303, %312 : vector<1x256xf32>
    %314 = vector.extract_strided_slice %308 {offsets = [1, 0], sizes = [1, 256], strides = [1, 1]} : vector<2x256xf32> to vector<1x256xf32>
    %c0_247 = arith.constant 0 : index
    %c1_248 = arith.constant 1 : index
    %315 = memref.load %arg26[%c0_247, %c1_248] : memref<9x2xf32, #tpu.memory_space<smem>>
    %316 = vector.broadcast %315 : f32 to vector<1x256xf32>
    %317 = arith.mulf %314, %316 : vector<1x256xf32>
    %318 = arith.addf %313, %317 : vector<1x256xf32>
    %c0_249 = arith.constant 0 : index
    %c112_250 = arith.constant 112 : index
    %319 = vector.load %arg29[%c0_249, %c112_250] : memref<16x401xf32, #tpu.memory_space<vmem>>, vector<2x256xf32>
    %320 = vector.extract_strided_slice %319 {offsets = [0, 0], sizes = [1, 256], strides = [1, 1]} : vector<2x256xf32> to vector<1x256xf32>
    %c1_251 = arith.constant 1 : index
    %c0_252 = arith.constant 0 : index
    %321 = memref.load %arg26[%c1_251, %c0_252] : memref<9x2xf32, #tpu.memory_space<smem>>
    %322 = vector.broadcast %321 : f32 to vector<1x256xf32>
    %323 = arith.mulf %320, %322 : vector<1x256xf32>
    %324 = arith.addf %318, %323 : vector<1x256xf32>
    %325 = vector.extract_strided_slice %319 {offsets = [1, 0], sizes = [1, 256], strides = [1, 1]} : vector<2x256xf32> to vector<1x256xf32>
    %c1_253 = arith.constant 1 : index
    %c1_254 = arith.constant 1 : index
    %326 = memref.load %arg26[%c1_253, %c1_254] : memref<9x2xf32, #tpu.memory_space<smem>>
    %327 = vector.broadcast %326 : f32 to vector<1x256xf32>
    %328 = arith.mulf %325, %327 : vector<1x256xf32>
    %329 = arith.addf %324, %328 : vector<1x256xf32>
    %c0_255 = arith.constant 0 : index
    %c113_256 = arith.constant 113 : index
    %330 = vector.load %arg29[%c0_255, %c113_256] : memref<16x401xf32, #tpu.memory_space<vmem>>, vector<2x256xf32>
    %cst_257 = arith.constant 0.000000e+00 : f32
    %331 = vector.shape_cast %22 : vector<1x256xi1> to vector<1x256xi1>
    %332 = vector.broadcast %331 : vector<1x256xi1> to vector<2x256xi1>
    %333 = vector.broadcast %cst_257 : f32 to vector<2x256xf32>
    %334 = arith.select %332, %330, %333 : vector<2x256xi1>, vector<2x256xf32>
    %335 = vector.extract_strided_slice %334 {offsets = [0, 0], sizes = [1, 256], strides = [1, 1]} : vector<2x256xf32> to vector<1x256xf32>
    %c2 = arith.constant 2 : index
    %c0_258 = arith.constant 0 : index
    %336 = memref.load %arg26[%c2, %c0_258] : memref<9x2xf32, #tpu.memory_space<smem>>
    %337 = vector.broadcast %336 : f32 to vector<1x256xf32>
    %338 = arith.mulf %335, %337 : vector<1x256xf32>
    %339 = arith.addf %329, %338 : vector<1x256xf32>
    %340 = vector.extract_strided_slice %334 {offsets = [1, 0], sizes = [1, 256], strides = [1, 1]} : vector<2x256xf32> to vector<1x256xf32>
    %c2_259 = arith.constant 2 : index
    %c1_260 = arith.constant 1 : index
    %341 = memref.load %arg26[%c2_259, %c1_260] : memref<9x2xf32, #tpu.memory_space<smem>>
    %342 = vector.broadcast %341 : f32 to vector<1x256xf32>
    %343 = arith.mulf %340, %342 : vector<1x256xf32>
    %344 = arith.addf %339, %343 : vector<1x256xf32>
    %c0_261 = arith.constant 0 : index
    %c127_262 = arith.constant 127 : index
    %345 = vector.load %arg29[%c0_261, %c127_262] : memref<16x401xf32, #tpu.memory_space<vmem>>, vector<2x256xf32>
    %cst_263 = arith.constant 0.000000e+00 : f32
    %346 = vector.shape_cast %20 : vector<1x256xi1> to vector<1x256xi1>
    %347 = vector.broadcast %346 : vector<1x256xi1> to vector<2x256xi1>
    %348 = vector.broadcast %cst_263 : f32 to vector<2x256xf32>
    %349 = arith.select %347, %345, %348 : vector<2x256xi1>, vector<2x256xf32>
    %350 = vector.extract_strided_slice %349 {offsets = [0, 0], sizes = [1, 256], strides = [1, 1]} : vector<2x256xf32> to vector<1x256xf32>
    %c3 = arith.constant 3 : index
    %c0_264 = arith.constant 0 : index
    %351 = memref.load %arg26[%c3, %c0_264] : memref<9x2xf32, #tpu.memory_space<smem>>
    %352 = vector.broadcast %351 : f32 to vector<1x256xf32>
    %353 = arith.mulf %350, %352 : vector<1x256xf32>
    %354 = arith.addf %344, %353 : vector<1x256xf32>
    %355 = vector.extract_strided_slice %349 {offsets = [1, 0], sizes = [1, 256], strides = [1, 1]} : vector<2x256xf32> to vector<1x256xf32>
    %c3_265 = arith.constant 3 : index
    %c1_266 = arith.constant 1 : index
    %356 = memref.load %arg26[%c3_265, %c1_266] : memref<9x2xf32, #tpu.memory_space<smem>>
    %357 = vector.broadcast %356 : f32 to vector<1x256xf32>
    %358 = arith.mulf %355, %357 : vector<1x256xf32>
    %359 = arith.addf %354, %358 : vector<1x256xf32>
    %c0_267 = arith.constant 0 : index
    %c128_268 = arith.constant 128 : index
    %360 = vector.load %arg29[%c0_267, %c128_268] : memref<16x401xf32, #tpu.memory_space<vmem>>, vector<2x256xf32>
    %361 = vector.extract_strided_slice %360 {offsets = [0, 0], sizes = [1, 256], strides = [1, 1]} : vector<2x256xf32> to vector<1x256xf32>
    %c4 = arith.constant 4 : index
    %c0_269 = arith.constant 0 : index
    %362 = memref.load %arg26[%c4, %c0_269] : memref<9x2xf32, #tpu.memory_space<smem>>
    %363 = vector.broadcast %362 : f32 to vector<1x256xf32>
    %364 = arith.mulf %361, %363 : vector<1x256xf32>
    %365 = arith.addf %359, %364 : vector<1x256xf32>
    %366 = vector.extract_strided_slice %360 {offsets = [1, 0], sizes = [1, 256], strides = [1, 1]} : vector<2x256xf32> to vector<1x256xf32>
    %c4_270 = arith.constant 4 : index
    %c1_271 = arith.constant 1 : index
    %367 = memref.load %arg26[%c4_270, %c1_271] : memref<9x2xf32, #tpu.memory_space<smem>>
    %368 = vector.broadcast %367 : f32 to vector<1x256xf32>
    %369 = arith.mulf %366, %368 : vector<1x256xf32>
    %370 = arith.addf %365, %369 : vector<1x256xf32>
    %c0_272 = arith.constant 0 : index
    %c129_273 = arith.constant 129 : index
    %371 = vector.load %arg29[%c0_272, %c129_273] : memref<16x401xf32, #tpu.memory_space<vmem>>, vector<2x256xf32>
    %cst_274 = arith.constant 0.000000e+00 : f32
    %372 = vector.shape_cast %22 : vector<1x256xi1> to vector<1x256xi1>
    %373 = vector.broadcast %372 : vector<1x256xi1> to vector<2x256xi1>
    %374 = vector.broadcast %cst_274 : f32 to vector<2x256xf32>
    %375 = arith.select %373, %371, %374 : vector<2x256xi1>, vector<2x256xf32>
    %376 = vector.extract_strided_slice %375 {offsets = [0, 0], sizes = [1, 256], strides = [1, 1]} : vector<2x256xf32> to vector<1x256xf32>
    %c5 = arith.constant 5 : index
    %c0_275 = arith.constant 0 : index
    %377 = memref.load %arg26[%c5, %c0_275] : memref<9x2xf32, #tpu.memory_space<smem>>
    %378 = vector.broadcast %377 : f32 to vector<1x256xf32>
    %379 = arith.mulf %376, %378 : vector<1x256xf32>
    %380 = arith.addf %370, %379 : vector<1x256xf32>
    %381 = vector.extract_strided_slice %375 {offsets = [1, 0], sizes = [1, 256], strides = [1, 1]} : vector<2x256xf32> to vector<1x256xf32>
    %c5_276 = arith.constant 5 : index
    %c1_277 = arith.constant 1 : index
    %382 = memref.load %arg26[%c5_276, %c1_277] : memref<9x2xf32, #tpu.memory_space<smem>>
    %383 = vector.broadcast %382 : f32 to vector<1x256xf32>
    %384 = arith.mulf %381, %383 : vector<1x256xf32>
    %385 = arith.addf %380, %384 : vector<1x256xf32>
    %c0_278 = arith.constant 0 : index
    %c143_279 = arith.constant 143 : index
    %386 = vector.load %arg29[%c0_278, %c143_279] : memref<16x401xf32, #tpu.memory_space<vmem>>, vector<2x256xf32>
    %cst_280 = arith.constant 0.000000e+00 : f32
    %387 = vector.shape_cast %20 : vector<1x256xi1> to vector<1x256xi1>
    %388 = vector.broadcast %387 : vector<1x256xi1> to vector<2x256xi1>
    %389 = vector.broadcast %cst_280 : f32 to vector<2x256xf32>
    %390 = arith.select %388, %386, %389 : vector<2x256xi1>, vector<2x256xf32>
    %391 = vector.extract_strided_slice %390 {offsets = [0, 0], sizes = [1, 256], strides = [1, 1]} : vector<2x256xf32> to vector<1x256xf32>
    %c6_281 = arith.constant 6 : index
    %c0_282 = arith.constant 0 : index
    %392 = memref.load %arg26[%c6_281, %c0_282] : memref<9x2xf32, #tpu.memory_space<smem>>
    %393 = vector.broadcast %392 : f32 to vector<1x256xf32>
    %394 = arith.mulf %391, %393 : vector<1x256xf32>
    %395 = arith.addf %385, %394 : vector<1x256xf32>
    %396 = vector.extract_strided_slice %390 {offsets = [1, 0], sizes = [1, 256], strides = [1, 1]} : vector<2x256xf32> to vector<1x256xf32>
    %c6_283 = arith.constant 6 : index
    %c1_284 = arith.constant 1 : index
    %397 = memref.load %arg26[%c6_283, %c1_284] : memref<9x2xf32, #tpu.memory_space<smem>>
    %398 = vector.broadcast %397 : f32 to vector<1x256xf32>
    %399 = arith.mulf %396, %398 : vector<1x256xf32>
    %400 = arith.addf %395, %399 : vector<1x256xf32>
    %c0_285 = arith.constant 0 : index
    %c144_286 = arith.constant 144 : index
    %401 = vector.load %arg29[%c0_285, %c144_286] : memref<16x401xf32, #tpu.memory_space<vmem>>, vector<2x256xf32>
    %402 = vector.extract_strided_slice %401 {offsets = [0, 0], sizes = [1, 256], strides = [1, 1]} : vector<2x256xf32> to vector<1x256xf32>
    %c7 = arith.constant 7 : index
    %c0_287 = arith.constant 0 : index
    %403 = memref.load %arg26[%c7, %c0_287] : memref<9x2xf32, #tpu.memory_space<smem>>
    %404 = vector.broadcast %403 : f32 to vector<1x256xf32>
    %405 = arith.mulf %402, %404 : vector<1x256xf32>
    %406 = arith.addf %400, %405 : vector<1x256xf32>
    %407 = vector.extract_strided_slice %401 {offsets = [1, 0], sizes = [1, 256], strides = [1, 1]} : vector<2x256xf32> to vector<1x256xf32>
    %c7_288 = arith.constant 7 : index
    %c1_289 = arith.constant 1 : index
    %408 = memref.load %arg26[%c7_288, %c1_289] : memref<9x2xf32, #tpu.memory_space<smem>>
    %409 = vector.broadcast %408 : f32 to vector<1x256xf32>
    %410 = arith.mulf %407, %409 : vector<1x256xf32>
    %411 = arith.addf %406, %410 : vector<1x256xf32>
    %c0_290 = arith.constant 0 : index
    %c145_291 = arith.constant 145 : index
    %412 = vector.load %arg29[%c0_290, %c145_291] : memref<16x401xf32, #tpu.memory_space<vmem>>, vector<2x256xf32>
    %cst_292 = arith.constant 0.000000e+00 : f32
    %413 = vector.shape_cast %22 : vector<1x256xi1> to vector<1x256xi1>
    %414 = vector.broadcast %413 : vector<1x256xi1> to vector<2x256xi1>
    %415 = vector.broadcast %cst_292 : f32 to vector<2x256xf32>
    %416 = arith.select %414, %412, %415 : vector<2x256xi1>, vector<2x256xf32>
    %417 = vector.extract_strided_slice %416 {offsets = [0, 0], sizes = [1, 256], strides = [1, 1]} : vector<2x256xf32> to vector<1x256xf32>
    %c8_293 = arith.constant 8 : index
    %c0_294 = arith.constant 0 : index
    %418 = memref.load %arg26[%c8_293, %c0_294] : memref<9x2xf32, #tpu.memory_space<smem>>
    %419 = vector.broadcast %418 : f32 to vector<1x256xf32>
    %420 = arith.mulf %417, %419 : vector<1x256xf32>
    %421 = arith.addf %411, %420 : vector<1x256xf32>
    %422 = vector.extract_strided_slice %416 {offsets = [1, 0], sizes = [1, 256], strides = [1, 1]} : vector<2x256xf32> to vector<1x256xf32>
    %c8_295 = arith.constant 8 : index
    %c1_296 = arith.constant 1 : index
    %423 = memref.load %arg26[%c8_295, %c1_296] : memref<9x2xf32, #tpu.memory_space<smem>>
    %424 = vector.broadcast %423 : f32 to vector<1x256xf32>
    %425 = arith.mulf %422, %424 : vector<1x256xf32>
    %426 = arith.addf %421, %425 : vector<1x256xf32>
    %427 = arith.negf %426 : vector<1x256xf32>
    %428 = math.exp %427 : vector<1x256xf32>
    %cst_297 = arith.constant 1.000000e+00 : f32
    %429 = vector.broadcast %cst_297 : f32 to vector<1x256xf32>
    %430 = arith.addf %429, %428 : vector<1x256xf32>
    %431 = arith.divf %429, %430 : vector<1x256xf32>
    %432 = vector.broadcast %431 : vector<1x256xf32> to vector<16x256xf32>
    %433 = arith.mulf %291, %432 : vector<16x256xf32>
    %434 = arith.addf %105, %433 : vector<16x256xf32>
    %435 = vector.shape_cast %434 : vector<16x256xf32> to vector<1x16x256xf32>
    %c0_298 = arith.constant 0 : index
    %c0_299 = arith.constant 0 : index
    %c0_300 = arith.constant 0 : index
    %436 = vector.load %arg28[%c0_298, %c0_299, %c0_300] : memref<1x16x256xf32, #tpu.memory_space<vmem>>, vector<1x16x256xf32>
    tpu.vector_store %arg28[%c0_298, %c0_299, %c0_300], %435 {strides = array<i32>} : memref<1x16x256xf32, #tpu.memory_space<vmem>>, vector<1x16x256xf32>,
    return
  }
  func.func @transform_0(%arg0: i32) -> (i32, i32, i32) {
    %c0_i32 = arith.constant 0 : i32
    %c0_i32_0 = arith.constant 0 : i32
    %c0_i32_1 = arith.constant 0 : i32
    return %arg0, %c0_i32, %c0_i32_0 : i32, i32, i32
  }
  func.func @transform_1(%arg0: i32) -> (i32, i32, i32) {
    %c0_i32 = arith.constant 0 : i32
    %c0_i32_0 = arith.constant 0 : i32
    %c0_i32_1 = arith.constant 0 : i32
    return %arg0, %c0_i32, %c0_i32_0 : i32, i32, i32
  }
  func.func @transform_2(%arg0: i32) -> (i32, i32, i32) {
    %c0_i32 = arith.constant 0 : i32
    %c0_i32_0 = arith.constant 0 : i32
    %c0_i32_1 = arith.constant 0 : i32
    return %arg0, %c0_i32, %c0_i32_0 : i32, i32, i32
  }
  func.func @transform_3(%arg0: i32) -> (i32, i32, i32) {
    %c0_i32 = arith.constant 0 : i32
    %c0_i32_0 = arith.constant 0 : i32
    %c0_i32_1 = arith.constant 0 : i32
    return %arg0, %c0_i32, %c0_i32_0 : i32, i32, i32
  }
  func.func @transform_4(%arg0: i32) -> (i32, i32) {
    %c0_i32 = arith.constant 0 : i32
    %c0_i32_0 = arith.constant 0 : i32
    %c0_i32_1 = arith.constant 0 : i32
    return %c0_i32, %c0_i32_0 : i32, i32
  }
  func.func @transform_5(%arg0: i32) -> (i32, i32) {
    %c0_i32 = arith.constant 0 : i32
    %c0_i32_0 = arith.constant 0 : i32
    %c0_i32_1 = arith.constant 0 : i32
    return %c0_i32, %c0_i32_0 : i32, i32
  }
  func.func @transform_6(%arg0: i32) -> (i32, i32) {
    %c0_i32 = arith.constant 0 : i32
    %c0_i32_0 = arith.constant 0 : i32
    %c0_i32_1 = arith.constant 0 : i32
    return %c0_i32, %c0_i32_0 : i32, i32
  }
  func.func @transform_7(%arg0: i32) -> (i32, i32) {
    %c0_i32 = arith.constant 0 : i32
    %c0_i32_0 = arith.constant 0 : i32
    %c0_i32_1 = arith.constant 0 : i32
    return %c0_i32, %c0_i32_0 : i32, i32
  }
  func.func @transform_8(%arg0: i32) -> (i32, i32) {
    %c0_i32 = arith.constant 0 : i32
    %c0_i32_0 = arith.constant 0 : i32
    %c0_i32_1 = arith.constant 0 : i32
    return %c0_i32, %c0_i32_0 : i32, i32
  }
  func.func @transform_9(%arg0: i32) -> (i32, i32) {
    %c0_i32 = arith.constant 0 : i32
    %c0_i32_0 = arith.constant 0 : i32
    %c0_i32_1 = arith.constant 0 : i32
    return %c0_i32, %c0_i32_0 : i32, i32
  }
  func.func @transform_10(%arg0: i32) -> (i32, i32) {
    %c0_i32 = arith.constant 0 : i32
    %c0_i32_0 = arith.constant 0 : i32
    %c0_i32_1 = arith.constant 0 : i32
    return %c0_i32, %c0_i32_0 : i32, i32
  }
  func.func @transform_11(%arg0: i32) -> (i32, i32) {
    %c0_i32 = arith.constant 0 : i32
    %c0_i32_0 = arith.constant 0 : i32
    %c0_i32_1 = arith.constant 0 : i32
    return %c0_i32, %c0_i32_0 : i32, i32
  }
  func.func @transform_12(%arg0: i32) -> (i32, i32) {
    %c0_i32 = arith.constant 0 : i32
    %c0_i32_0 = arith.constant 0 : i32
    %c0_i32_1 = arith.constant 0 : i32
    return %c0_i32, %c0_i32_0 : i32, i32
  }
  func.func @transform_13(%arg0: i32) -> (i32, i32) {
    %c0_i32 = arith.constant 0 : i32
    %c0_i32_0 = arith.constant 0 : i32
    %c0_i32_1 = arith.constant 0 : i32
    return %c0_i32, %c0_i32_0 : i32, i32
  }
  func.func @transform_14(%arg0: i32) -> (i32, i32) {
    %c0_i32 = arith.constant 0 : i32
    %c0_i32_0 = arith.constant 0 : i32
    %c0_i32_1 = arith.constant 0 : i32
    return %c0_i32, %c0_i32_0 : i32, i32
  }
  func.func @transform_15(%arg0: i32) -> (i32, i32) {
    %c0_i32 = arith.constant 0 : i32
    %c0_i32_0 = arith.constant 0 : i32
    %c0_i32_1 = arith.constant 0 : i32
    return %c0_i32, %c0_i32_0 : i32, i32
  }
  func.func @transform_16(%arg0: i32) -> (i32, i32) {
    %c0_i32 = arith.constant 0 : i32
    %c0_i32_0 = arith.constant 0 : i32
    %c0_i32_1 = arith.constant 0 : i32
    return %c0_i32, %c0_i32_0 : i32, i32
  }
  func.func @transform_17(%arg0: i32) -> (i32, i32) {
    %c0_i32 = arith.constant 0 : i32
    %c0_i32_0 = arith.constant 0 : i32
    %c0_i32_1 = arith.constant 0 : i32
    return %c0_i32, %c0_i32_0 : i32, i32
  }
  func.func @transform_18(%arg0: i32) -> (i32, i32) {
    %c0_i32 = arith.constant 0 : i32
    %c0_i32_0 = arith.constant 0 : i32
    %c0_i32_1 = arith.constant 0 : i32
    return %c0_i32, %c0_i32_0 : i32, i32
  }
  func.func @transform_19(%arg0: i32) -> (i32, i32) {
    %c0_i32 = arith.constant 0 : i32
    %c0_i32_0 = arith.constant 0 : i32
    %c0_i32_1 = arith.constant 0 : i32
    return %c0_i32, %c0_i32_0 : i32, i32
  }
  func.func @transform_20(%arg0: i32) -> (i32, i32) {
    %c0_i32 = arith.constant 0 : i32
    %c0_i32_0 = arith.constant 0 : i32
    %c0_i32_1 = arith.constant 0 : i32
    return %c0_i32, %c0_i32_0 : i32, i32
  }
  func.func @transform_21(%arg0: i32) -> (i32, i32) {
    %c0_i32 = arith.constant 0 : i32
    %c0_i32_0 = arith.constant 0 : i32
    %c0_i32_1 = arith.constant 0 : i32
    return %c0_i32, %c0_i32_0 : i32, i32
  }
  func.func @transform_22(%arg0: i32) -> (i32, i32) {
    %c0_i32 = arith.constant 0 : i32
    %c0_i32_0 = arith.constant 0 : i32
    %c0_i32_1 = arith.constant 0 : i32
    return %c0_i32, %c0_i32_0 : i32, i32
  }
  func.func @transform_23(%arg0: i32) -> (i32, i32) {
    %c0_i32 = arith.constant 0 : i32
    %c0_i32_0 = arith.constant 0 : i32
    %c0_i32_1 = arith.constant 0 : i32
    return %c0_i32, %c0_i32_0 : i32, i32
  }
  func.func @transform_24(%arg0: i32) -> (i32, i32) {
    %c0_i32 = arith.constant 0 : i32
    %c0_i32_0 = arith.constant 0 : i32
    %c0_i32_1 = arith.constant 0 : i32
    return %c0_i32, %c0_i32_0 : i32, i32
  }
  func.func @transform_25(%arg0: i32) -> (i32, i32) {
    %c0_i32 = arith.constant 0 : i32
    %c0_i32_0 = arith.constant 0 : i32
    %c0_i32_1 = arith.constant 0 : i32
    return %c0_i32, %c0_i32_0 : i32, i32
  }
  func.func @transform_26(%arg0: i32) -> i32 {
    %c0_i32 = arith.constant 0 : i32
    %c0_i32_0 = arith.constant 0 : i32
    return %c0_i32 : i32
  }
  func.func @transform_27(%arg0: i32) -> (i32, i32, i32) {
    %c0_i32 = arith.constant 0 : i32
    %c0_i32_0 = arith.constant 0 : i32
    %c0_i32_1 = arith.constant 0 : i32
    return %arg0, %c0_i32, %c0_i32_0 : i32, i32, i32
  }
}

</mosaic_0001>

<bundles_post_ra>
// kernel: tpu_custom_call.1
= control target key start
LH: loop header
LB: loop body
LE: loop exit
PB: predicated region body
PF: predicated region fallthrough
CT: control target
= control target key end

     0   :  { %s5084_s0 = inlined_call_operand.vmem [shape: f32[2,16,256], index: 0, kind: input, shape index: {}]   ;;  %s5085_s1 = inlined_call_operand.vmem [shape: f32[2,8,256], index: 1, kind: input, shape index: {}]   ;;  %s5086_s2 = inlined_call_operand.vmem [shape: f32[2,12,256], index: 2, kind: input, shape index: {}]   ;;  %s5087_s3 = inlined_call_operand.vmem [shape: f32[2,6,256], index: 3, kind: input, shape index: {}]   ;;  %s5088_s4 = inlined_call_operand.vmem [shape: f32[16,144], index: 4, kind: input, shape index: {}]   ;;  %s5089_s5 = inlined_call_operand.vmem [shape: f32[16,1], index: 5, kind: input, shape index: {}]   ;;  %s5090_s6 = inlined_call_operand.vmem [shape: f32[16,1], index: 6, kind: input, shape index: {}]   ;;  %s5091_s7 = inlined_call_operand.vmem [shape: f32[16,8], index: 7, kind: input, shape index: {}]   ;;  %s5092_s8 = inlined_call_operand.vmem [shape: f32[1,8], index: 8, kind: input, shape index: {}]   ;;  %s5093_s9 = inlined_call_operand.vmem [shape: f32[16,8], index: 9, kind: input, shape index: {}]   ;;  %s5094_s10 = inlined_call_operand.vmem [shape: f32[16,1], index: 10, kind: input, shape index: {}]   ;;  %s5095_s11 = inlined_call_operand.vmem [shape: f32[8,72], index: 11, kind: input, shape index: {}]   ;;  %s5096_s12 = inlined_call_operand.vmem [shape: f32[8,108], index: 12, kind: input, shape index: {}]   ;;  %s5097_s13 = inlined_call_operand.vmem [shape: f32[8,54], index: 13, kind: input, shape index: {}]   ;;  %s5098_s14 = inlined_call_operand.vmem [shape: f32[8,1], index: 14, kind: input, shape index: {}]   ;;  %s5099_s15 = inlined_call_operand.vmem [shape: f32[8,1], index: 15, kind: input, shape index: {}]   ;;  %s5100_s16 = inlined_call_operand.vmem [shape: f32[8,1], index: 16, kind: input, shape index: {}]   ;;  %s5101_s17 = inlined_call_operand.vmem [shape: f32[8,1], index: 17, kind: input, shape index: {}]   ;;  %s5102_s18 = inlined_call_operand.vmem [shape: f32[8,1], index: 18, kind: input, shape index: {}]   ;;  %s5103_s19 = inlined_call_operand.vmem [shape: f32[8,1], index: 19, kind: input, shape index: {}]   ;;  %s5104_s20 = inlined_call_operand.vmem [shape: f32[16,8], index: 20, kind: input, shape index: {}]   ;;  %s5105_s21 = inlined_call_operand.vmem [shape: f32[16,8], index: 21, kind: input, shape index: {}]   ;;  %s5106_s22 = inlined_call_operand.vmem [shape: f32[16,8], index: 22, kind: input, shape index: {}]   ;;  %s5107_s23 = inlined_call_operand.vmem [shape: f32[16,1], index: 23, kind: input, shape index: {}]   ;;  %s5108_s24 = inlined_call_operand.vmem [shape: f32[16,1], index: 24, kind: input, shape index: {}]   ;;  %s5109_s25 = inlined_call_operand.vmem [shape: f32[9,2], index: 25, kind: input, shape index: {}]   ;;  %s5110_s26 = inlined_call_operand.<no memory space> [shape: f32[1], index: 26, kind: input, shape index: {}]   ;;  %s5111_s27 = inlined_call_operand.hbm [shape: f32[2,16,256], index: 27, kind: output, shape index: {}]  }
   0x1   :  { %5147 = sst [smem:[#allocation18_spill]] %s5084_s0 }
   0x2   :  { %5148 = sst [smem:[#allocation19_spill]] %s5085_s1 }
   0x3   :  { %5149 = sst [smem:[#allocation20_spill]] %s5086_s2 }
   0x4   :  { %5150 = sst [smem:[#allocation21_spill]] %s5087_s3 }
   0x5   :  { %5151 = sst [smem:[#allocation22_spill]] %s5088_s4 }
   0x6   :  { %5152 = sst [smem:[#allocation23_spill]] %s5089_s5 }
   0x7   :  { %5153 = sst [smem:[#allocation24_spill]] %s5090_s6 }
   0x8   :  { %5154 = sst [smem:[#allocation25_spill]] %s5091_s7 }
   0x9   :  { %5155 = sst [smem:[#allocation26_spill]] %s5092_s8 }
   0xa   :  { %5156 = sst [smem:[#allocation27_spill]] %s5093_s9 }
   0xb   :  { %5157 = sst [smem:[#allocation28_spill]] %s5094_s10 }
   0xc   :  { %5158 = sst [smem:[#allocation29_spill]] %s5095_s11 }
   0xd   :  { %5159 = sst [smem:[#allocation30_spill]] %s5096_s12 }
   0xe   :  { %5160 = sst [smem:[#allocation31_spill]] %s5097_s13 }
   0xf   :  { %5161 = sst [smem:[#allocation32_spill]] %s5109_s25 }
  0x10   :  { %32 = sst [smem:[#allocation4]] %s5110_s26 }
  0x11   :  { %33 = vsyncpa [#allocation7], 0 }
  0x12   :  { %34 = vsyncpa [#allocation6], 0 }
  0x13   :  { %36 = vsyncpa [#allocation6 + $0x1], 0  ;;  %s3779_s8 = smov 0   ;;  %s3781_s30 = smov 0  }
  0x14   :  { %s3783_s9 = smov 0   ;;  %s3785_s5 = smov 0  }
  0x15 LB: > { %5162 = sst [smem:[#allocation11_spill]] %s3606_s8  ;;  %s3800_s26 = sadd.s32 4294967295, %s3618_s5   ;;  %s3618_s5 = sphi %s3785_s5, %s5217_s5   ;;  %s3614_s9 = sphi %s3783_s9, %s5219_s9   ;;  %s3610_s30 = sphi %s3781_s30, %s5221_s30   ;;  %s3606_s8 = sphi %s3779_s8, %s5220_s8  }
  0x16   : > { %5163 = sst [smem:[#allocation12_spill]] %s3614_s9  ;;  %s3290_s28 = sadd.s32 4294967294, %s3618_s5  }
  0x17   : > { %5164 = sst [smem:[#allocation13_spill]] %s3618_s5  ;;  %s3804_s0 = sadd.s32 1, %s3618_s5  }
  0x18   : > { %5165 = sst [smem:[#allocation14_spill]] %s3804_s0  ;;  %s636_s10 = sadd.s32 1, %s3614_s9 }
  0x19   : > { %s633_s29 = ssub.s32 %s3618_s5, %s3804_s0  ;;  %p646_p0 = scmp.ne.s32.totalorder %s3614_s9, %s3610_s30 }
  0x1a   : > { %p634_p1 = scmp.eq.s32.totalorder %s633_s29, 0  ;;  %p647_p2 = scmp.eq.s32.totalorder %s3800_s26, 1 }
  0x1b   : > { %p652_p3 = scmp.ne.s32.totalorder %s3610_s30, %s3606_s8  ;;  %p653_p4 = scmp.eq.s32.totalorder %s3290_s28, 1 }
  0x1c   : > { %s3815_s1 = scalar_select %p634_p1, %s3614_s9, %s636_s10  }
  0x1d   : > { %p3817_p5 = por %p647_p2, %p646_p0  ;;  %p3821_p6 = por %p653_p4, %p652_p3 }
  0x1e   : > { %5166 = sst [smem:[#allocation15_spill]] %s3815_s1  ;;  %p3291_p7 = scmp.ge.s32.totalorder %s3618_s5, 1 }
  0x1f   : > { %s5167_s6 = scalar_select %p3817_p5, 1, 0 }
  0x20   : > { %s5169_s11 = scalar_select %p3821_p6, 1, 0 }
  0x21   : > { %5168 = sst [smem:[#allocation16_spill]] %s5167_s6  ;;  %p660_p8 = scmp.lt.s32.totalorder %s3618_s5, 3 }
  0x22   : > { %5170 = sst [smem:[#allocation17_spill]] %s5169_s11  ;;  %p3376_p9 = scmp.eq.s32.totalorder %s3800_s26, 0 }
  0x23   : > { %p661_p10 = pnand %p3291_p7, %p660_p8  ;;  %s5171_s25 = sld [smem:[#allocation32_spill]] }
  0x24   : > { %s3620_s4 = smov [#allocation5]   ;;  %s3621_s28 = smov 128  }
  0x25   : > { %p3368_p11 = pneg %p661_p10  ;;  %s3622_s10 = smov 8  }
  0x26   : > { %785 = sbr.rel (%p661_p10) target bundleno = 1126 (0x466), region = 128 }
  0x27   : > { %p3369_p12 = pnand %p3376_p9, %p3368_p11 }
  0x29   : > { %s734_s7 = sshll.u32 %s5171_s25, 4  ;;  %s735_s7 = int_to_ptr.vmem [resolvable:$true] %s734_s7 }
  0x2a   : > { %3371 = dma.vmem_to_smem (!%p3369_p12), %s735_s7, 256, %s3620_s4, [#allocation7], %s3621_s28, %s3621_s28, %s3622_s10  }
  0x2b   : > { %3597 = dma.done.wait (%p3376_p9), [#allocation7], 256  }
  0x2c   : > { %3599 = vsyncadd (%p3376_p9), [#allocation7], 4294967040 }
  0x2d   : > { %792 = sfence }
  0x2e   : > { %p874_p13 = scmp.lt.s32.totalorder %s3800_s26, 1  ;;  %vm897_vm0 = vcmask 138240   ;;  %v3623_v0 = vmov 0.0   ;;  %s5172_s28 = sld [smem:[#allocation18_spill]]  ;;  %v903_v21 = vlaneseq  ;;  %vm5141_vm1 = vcmask 908288  }
  0x2f   : > { %894 = vst [vmem:[#allocation2] sm:$0xff] %v3623_v0  ;;  %s5173_s9 = sld [smem:[#allocation19_spill]]  ;;  %s5134_s6 = smov 1   ;;  %vm5130_vm3 = vcmask 916480   ;;  %vm1859_vm4 = vcmask 1043456   ;;  %vm5142_vm5 = vcmask 924672  }
  0x30   : > { %s875_s29 = scalar_select %p874_p13, %s3800_s26, 1  ;;  %899 = vst [vmem:[#allocation2 + $0x20] sm:$0xff] %v3623_v0  ;;  %v3990_v22 = vand.u32 127, %v903_v21  ;;  %vm5143_vm7 = vcmask 1039360   ;;  %vm1096_vm9 = vcmask 7168   ;;  %vm1055_vm10 = vcmask 121856  }
  0x31   : > { %902 = vst.msk [vmem:[#allocation2 + $0x38] sm:$0xff] %vm897_vm0, %v3623_v0  ;;  %s5136_s7 = smov 15   ;;  %s5126_s11 = smov 112   ;;  %vm1014_vm11 = vcmask 130048   ;;  %vm1735_vm13 = vcmask 588800   ;;  %vm2203_vm14 = vcmask 883712  }
  0x32   : > { %s3357_s2 = sshll.u32 %s875_s29, 5  ;;  %s3358_s3 = sshll.u32 %s875_s29, 4  ;;  %898 = vst.msk [vmem:[#allocation2 + $0x18] sm:$0xff] %vm897_vm0, %v3623_v0  ;;  %v905_v26 = vadd.s32 128, %v3990_v22  ;;  %vm2598_vm15 = vcmask 1045504  }
  0x33   : > { %s5174_s29 = sld [smem:[#allocation20_spill]]  ;;  %s5133_s4 = smov 127  }
  0x34   : > { %s3842_s10 = scalar_lea.vmem %s5172_s28, %s3357_s2  ;;  %v917_v27 = vand.u32 15, %v905_v26  ;;  %s5182_s25 = sld [smem:[#allocation22_spill]] }
  0x35   : > { %v3845_v1 = vld [vmem:[%s3842_s10 + $0x10] sm:$0xff]  ;;  %s883_s0 = scalar_lea.vmem %s5173_s9, %s3358_s3  ;;  %v3861_v3 = vld [vmem:[%s3842_s10] sm:$0xff]  ;;  %v3864_v4 = vld [vmem:[%s3842_s10 + $0x18] sm:$0xff]  ;;  %s5175_s9 = sld [smem:[#allocation21_spill]] }
  0x36   : > { %944 = vst [vmem:[#allocation2 + $0x28] sm:$0xff] %v3845_v1  ;;  %1092 = vrot.lane.b32.xlu0 %v3845_v1, %s5134_s6  ;;  %1051 = vrot.lane.b32.xlu2 %v3845_v1, %s5136_s7  ;;  %v3867_v5 = vld [vmem:[%s883_s0 + $0x8] sm:$0xff]  ;;  %v3880_v9 = vld [vmem:[%s883_s0] sm:$0xff]  ;;  %s5131_s0 = smov 16   ;;  %vm4009_vm2 = vcmp.le.s32.totalorder %v917_v27, 14  ;;  %vm4073_vm6 = vcmp.ge.s32.totalorder %v917_v27, 1 }
  0x37   : > { %1086 = vrot.lane.b32.xlu1 %v3861_v3, %s5134_s6  ;;  %945 = vst [vmem:[#allocation2 + $0x30] sm:$0xff] %v3864_v4  ;;  %v3885_v11 = vld [vmem:[%s3842_s10 + $0x8] sm:$0xff]  ;;  %s5186_s8 = sld [smem:[#allocation23_spill]] }
  0x38   : > { %1637 = vst [vmem:[#allocation3 + $0x110] sm:$0xff] %v3867_v5  ;;  %v3895_v13 = vld [vmem:[#allocation2 + $0x38] sm:$0xff]  ;;  %s5189_s12 = sld [smem:[#allocation30_spill]] }
  0x39   : > { %s888_s5 = scalar_lea.vmem %s5174_s29, %s3357_s2  ;;  %1636 = vst [vmem:[#allocation3 + $0x80] sm:$0xff] %v3880_v9  ;;  %v3901_v14 = vld [vmem:[#allocation2 + $0x18] sm:$0xff]  ;;  %s3629_s2 = smov 113  }
  0x3a   : > { %v3856_v2 = vld [vmem:[%s888_s5] sm:$0xff]  ;;  %v1800_v6 = vld [vmem:[%s888_s5 + $0x18] sm:$0xf]  ;;  %v3872_v7 = vld [vmem:[%s888_s5 + $0x8] sm:$0xff]  ;;  %v2103_v53 = vrot.slane %v3901_v14, 4  ;;  %s5185_s29 = sld [smem:[#allocation29_spill]] }
  0x3b   : > { %1803 = vst [vmem:[#allocation2 + $0x8] sm:$0xff] %v3856_v2  ;;  %s893_s1 = scalar_lea.vmem %s5175_s9, %s3358_s3  ;;  %v1799_v8 = vld [vmem:[%s888_s5 + $0x10] sm:$0xf]  ;;  %s5128_s5 = smov 111   ;;  %v2139_v41 = vld [vmem:[#allocation2 + $0x38] sm:$0xf] }
  0x3c   : > { %1804 = vst [vmem:[#allocation2 + $0x10] sm:$0xff] %v3872_v7  ;;  %v2376_v10 = vld [vmem:[%s893_s1 + $0x8] sm:$0x3f]  ;;  %v2375_v12 = vld [vmem:[%s893_s1] sm:$0x3f]  ;;  %s5138_s3 = smov 17  }
  0x3d   : > { %1806 = vst [vmem:[#allocation2 + $0x30] sm:$0xf] %v1800_v6  ;;  %v4053_v45 = vrot.slane %v3872_v7, 4  ;;  %v2094_v52 = vld [vmem:[#allocation2 + $0x38] sm:$0xf]  ;;  %s5188_s1 = sld [smem:[#allocation24_spill]] }
  0x3e   : > { %1992 = vst [vmem:[#allocation3 + $0x38] sm:$0xff] %v3872_v7  ;;  %1094 = vrot.lane.b32.xlu0 %v3864_v4, %s5134_s6  ;;  %1053 = vrot.lane.b32.xlu2 %v3864_v4, %s5136_s7  ;;  %v2108_v54 = vrot.slane %v2094_v52, 4  ;;  %v2000_v27 = vld [vmem:[#allocation2 + $0x38] sm:$0xf]  ;;  %s5190_s13 = sld [smem:[#allocation31_spill]] }
  0x3f   : > { %1805 = vst [vmem:[#allocation2 + $0x28] sm:$0xf] %v1799_v8  ;;  %1088 = vrot.lane.b32.xlu1 %v3885_v11, %s5134_s6  ;;  %v2054_v8 = vld [vmem:[#allocation2 + $0x38] sm:$0xf]  ;;  %s3334_s9 = sld [smem:[#allocation5 + $0x80]] }
  0x40   : > { %1991 = vst [vmem:[#allocation3 + $0xf8] sm:$0xff] %v3856_v2  ;;  %v2109_v58 = vsel %vm1859_vm4, %v2103_v53, %v2108_v54  ;;  %s4943_s28 = sld [smem:[#allocation5 + $0x181]] }
  0x41   : > { %2380 = vst [vmem:[#allocation2 + $0x10] sm:$0x3f] %v2376_v10 }
  0x42   : > { %2379 = vst [vmem:[#allocation2 + $0x8] sm:$0x3f] %v2375_v12 }
  0x44   : > { %v2093_v42 = vld [vmem:[#allocation2 + $0x30] sm:$0xf] }
  0x45   : > { %v2138_v43 = vld [vmem:[#allocation2 + $0x30] sm:$0xf]  ;;  %v2106_v46 = vrot.slane %v2093_v42, 4 }
  0x46   : > { %1260 = vrot.lane.b32.xlu0 %v3864_v4, %s5128_s5  ;;  %1045 = vrot.lane.b32.xlu2 %v3861_v3, %s5136_s7  ;;  %v1990_v49 = vld [vmem:[#allocation2 + $0x30] sm:$0xf]  ;;  %v1937_v52 = vld [vmem:[#allocation2 + $0x28] sm:$0xf] }
  0x47   : > { %1262 = vrot.lane.b32.xlu1 %v3895_v13, %s5128_s5  ;;  %v2107_v51 = vsel %vm1859_vm4, %v4053_v45, %v2106_v46  ;;  %v2053_v61 = vld [vmem:[#allocation2 + $0x30] sm:$0xf] }
  0x4e   : > { %1047 = vrot.lane.b32.xlu0 %v3885_v11, %s5136_s7  ;;  %1256 = vrot.lane.b32.xlu2 %v3901_v14, %s5128_s5 }
  0x4f   : > { %1254 = vrot.lane.b32.xlu1 %v3885_v11, %s5128_s5 }
  0x56   : > { %1704 = vrot.lane.b32.xlu0 %v3867_v5, %s5128_s5  ;;  %1010 = vrot.lane.b32.xlu2 %v3845_v1, %s5131_s0 }
  0x57   : > { %1706 = vrot.lane.b32.xlu1 %v3901_v14, %s5128_s5 }
  0x5e   : > { %1012 = vrot.lane.b32.xlu0 %v3864_v4, %s5131_s0  ;;  %1688 = vrot.lane.b32.xlu2 %v3901_v14, %s5126_s11 }
  0x5f   : > { %1686 = vrot.lane.b32.xlu1 %v3867_v5, %s5126_s11 }
  0x66   : > { %1666 = vrot.lane.b32.xlu0 %v3867_v5, %s3629_s2  ;;  %1004 = vrot.lane.b32.xlu2 %v3861_v3, %s5131_s0 }
  0x67   : > { %1668 = vrot.lane.b32.xlu1 %v3901_v14, %s3629_s2 }
  0x6e   : > { %1006 = vrot.lane.b32.xlu0 %v3885_v11, %s5131_s0  ;;  %972 = vrot.lane.b32.xlu2 %v3864_v4, %s5138_s3 }
  0x6f   : > { %970 = vrot.lane.b32.xlu1 %v3845_v1, %s5138_s3 }
  0x76   : > { %1646 = vrot.lane.b32.xlu0 %v3867_v5, %s5133_s4  ;;  %964 = vrot.lane.b32.xlu2 %v3861_v3, %s5138_s3 }
  0x77   : > { %1648 = vrot.lane.b32.xlu1 %v3901_v14, %s5133_s4 }
  0x7e   : > { %966 = vrot.lane.b32.xlu0 %v3885_v11, %s5138_s3  ;;  %1624 = vrot.lane.b32.xlu2 %v3867_v5, %s5134_s6 }
  0x7f   : > { %1622 = vrot.lane.b32.xlu1 %v3880_v9, %s5134_s6 }
  0x86   : > { %1602 = vrot.lane.b32.xlu0 %v3880_v9, %s5136_s7  ;;  %3428 = vrot.lane.b32.xlu2 %v3623_v0, %s5134_s6 }
  0x87   : > { %1604 = vrot.lane.b32.xlu1 %v3867_v5, %s5136_s7 }
  0x8e   : > { %1584 = vrot.lane.b32.xlu0 %v3880_v9, %s5131_s0  ;;  %1564 = vrot.lane.b32.xlu2 %v3880_v9, %s5138_s3 }
  0x8f   : > { %1586 = vrot.lane.b32.xlu1 %v3867_v5, %s5131_s0 }
  0x90   : > { %v3957_v15 = vpop.permute.xlu2 %1051 }
  0x96   : > { %1566 = vrot.lane.b32.xlu0 %v3867_v5, %s5138_s3  ;;  %1258 = vrot.lane.b32.xlu2 %v3845_v1, %s5128_s5 }
  0x97   : > { %3433 = vrot.lane.b32.xlu1 %v3623_v0, %s5136_s7 }
  0x98   : > { %v3965_v16 = vpop.permute.xlu2 %1053 }
  0x9e   : > { %1252 = vrot.lane.b32.xlu0 %v3861_v3, %s5128_s5  ;;  %3438 = vrot.lane.b32.xlu2 %v3623_v0, %s5131_s0 }
  0x9f   : > { %1702 = vrot.lane.b32.xlu1 %v3880_v9, %s5128_s5 }
  0xa0   : > { %v3973_v17 = vpop.permute.xlu2 %1045 }
  0xa6   : > { %1684 = vrot.lane.b32.xlu0 %v3880_v9, %s5126_s11  ;;  %3443 = vrot.lane.b32.xlu2 %v3623_v0, %s5138_s3 }
  0xa7   : > { %1664 = vrot.lane.b32.xlu1 %v3880_v9, %s3629_s2 }
  0xa8   : > { %v3979_v18 = vpop.permute.xlu0 %1092  ;;  %v1257_v19 = vpop.permute.xlu2 %1256 }
  0xa9   : > { %v3983_v20 = vpop.permute.xlu1 %1086 }
  0xae   : > { %1644 = vrot.lane.b32.xlu0 %v3880_v9, %s5133_s4  ;;  %1600 = vrot.lane.b32.xlu2 %v3623_v0, %s5136_s7 }
  0xaf   : > { %1620 = vrot.lane.b32.xlu1 %v3623_v0, %s5134_s6 }
  0xb0   : > { %v3992_v23 = vpop.permute.xlu0 %1094  ;;  %v3996_v24 = vpop.permute.xlu2 %1010 }
  0xb1   : > { %v3998_v25 = vpop.permute.xlu1 %1088 }
  0xb6   : > { %1582 = vrot.lane.b32.xlu0 %v3623_v0, %s5131_s0  ;;  %1182 = vrot.lane.b32.xlu2 %v3864_v4, %s3629_s2 }
  0xb7   : > { %1562 = vrot.lane.b32.xlu1 %v3623_v0, %s5138_s3 }
  0xb8   : > { %v4005_v28 = vpop.permute.xlu0 %1260  ;;  %v1689_v29 = vpop.permute.xlu2 %1688 }
  0xb9   : > { %v1263_v30 = vpop.permute.xlu1 %1262 }
  0xba   : > { %v1268_v32 = vsel %vm5141_vm1, %v4005_v28, %v1263_v30 }
  0xbb   : > { %3493 = vmatpush.msk.msra.mxu3 %vm4009_vm2, %v1268_v32 }
  0xbe   : > { %1184 = vrot.lane.b32.xlu0 %v3895_v13, %s3629_s2  ;;  %1178 = vrot.lane.b32.xlu2 %v3901_v14, %s3629_s2 }
  0xbf   : > { %1176 = vrot.lane.b32.xlu1 %v3885_v11, %s3629_s2 }
  0xc0   : > { %v4021_v33 = vpop.permute.xlu0 %1047  ;;  %v4025_v34 = vpop.permute.xlu2 %1004 }
  0xc1   : > { %v4027_v35 = vpop.permute.xlu1 %1254 }
  0xc2   : > { %v1266_v36 = vsel %vm5141_vm1, %v4027_v35, %v1257_v19  ;;  %v1999_v19 = vld [vmem:[#allocation2 + $0x30] sm:$0xf] }
  0xc3   : > { %3494 = vmatpush.msk.msra.mxu3 %vm4009_vm2, %v1266_v36 }
  0xc6   : > { %1141 = vrot.lane.b32.xlu0 %v3864_v4, %s5133_s4  ;;  %1135 = vrot.lane.b32.xlu2 %v3885_v11, %s5133_s4 }
  0xc7   : > { %1143 = vrot.lane.b32.xlu1 %v3895_v13, %s5133_s4 }
  0xc8   : > { %v4037_v37 = vpop.permute.xlu0 %1704  ;;  %v4041_v38 = vpop.permute.xlu2 %972 }
  0xc9   : > { %v1707_v39 = vpop.permute.xlu1 %1706 }
  0xca   : > { %v1709_v40 = vsel %vm5141_vm1, %v4037_v37, %v1707_v39 }
  0xcb   : > { %3495 = vmatpush.msk.msrb.mxu3 %vm4009_vm2, %v1709_v40 }
  0xce   : > { %1137 = vrot.lane.b32.xlu0 %v3901_v14, %s5133_s4  ;;  %2156 = vrot.lane.b32.xlu2 %v2139_v41, %s5128_s5 }
  0xcf   : > { %2154 = vrot.lane.b32.xlu1 %v2138_v43, %s5128_s5 }
  0xd0   : > { %v4050_v44 = vpop.permute.xlu0 %1012  ;;  %v4056_v47 = vpop.permute.xlu2 %964 }
  0xd1   : > { %v4058_v48 = vpop.permute.xlu1 %1686 }
  0xd2   : > { %v1691_v50 = vsel %vm5130_vm3, %v4058_v48, %v1689_v29  ;;  %v910_v29 = vand.u32 15, %v3990_v22 }
  0xd3   : > { %1695 = vst [vmem:[#allocation3 + $0x78] sm:$0xff] %v1691_v50  ;;  %1767 = vmatpush.msrb.mxu3 %v1691_v50 }
  0xd4   : > { %1994 = vst [vmem:[#allocation3 + $0x78] sm:$0xf] %v1990_v49  ;;  %vm4112_vm8 = vcmp.le.s32.totalorder %v910_v29, 14  ;;  %vm4195_vm12 = vcmp.ge.s32.totalorder %v910_v29, 1 }
  0xd6   : > { %2148 = vrot.lane.b32.xlu0 %v3872_v7, %s5128_s5  ;;  %2118 = vrot.lane.b32.xlu2 %v2107_v51, %s5126_s11 }
  0xd7   : > { %2150 = vrot.lane.b32.xlu1 %v3901_v14, %s5128_s5 }
  0xd8   : > { %v4068_v55 = vpop.permute.xlu0 %1666  ;;  %v1625_v56 = vpop.permute.xlu2 %1624 }
  0xd9   : > { %v1669_v57 = vpop.permute.xlu1 %1668 }
  0xda   : > { %v1671_v60 = vsel %vm5142_vm5, %v4068_v55, %v1669_v57  ;;  %v2092_v57 = vld [vmem:[#allocation2 + $0x28] sm:$0xf] }
  0xdb   : > { %3496 = vmatpush.msk.msrb.mxu3 %vm4073_vm6, %v1671_v60 }
  0xde   : > { %2120 = vrot.lane.b32.xlu0 %v2109_v58, %s5126_s11  ;;  %2069 = vrot.lane.b32.xlu2 %v2053_v61, %s3629_s2  ;;  %v2137_v58 = vld [vmem:[#allocation2 + $0x28] sm:$0xf]  ;;  %v4168_v61 = vrot.slane %v3856_v2, 4 }
  0xdf   : > { %1180 = vrot.lane.b32.xlu1 %v3845_v1, %s3629_s2 }
  0xe0   : > { %v4083_v62 = vpop.permute.xlu0 %1006  ;;  %v4087_v63 = vpop.permute.xlu2 %3428 }
  0xe1   : > { %v4089_v6 = vpop.permute.xlu1 %970 }
  0xe6   : > { %2071 = vrot.lane.b32.xlu0 %v2054_v8, %s3629_s2  ;;  %2011 = vrot.lane.b32.xlu2 %v3901_v14, %s5133_s4  ;;  %v2104_v8 = vrot.slane %v2092_v57, 4 }
  0xe7   : > { %2009 = vrot.lane.b32.xlu1 %v3872_v7, %s5133_s4 }
  0xe8   : > { %v4094_v10 = vpop.permute.xlu0 %1646  ;;  %v4098_v12 = vpop.permute.xlu2 %1564 }
  0xe9   : > { %v1649_v13 = vpop.permute.xlu1 %1648 }
  0xea   : > { %v1651_v26 = vsel %vm5143_vm7, %v4094_v10, %v1649_v13 }
  0xeb   : > { %3497 = vmatpush.msk.msrb.mxu3 %vm4009_vm2, %v1651_v26 }
  0xed   : > { %1770 = vmatpush.msrb.mxu3 %v3867_v5 }
  0xee   : > { %2015 = vrot.lane.b32.xlu0 %v1999_v19, %s5133_s4  ;;  %2112 = vrot.lane.b32.xlu2 %v4053_v45, %s5126_s11 }
  0xef   : > { %2017 = vrot.lane.b32.xlu1 %v2000_v27, %s5133_s4  ;;  %v1897_v27 = vld [vmem:[#allocation2 + $0x28] sm:$0xf] }
  0xf0   : > { %v4108_v30 = vpop.permute.xlu0 %966  ;;  %v1259_v36 = vpop.permute.xlu2 %1258 }
  0xf1   : > { %v1267_v39 = vsel %vm5141_vm1, %v1259_v36, %v4005_v28  ;;  %v4120_v40 = vpop.permute.xlu1 %1622 }
  0xf2   : > { %v1627_v41 = vsel %vm1096_vm9, %v4120_v40, %v1625_v56  ;;  %3498 = vmatpush.msk.msra.mxu1 %vm4112_vm8, %v1267_v39  ;;  %v1938_v56 = vld [vmem:[#allocation2 + $0x30] sm:$0xf]  ;;  %v2105_v39 = vsel %vm1859_vm4, %v4168_v61, %v2104_v8  ;;  %v1716_v8 = vld [vmem:[%s5185_s29] sm:$0xff]  ;;  %s5191_s29 = sld [smem:[#allocation25_spill]] }
  0xf3   : > { %3499 = vmatpush.msk.msrb.mxu3 %vm4073_vm6, %v1627_v41  ;;  %v1282_v41 = vld [vmem:[%s5182_s25 + $0x8] sm:$0xff] }
  0xf4   : > { %3307 = vmatmul.msk.f32.vlgmr.msra.gmra.mxu3 %vm1014_vm11, %v1282_v41 }
  0xf6   : > { %2114 = vrot.lane.b32.xlu0 %v2103_v53, %s5126_s11  ;;  %2063 = vrot.lane.b32.xlu2 %v3872_v7, %s3629_s2 }
  0xf7   : > { %1174 = vrot.lane.b32.xlu1 %v3861_v3, %s3629_s2 }
  0xf8   : > { %v4131_v5 = vpop.permute.xlu0 %1602  ;;  %v4135_v28 = vpop.permute.xlu2 %3438 }
  0xf9   : > { %v1605_v42 = vpop.permute.xlu1 %1604 }
  0xfa   : > { %v1607_v43 = vsel %vm1055_vm10, %v4131_v5, %v1605_v42  ;;  %v1898_v42 = vld [vmem:[#allocation2 + $0x30] sm:$0xf] }
  0xfb   : > { %3500 = vmatpush.msk.msrb.mxu3 %vm4009_vm2, %v1607_v43  ;;  %v1989_v43 = vld [vmem:[#allocation2 + $0x28] sm:$0xf] }
  0xfe   : > { %2065 = vrot.lane.b32.xlu0 %v3901_v14, %s3629_s2  ;;  %1133 = vrot.lane.b32.xlu2 %v3861_v3, %s5133_s4 }
  0xff   : > { %1139 = vrot.lane.b32.xlu1 %v3845_v1, %s5133_s4 }
 0x100   : > { %v4145_v46 = vpop.permute.xlu0 %1584  ;;  %v4149_v49 = vpop.permute.xlu2 %3443 }
 0x101   : > { %v1587_v50 = vpop.permute.xlu1 %1586 }
 0x102   : > { %v1589_v51 = vsel %vm1014_vm11, %v4145_v46, %v1587_v50 }
 0x103   : > { %1593 = vst [vmem:[#allocation3 + $0x48] sm:$0xff] %v1589_v51  ;;  %1773 = vmatpush.msrb.mxu3 %v1589_v51 }
 0x106   : > { %1947 = vrot.lane.b32.xlu0 %v3856_v2, %s5134_s6  ;;  %1953 = vrot.lane.b32.xlu2 %v1937_v52, %s5134_s6 }
 0x107   : > { %1949 = vrot.lane.b32.xlu1 %v3872_v7, %s5134_s6 }
 0x108   : > { %v1567_v3 = vpop.permute.xlu0 %1566  ;;  %v1601_v53 = vpop.permute.xlu2 %1600 }
 0x109   : > { %v1569_v14 = vsel %vm897_vm0, %v4098_v12, %v1567_v3  ;;  %v4160_v54 = vpop.permute.xlu1 %3433 }
 0x10a   : > { %3501 = vmatpush.msk.msrb.mxu3 %vm4073_vm6, %v1569_v14  ;;  %v2052_v14 = vld [vmem:[#allocation2 + $0x28] sm:$0xf] }
 0x10e   : > { %1955 = vrot.lane.b32.xlu0 %v1938_v56, %s5134_s6  ;;  %2146 = vrot.lane.b32.xlu2 %v3856_v2, %s5128_s5  ;;  %v1284_v56 = vld [vmem:[%s5182_s25 + $0x18] sm:$0xff] }
 0x10f   : > { %2152 = vrot.lane.b32.xlu1 %v2137_v58, %s5128_s5  ;;  %3308 = vmatmul.msk.f32.gmra.mxu3 %vm1014_vm11, %v1284_v56  ;;  %v1606_v58 = vsel %vm1055_vm10, %v1601_v53, %v4131_v5 }
 0x110   : > { %v1253_v60 = vpop.permute.xlu0 %1252  ;;  %v4173_v19 = vpop.permute.xlu2 %1182 }
 0x111   : > { %v1265_v13 = vsel %vm5141_vm1, %v1253_v60, %v4027_v35  ;;  %v1703_v26 = vpop.permute.xlu1 %1702  ;;  %v1852_v60 = vld [vmem:[#allocation2 + $0x30] sm:$0xf] }
 0x112   : > { %3502 = vmatpush.msk.msra.mxu1 %vm4112_vm8, %v1265_v13  ;;  %v1708_v36 = vsel %vm5141_vm1, %v1703_v26, %v4037_v37  ;;  %v1851_v13 = vld [vmem:[#allocation2 + $0x28] sm:$0xf]  ;;  %v1867_v5 = vrot.slane %v1852_v60, 4 }
 0x113   : > { %3305 = vmatmul.msk.f32.vlgmr.msra.gmra.mxu1 %vm1014_vm11, %v1282_v41  ;;  %v1865_v26 = vrot.slane %v1851_v13, 4 }
 0x114   : > { %3503 = vmatpush.msk.msrb.mxu1 %vm4112_vm8, %v1708_v36 }
 0x116   : > { %1913 = vrot.lane.b32.xlu0 %v1897_v27, %s5136_s7  ;;  %2116 = vrot.lane.b32.xlu2 %v2105_v39, %s5126_s11  ;;  %v1868_v39 = vsel %vm1859_vm4, %v4053_v45, %v1867_v5  ;;  %v1896_v5 = vld [vmem:[#allocation2 + $0x20] sm:$0xf] }
 0x117   : > { %1915 = vrot.lane.b32.xlu1 %v1898_v42, %s5136_s7  ;;  %3312 = vmatmul.msk.f32.vlgmr.msrb.gmra.mxu3 %vm1735_vm13, %v1716_v8  ;;  %v3632_v42 = vmov 0  }
 0x118   : > { %v1685_v35 = vpop.permute.xlu0 %1684  ;;  %v1179_v50 = vpop.permute.xlu2 %1178  ;;  %3462 = vset.pattern.permute.xlu0 %v3632_v42  ;;  %3468 = vset.pattern.permute.xlu1 %v3632_v42 }
 0x119   : > { %v1690_v37 = vsel %vm5130_vm3, %v1685_v35, %v4058_v48  ;;  %v1665_v51 = vpop.permute.xlu1 %1664  ;;  %3469 = vset.pattern.permute.xlu2 %v3632_v42 }
 0x11a   : > { %1694 = vst [vmem:[#allocation3 + $0x8] sm:$0xff] %v1690_v37  ;;  %1747 = vmatpush.msrb.mxu1 %v1690_v37  ;;  %v1670_v3 = vsel %vm5142_vm5, %v1665_v51, %v4068_v55  ;;  %v1811_v51 = vld [vmem:[#allocation2 + $0x28] sm:$0xf] }
 0x11b   : > { %1993 = vst [vmem:[#allocation3 + $0x8] sm:$0xf] %v1989_v43  ;;  %3306 = vmatmul.msk.f32.gmra.mxu1 %vm1014_vm11, %v1284_v56 }
 0x11c   : > { %3504 = vmatpush.msk.msrb.mxu1 %vm4195_vm12, %v1670_v3 }
 0x11e   : > { %1907 = vrot.lane.b32.xlu0 %v3856_v2, %s5136_s7  ;;  %2067 = vrot.lane.b32.xlu2 %v2052_v14, %s3629_s2  ;;  %v1812_v14 = vld [vmem:[#allocation2 + $0x30] sm:$0xf] }
 0x11f   : > { %1909 = vrot.lane.b32.xlu1 %v3872_v7, %s5136_s7 }
 0x120   : > { %v1645_v22 = vpop.permute.xlu0 %1644  ;;  %v4215_v55 = vpop.permute.xlu2 %1135 }
 0x121   : > { %v1650_v48 = vsel %vm5143_vm7, %v1645_v22, %v4094_v10  ;;  %v1621_v29 = vpop.permute.xlu1 %1620  ;;  %v1998_v10 = vld [vmem:[#allocation2 + $0x28] sm:$0xf] }
 0x122   : > { %3505 = vmatpush.msk.msrb.mxu1 %vm4112_vm8, %v1650_v48  ;;  %v1626_v57 = vsel %vm1096_vm9, %v1621_v29, %v4120_v40  ;;  %v1850_v48 = vld [vmem:[#allocation2 + $0x20] sm:$0xf] }
 0x124   : > { %1750 = vmatpush.msrb.mxu1 %v3880_v9 }
 0x126   : > { %2007 = vrot.lane.b32.xlu0 %v3856_v2, %s5133_s4  ;;  %2110 = vrot.lane.b32.xlu2 %v4168_v61, %s5126_s11 }
 0x127   : > { %3506 = vmatpush.msk.msrb.mxu1 %vm4195_vm12, %v1626_v57  ;;  %2013 = vrot.lane.b32.xlu1 %v1998_v10, %s5133_s4 }
 0x128   : > { %v1583_v40 = vpop.permute.xlu0 %1582  ;;  %v2157_v53 = vpop.permute.xlu2 %2156 }
 0x129   : > { %v1588_v9 = vsel %vm1014_vm11, %v1583_v40, %v4145_v46  ;;  %3507 = vmatpush.msk.msrb.mxu1 %vm4112_vm8, %v1606_v58  ;;  %v1563_v27 = vpop.permute.xlu1 %1562  ;;  %v1866_v46 = vsel %vm1859_vm4, %v4168_v61, %v1865_v26  ;;  %v1863_v58 = vrot.slane %v1850_v48, 4 }
 0x12a   : > { %1592 = vst [vmem:[#allocation3 + $0x10] sm:$0xff] %v1588_v9  ;;  %v1568_v36 = vsel %vm897_vm0, %v1563_v27, %v4098_v12 }
 0x12b   : > { %1753 = vmatpush.msrb.mxu1 %v1588_v9 }
 0x12d   : > { %3508 = vmatpush.msk.msrb.mxu1 %vm4195_vm12, %v1568_v36  ;;  %v3452_v36 = vpack.i.bf16 0.0, %v1896_v5 }
 0x12e   : > { %2061 = vrot.lane.b32.xlu0 %v3856_v2, %s3629_s2  ;;  %1879 = vrot.lane.b32.xlu2 %v1868_v39, %s5131_s0 }
 0x12f   : > { %3311 = vmatmul.msk.f32.vlgmr.msrb.gmra.mxu1 %vm1735_vm13, %v1716_v8  ;;  %1877 = vrot.lane.b32.xlu1 %v1866_v46, %s5131_s0  ;;  %v1810_v46 = vld [vmem:[#allocation2 + $0x20] sm:$0xf]  ;;  %vm2594_vm13 = vcmask 441344  }
 0x130   : > { %v1185_v41 = vpop.permute.xlu0 %1184  ;;  %v4256_v35 = vpop.permute.xlu2 %2118 }
 0x131   : > { %v4254_v12 = vsel %vm5142_vm5, %v4173_v19, %v1185_v41  ;;  %v4261_v37 = vpop.permute.xlu1 %1176 }
 0x132   : > { %v1198_v43 = vsel %vm4073_vm6, %v4254_v12, 0.0  ;;  %v4265_v3 = vsel %vm5142_vm5, %v4261_v37, %v1179_v50  ;;  %v1860_v50 = vrot.slane %v3623_v0, 4 }
 0x133   : > { %1202 = vst [vmem:[#allocation3 + $0xc0] sm:$0xff] %v1198_v43  ;;  %v2511_v43 = vld [vmem:[#allocation2 + $0x10] sm:$0x3f] }
 0x134   : > { %v1864_v8 = vsel %vm1859_vm4, %v1860_v50, %v1863_v58 }
 0x135   : > { %v3457_v26 = vpack.i.bf16 %v1860_v50, %v1864_v8  ;;  %v2560_v8 = vld [vmem:[#allocation2 + $0x10] sm:$0x3f] }
 0x136   : > { %1827 = vrot.lane.b32.xlu0 %v1811_v51, %s5138_s3  ;;  %1871 = vrot.lane.b32.xlu2 %v4168_v61, %s5131_s0  ;;  %v1936_v61 = vld [vmem:[#allocation2 + $0x20] sm:$0xf] }
 0x137   : > { %1829 = vrot.lane.b32.xlu1 %v1812_v14, %s5138_s3  ;;  %v3463_v14 = vpack.i.bf16 0.0, %v1810_v46 }
 0x138   : > { %v4270_v56 = vpop.permute.xlu0 %1141  ;;  %v4273_v22 = vpop.permute.xlu2 %2069 }
 0x139   : > { %v1144_v29 = vpop.permute.xlu1 %1143 }
 0x13a   : > { %v4277_v57 = vsel %vm5143_vm7, %v4270_v56, %v1144_v29 }
 0x13e   : > { %1873 = vrot.lane.b32.xlu0 %v4053_v45, %s5131_s0  ;;  %1823 = vrot.lane.b32.xlu2 %v3872_v7, %s5138_s3  ;;  %v3447_v45 = vpack.i.bf16 %v1936_v61, %v3623_v0  ;;  %v2561_v61 = vld [vmem:[#allocation2 + $0x18] sm:$0x3f] }
 0x13f   : > { %1821 = vrot.lane.b32.xlu1 %v3856_v2, %s5138_s3 }
 0x140   : > { %v1138_v60 = vpop.permute.xlu0 %1137  ;;  %v2012_v13 = vpop.permute.xlu2 %2011 }
 0x141   : > { %v4289_v10 = vsel %vm5143_vm7, %v4215_v55, %v1138_v60  ;;  %v4295_v9 = vpop.permute.xlu1 %2154 }
 0x142   : > { %v1155_v40 = vsel %vm4009_vm2, %v4289_v10, 0.0  ;;  %v2161_v27 = vsel %vm5141_vm1, %v4295_v9, %v2157_v53  ;;  %v1552_v53 = vld [vmem:[%s5098_s14] sm:$0xff] }
 0x143   : > { %1159 = vst [vmem:[#allocation3 + $0x58] sm:$0xff] %v1155_v40  ;;  %v2169_v2 = vsel %vm4009_vm2, %v2161_v27, 0.0 }
 0x144   : > { %2173 = vst [vmem:[#allocation3 + $0xc0] sm:$0xf] %v2169_v2 }
 0x146   : > { %3448 = vrot.lane.b32.xlu0 %v3447_v45, %s5134_s6  ;;  %3458 = vrot.lane.b32.xlu2 %v3457_v26, %s5131_s0  ;;  %v2512_v45 = vld [vmem:[#allocation2 + $0x18] sm:$0x3f] }
 0x147   : > { %3453 = vrot.lane.b32.xlu1 %v3452_v36, %s5136_s7 }
 0x148   : > { %v4303_v39 = vpop.permute.xlu0 %2148  ;;  %v4306_v0 = vpop.permute.xlu2 %2112 }
 0x149   : > { %v2151_v41 = vpop.permute.xlu1 %2150 }
 0x14a   : > { %v2159_v42 = vsel %vm5141_vm1, %v4303_v39, %v2151_v41  ;;  %v2484_v41 = vld [vmem:[#allocation2 + $0x18] sm:$0x3f] }
 0x14b   : > { %v2202_v51 = vld [vmem:[#allocation3 + $0xc0] sm:$0xf] }
 0x14c   : > { %3315 = vmatpush.msk.msra.mxu3 %vm1859_vm4, %v2202_v51 }
 0x14e   : > { %1781 = vperm.xlu0 %3462, %v1552_v53   ;;  %2518 = vrot.lane.b32.xlu2 %v2511_v43, %s3629_s2 }
 0x14f   : > { %3509 = vmatpush.msk.msra.mxu3 %vm4009_vm2, %v2159_v42  ;;  %3464 = vrot.lane.b32.xlu1 %v3463_v14, %s5138_s3  ;;  %v2483_v42 = vld [vmem:[#allocation2 + $0x10] sm:$0x3f] }
 0x150   : > { %v2121_v48 = vpop.permute.xlu0 %2120  ;;  %v4320_v50 = vpop.permute.xlu2 %2063 }
 0x151   : > { %v2125_v29 = vsel %vm5130_vm3, %v4256_v35, %v2121_v48  ;;  %v1181_v58 = vpop.permute.xlu1 %1180  ;;  %v2540_v48 = vld [vmem:[#allocation2 + $0x18] sm:$0x3f] }
 0x152   : > { %2237 = vmatpush.msra.mxu3 %v2125_v29  ;;  %v4324_v60 = vsel %vm5142_vm5, %v1181_v58, %v4173_v19  ;;  %v2539_v29 = vld [vmem:[#allocation2 + $0x10] sm:$0x3f] }
 0x153   : > { %v1197_v40 = vsel %vm4195_vm12, %v4324_v60, 0.0 }
 0x154   : > { %1201 = vst [vmem:[#allocation3 + $0xd8] sm:$0xff] %v1197_v40 }
 0x156   : > { %2569 = vrot.lane.b32.xlu0 %v2561_v61, %s5128_s5  ;;  %2567 = vrot.lane.b32.xlu2 %v2560_v8, %s5128_s5  ;;  %v2546_v61 = vrot.slane %v2540_v48, 6  ;;  %v2425_v8 = vld [vmem:[#allocation2 + $0x8] sm:$0x3f] }
 0x157   : > { %2520 = vrot.lane.b32.xlu1 %v2512_v45, %s3629_s2  ;;  %v2453_v48 = vld [vmem:[#allocation2 + $0x8] sm:$0x3f] }
 0x158   : > { %v2072_v5 = vpop.permute.xlu0 %2071  ;;  %v1134_v27 = vpop.permute.xlu2 %1133 }
 0x159   : > { %v2076_v26 = vsel %vm5142_vm5, %v4273_v22, %v2072_v5  ;;  %v4338_v2 = vsel %vm5143_vm7, %v1134_v27, %v4215_v55  ;;  %v4340_v36 = vpop.permute.xlu1 %2009  ;;  %v1553_v55 = vld [vmem:[%s5101_s17] sm:$0xff]  ;;  %v2545_v5 = vrot.slane %v2539_v29, 6 }
 0x15a   : > { %v2084_v19 = vsel %vm4073_vm6, %v2076_v26, 0.0  ;;  %v1154_v46 = vsel %vm4112_vm8, %v4338_v2, 0.0  ;;  %v2020_v53 = vsel %vm5143_vm7, %v4340_v36, %v2012_v13 }
 0x15b   : > { %2088 = vst [vmem:[#allocation3 + $0x58] sm:$0xf] %v2084_v19  ;;  %v2028_v43 = vsel %vm4009_vm2, %v2020_v53, 0.0 }
 0x15c   : > { %1158 = vst [vmem:[#allocation3 + $0x70] sm:$0xff] %v1154_v46  ;;  %v2036_v51 = vrot.slane %v2028_v43, 4  ;;  %v2454_v43 = vld [vmem:[#allocation2 + $0x10] sm:$0x3f] }
 0x15e   : > { %2492 = vrot.lane.b32.xlu0 %v2484_v41, %s5133_s4  ;;  %2490 = vrot.lane.b32.xlu2 %v2483_v42, %s5133_s4  ;;  %2046 = vst [vmem:[#allocation3 + $0x78] sm:$0xf0] %v2036_v51 }
 0x15f   : > { %1788 = vperm.xlu1 %3468, %v1553_v55  }
 0x160   : > { %v4354_v14 = vpop.permute.xlu0 %2015  ;;  %v4356_v13 = vpop.permute.xlu2 %1953 }
 0x161   : > { %v2018_v58 = vpop.permute.xlu1 %2017 }
 0x162   : > { %v2022_v40 = vsel %vm5143_vm7, %v4354_v14, %v2018_v58  ;;  %v2403_v58 = vld [vmem:[#allocation2 + $0x10] sm:$0x3f] }
 0x163   : > { %v2030_v45 = vsel %vm4009_vm2, %v2022_v40, 0.0 }
 0x164   : > { %v2039_v26 = vrot.slane %v2030_v45, 4 }
 0x166   : > { %2432 = vrot.lane.b32.xlu0 %v2425_v8, %s5136_s7  ;;  %2551 = vrot.lane.b32.xlu2 %v2546_v61, %s5126_s11  ;;  %v2040_v27 = vsel %vm1859_vm4, %v2036_v51, %v2039_v26  ;;  %v2426_v51 = vld [vmem:[#allocation2 + $0x10] sm:$0x3f]  ;;  %v2382_v26 = vld [vmem:[#allocation2 + $0x8] sm:$0x3f] }
 0x167   : > { %2549 = vrot.lane.b32.xlu1 %v2545_v5, %s5126_s11  ;;  %v2409_v5 = vrot.slane %v2403_v58, 2 }
 0x168   : > { %v2115_v19 = vpop.permute.xlu0 %2114  ;;  %v2147_v41 = vpop.permute.xlu2 %2146 }
 0x169   : > { %v2123_v46 = vsel %vm5130_vm3, %v4306_v0, %v2115_v19  ;;  %v4370_v53 = vsel %vm5141_vm1, %v2147_v41, %v4303_v39  ;;  %v1175_v42 = vpop.permute.xlu1 %1174 }
 0x16a   : > { %2131 = vst [vmem:[#allocation3 + $0x58] sm:$0xf0] %v2123_v46  ;;  %v4374_v55 = vsel %vm5142_vm5, %v1175_v42, %v4261_v37  ;;  %v2402_v37 = vld [vmem:[#allocation2 + $0x8] sm:$0x3f] }
 0x16b   : > { %v2408_v46 = vrot.slane %v2402_v37, 2 }
 0x16e   : > { %2462 = vrot.lane.b32.xlu0 %v2454_v43, %s5134_s6  ;;  %2460 = vrot.lane.b32.xlu2 %v2453_v48, %s5134_s6 }
 0x16f   : > { %2434 = vrot.lane.b32.xlu1 %v2426_v51, %s5136_s7  ;;  %v2559_v51 = vld [vmem:[#allocation2 + $0x8] sm:$0x3f] }
 0x170   : > { %v2066_v29 = vpop.permute.xlu0 %2065  ;;  %v2117_v61 = vpop.permute.xlu2 %2116 }
 0x171   : > { %v2074_v39 = vsel %vm5142_vm5, %v4320_v50, %v2066_v29  ;;  %v2196_v8 = vld [vmem:[#allocation3 + $0x58] sm:$0xff]  ;;  %v4383_v40 = vsel %vm5130_vm3, %v2117_v61, %v4256_v35  ;;  %v1140_v45 = vpop.permute.xlu1 %1139  ;;  %v2510_v29 = vld [vmem:[#allocation2 + $0x8] sm:$0x3f]  ;;  %v2383_v61 = vld [vmem:[#allocation2 + $0x10] sm:$0x3f] }
 0x172   : > { %2238 = vmatpush.msra.mxu3 %v2196_v8  ;;  %v4387_v19 = vsel %vm5143_vm7, %v1140_v45, %v4270_v56  ;;  %v2190_v35 = vld [vmem:[#allocation3 + $0x78] sm:$0xff] }
 0x174   : > { %3510 = vmatpush.msk.msra.mxu3 %vm4073_vm6, %v2074_v39 }
 0x176   : > { %2389 = vrot.lane.b32.xlu0 %v2382_v26, %s5138_s3  ;;  %2240 = vmatpush.msra.mxu3 %v2040_v27 }
 0x177   : > { %2414 = vrot.lane.b32.xlu2 %v2409_v5, %s5131_s0  ;;  %2412 = vrot.lane.b32.xlu1 %v2408_v46, %s5131_s0 }
 0x178   : > { %v4393_v41 = vpop.permute.xlu0 %1947  ;;  %2241 = vmatpush.msra.mxu3 %v2190_v35  ;;  %v2068_v42 = vpop.permute.xlu2 %2067 }
 0x179   : > { %v2075_v56 = vsel %vm5142_vm5, %v2068_v42, %v4273_v22  ;;  %v1950_v43 = vpop.permute.xlu1 %1949  ;;  %v2538_v22 = vld [vmem:[#allocation2 + $0x8] sm:$0x3f]  ;;  %v2424_v42 = vld [vmem:[#allocation2] sm:$0x3f] }
 0x17a   : > { %2242 = vmatpush.msra.mxu3 %v3872_v7  ;;  %v2083_v48 = vsel %vm4195_vm12, %v2075_v56, 0.0  ;;  %v1958_v27 = vsel %vm1096_vm9, %v4393_v41, %v1950_v43  ;;  %v2544_v35 = vrot.slane %v2538_v22, 6 }
 0x17b   : > { %2087 = vst [vmem:[#allocation3 + $0x70] sm:$0xf] %v2083_v48  ;;  %v1966_v58 = vsel %vm4073_vm6, %v1958_v27, 0.0  ;;  %v2401_v27 = vld [vmem:[#allocation2] sm:$0x3f] }
 0x17c   : > { %v1974_v39 = vrot.slane %v1966_v58, 4  ;;  %v2407_v58 = vrot.slane %v2401_v27, 2 }
 0x17e   : > { %2565 = vrot.lane.b32.xlu0 %v2559_v51, %s5128_s5  ;;  %1984 = vst [vmem:[#allocation3 + $0x110] sm:$0xf0] %v1974_v39  ;;  %v2482_v51 = vld [vmem:[#allocation2 + $0x8] sm:$0x3f]  ;;  %s5200_s5 = smov 16  }
 0x17f   : > { %2516 = vrot.lane.b32.xlu2 %v2510_v29, %s3629_s2  ;;  %2391 = vrot.lane.b32.xlu1 %v2383_v61, %s5138_s3  ;;  %v2381_v61 = vld [vmem:[#allocation2] sm:$0x3f] }
 0x180   : > { %v1956_v7 = vpop.permute.xlu0 %1955  ;;  %v2111_v8 = vpop.permute.xlu2 %2110 }
 0x181   : > { %v1960_v37 = vsel %vm1096_vm9, %v4356_v13, %v1956_v7  ;;  %v2122_v45 = vsel %vm5130_vm3, %v2111_v8, %v4306_v0  ;;  %v2153_v26 = vpop.permute.xlu1 %2152  ;;  %v2452_v8 = vld [vmem:[#allocation2] sm:$0x3f] }
 0x182   : > { %v1968_v5 = vsel %vm4073_vm6, %v1960_v37, 0.0  ;;  %2130 = vst [vmem:[#allocation3 + $0x70] sm:$0xf0] %v2122_v45  ;;  %v2160_v56 = vsel %vm5141_vm1, %v2153_v26, %v4295_v9 }
 0x183   : > { %v1977_v46 = vrot.slane %v1968_v5, 4  ;;  %v2168_v43 = vsel %vm4112_vm8, %v2160_v56, 0.0 }
 0x184   : > { %2172 = vst [vmem:[#allocation3 + $0xd8] sm:$0xf] %v2168_v43 }
 0x185   : > { %v1978_v48 = vsel %vm1859_vm4, %v1974_v39, %v1977_v46 }
 0x186   : > { %2430 = vrot.lane.b32.xlu0 %v2424_v42, %s5136_s7  ;;  %2243 = vmatpush.msra.mxu3 %v1978_v48  ;;  %1986 = vst [vmem:[#allocation3 + $0x98] sm:$0xff] %v1978_v48  ;;  %v1208_v42 = vld [vmem:[#allocation2 + $0x38] sm:$0xff] }
 0x187   : > { %2547 = vrot.lane.b32.xlu2 %v2544_v35, %s5126_s11  ;;  %2488 = vrot.lane.b32.xlu1 %v2482_v51, %s5133_s4  ;;  %v2479_v35 = vld [vmem:[#allocation2 + $0x10] sm:$0x3f] }
 0x188   : > { %v4421_v0 = vpop.permute.xlu0 %1913  ;;  %v1880_v29 = vpop.permute.xlu2 %1879 }
 0x189   : > { %v1916_v9 = vpop.permute.xlu1 %1915  ;;  %v2195_v26 = vld [vmem:[#allocation3 + $0x70] sm:$0xff] }
 0x18a   : > { %v1920_v39 = vsel %vm1055_vm10, %v4421_v0, %v1916_v9 }
 0x18b   : > { %v1928_v7 = vsel %vm4009_vm2, %v1920_v39, 0.0  ;;  %v2201_v22 = vld [vmem:[#allocation3 + $0xd8] sm:$0xf] }
 0x18c   : > { %1932 = vst [vmem:[#allocation3 + $0x110] sm:$0xf] %v1928_v7  ;;  %3313 = vmatpush.msk.msra.mxu1 %vm1859_vm4, %v2201_v22  ;;  %v1205_v39 = vld [vmem:[#allocation2 + $0x18] sm:$0xff]  ;;  %v4460_v7 = vld [vmem:[%s3842_s10] sm:$0xff] }
 0x18e   : > { %2387 = vrot.lane.b32.xlu0 %v2381_v61, %s5138_s3  ;;  %3511 = vmatpush.msk.msra.mxu1 %vm4112_vm8, %v4370_v53 }
 0x18f   : > { %2410 = vrot.lane.b32.xlu2 %v2407_v58, %s5131_s0  ;;  %2458 = vrot.lane.b32.xlu1 %v2452_v8, %s5134_s6 }
 0x190   : > { %v4434_v37 = vpop.permute.xlu0 %1907  ;;  %v4437_v45 = vpop.permute.xlu2 %1871  ;;  %2217 = vmatpush.msra.mxu1 %v4383_v40 }
 0x191   : > { %v1910_v5 = vpop.permute.xlu1 %1909 }
 0x192   : > { %v1918_v46 = vsel %vm1055_vm10, %v4434_v37, %v1910_v5  ;;  %2218 = vmatpush.msra.mxu1 %v2195_v26 }
 0x193   : > { %v1926_v56 = vsel %vm4009_vm2, %v1918_v46, 0.0  ;;  %v2184_v53 = vld [vmem:[#allocation3 + $0x110] sm:$0xff] }
 0x194   : > { %1930 = vst [vmem:[#allocation3 + $0x18] sm:$0xff] %v1926_v56  ;;  %2244 = vmatpush.msra.mxu3 %v2184_v53 }
 0x195   : > { %2481 = vst [vmem:[#allocation3 + $0x18] sm:$0x3f] %v2479_v35  ;;  %v2377_v35 = vld [vmem:[%s5100_s16] sm:$0xff] }
 0x196   : > { %1217 = vrot.lane.b32.xlu0 %v3885_v11, %s5126_s11  ;;  %3512 = vmatpush.msk.msra.mxu3 %vm4009_vm2, %v1918_v46 }
 0x197   : > { %1225 = vrot.lane.b32.xlu2 %v1208_v42, %s5126_s11  ;;  %1223 = vrot.lane.b32.xlu1 %v3864_v4, %s5126_s11 }
 0x198   : > { %v2008_v40 = vpop.permute.xlu0 %2007  ;;  %v1824_v48 = vpop.permute.xlu2 %1823 }
 0x199   : > { %v2019_v43 = vsel %vm5143_vm7, %v2008_v40, %v4340_v36  ;;  %v2014_v27 = vpop.permute.xlu1 %2013 }
 0x19a   : > { %v2027_v51 = vsel %vm4112_vm8, %v2019_v43, 0.0  ;;  %v2021_v9 = vsel %vm5143_vm7, %v2014_v27, %v4354_v14  ;;  %v3491_v27 = vld [vmem:[#allocation3 + $0xf8] sm:$0xff] }
 0x19b   : > { %v2035_v11 = vrot.slane %v2027_v51, 4  ;;  %v2029_v58 = vsel %vm4112_vm8, %v2021_v9, 0.0 }
 0x19c   : > { %v2037_v61 = vrot.slane %v2029_v58, 4 }
 0x19d   : > { %2045 = vst [vmem:[#allocation3 + $0x8] sm:$0xf0] %v2035_v11 }
 0x19e   : > { %1215 = vrot.lane.b32.xlu0 %v4460_v7, %s5126_s11  ;;  %v2038_v36 = vsel %vm1859_vm4, %v2035_v11, %v2037_v61  ;;  %v939_v11 = vld [vmem:[%s5186_s8 + $0x8] sm:$0xff]  ;;  %v2378_v61 = vld [vmem:[%s5103_s19] sm:$0xff] }
 0x19f   : > { %1221 = vrot.lane.b32.xlu2 %v3845_v1, %s5126_s11  ;;  %1219 = vrot.lane.b32.xlu1 %v1205_v39, %s5126_s11  ;;  %s5187_s11 = smov %s5186_s8  ;;  %s5192_s8 = sld [smem:[#allocation26_spill]] }
 0x1a0   : > { %v2062_v22 = vpop.permute.xlu0 %2061  ;;  %v3459_v8 = vpop.permute.xlu2 %3458 }
 0x1a1   : > { %v2073_v14 = vsel %vm5142_vm5, %v2062_v22, %v4320_v50  ;;  %v3461_v5 = vunpack.i.h.bf16 %v3459_v8  ;;  %v3460_v26 = vunpack.i.l.bf16 %v3459_v8  ;;  %v1878_v46 = vpop.permute.xlu1 %1877  ;;  %v1801_v50 = vld [vmem:[%s5099_s15] sm:$0xff] }
 0x1a2   : > { %3513 = vmatpush.msk.msra.mxu1 %vm4195_vm12, %v2073_v14  ;;  %v1884_v53 = vsel %vm1014_vm11, %v1878_v46, %v1880_v29  ;;  %v2719_v8 = vld [vmem:[%s5107_s23] sm:$0xff] }
 0x1a3   : > { %v1881_v42 = vsel %vm1014_vm11, %v3461_v5, %v4437_v45  ;;  %v4478_v56 = vsel %vm1014_vm11, %v3460_v26, %v1878_v46  ;;  %2246 = vmatpush.msra.mxu3 %v1884_v53  ;;  %1892 = vst [vmem:[#allocation3 + $0x68] sm:$0xff] %v1884_v53  ;;  %v940_v46 = vld [vmem:[%s5188_s1] sm:$0xff] }
 0x1a4   : > { %1889 = vst [vmem:[#allocation3 + $0x10] sm:$0xf0] %v1881_v42  ;;  %2220 = vmatpush.msra.mxu1 %v2038_v36  ;;  %v2189_v40 = vld [vmem:[#allocation3 + $0x8] sm:$0xff] }
 0x1a5   : > { %1891 = vst [vmem:[#allocation3 + $0x108] sm:$0xff] %v4478_v56 }
 0x1a6   : > { %2647 = vperm.xlu0 %3462, %v2377_v35   ;;  %2221 = vmatpush.msra.mxu1 %v2189_v40  ;;  %v4514_v40 = vpop.f32.mrf.mxu1 }
 0x1a7   : > { %2255 = vperm.xlu1 %3468, %v1801_v50  }
 0x1a8   : > { %v4485_v43 = vpop.permute.xlu0 %1827  ;;  %v4487_v51 = vpop.permute.xlu2 %2518  ;;  %2222 = vmatpush.msra.mxu1 %v3491_v27 }
 0x1a9   : > { %v1830_v29 = vpop.permute.xlu1 %1829  ;;  %v4521_v27 = vpop.f32.mrf.mxu3 }
 0x1aa   : > { %v1834_v9 = vsel %vm897_vm0, %v4485_v43, %v1830_v29 }
 0x1ab   : > { %v1842_v58 = vsel %vm4073_vm6, %v1834_v9, 0.0 }
 0x1ac   : > { %1846 = vst [vmem:[#allocation3 + $0x48] sm:$0xf] %v1842_v58  ;;  %v2736_v58 = vld [vmem:[%s5108_s24 + $0x8] sm:$0xff] }
 0x1ae   : > { %1426 = vperm.xlu0 %3462, %v939_v11  }
 0x1af   : > { %2654 = vperm.xlu1 %3468, %v2378_v61  }
 0x1b0   : > { %v1874_v39 = vpop.permute.xlu0 %1873  ;;  %v4501_v22 = vpop.permute.xlu2 %2567 }
 0x1b1   : > { %v1882_v36 = vsel %vm1014_vm11, %v4437_v45, %v1874_v39  ;;  %v1822_v14 = vpop.permute.xlu1 %1821 }
 0x1b2   : > { %1890 = vst [vmem:[#allocation3 + $0x48] sm:$0xf0] %v1882_v36  ;;  %v1832_v5 = vsel %vm897_vm0, %v1822_v14, %v1824_v48  ;;  %v4519_v48 = vld [vmem:[%s5189_s12] sm:$0xff] }
 0x1b3   : > { %v1840_v26 = vsel %vm4073_vm6, %v1832_v5, 0.0 }
 0x1b4   : > { %1844 = vst [vmem:[#allocation3 + $0xd0] sm:$0xff] %v1840_v26 }
 0x1b6   : > { %2723 = vperm.xlu0 %3462, %v2719_v8  }
 0x1b7   : > { %1435 = vperm.xlu1 %3468, %v940_v46  }
 0x1b8   : > { %v3449_v45 = vpop.permute.xlu0 %3448  ;;  %v4512_v53 = vpop.permute.xlu2 %2490 }
 0x1b9   : > { %v3451_v35 = vunpack.i.h.bf16 %v3449_v45  ;;  %v3450_v42 = vunpack.i.l.bf16 %v3449_v45  ;;  %v2178_v50 = vld [vmem:[#allocation3 + $0x48] sm:$0xff]  ;;  %v3454_v9 = vpop.permute.xlu1 %3453 }
 0x1ba   : > { %2247 = vmatpush.msra.mxu3 %v2178_v50  ;;  %v3456_v36 = vunpack.i.h.bf16 %v3454_v9  ;;  %v3455_v8 = vunpack.i.l.bf16 %v3454_v9  ;;  %v2720_v45 = vld [vmem:[%s5107_s23 + $0x8] sm:$0xff] }
 0x1bb   : > { %v1959_v29 = vsel %vm1096_vm9, %v3451_v35, %v4356_v13  ;;  %v1957_v11 = vsel %vm1096_vm9, %v3450_v42, %v4393_v41 }
 0x1bc   : > { %v1967_v61 = vsel %vm4195_vm12, %v1959_v29, 0.0  ;;  %v1965_v39 = vsel %vm4195_vm12, %v1957_v11, 0.0  ;;  %3514 = vmatpush.msk.msra.mxu3 %vm4073_vm6, %v1832_v5  ;;  %v1917_v41 = vsel %vm1055_vm10, %v3456_v36, %v4434_v37  ;;  %v1919_v46 = vsel %vm1055_vm10, %v3455_v8, %v4421_v0  ;;  %v2478_v37 = vld [vmem:[#allocation2 + $0x8] sm:$0x3f] }
 0x1bd   : > { %v1975_v13 = vrot.slane %v1967_v61, 4  ;;  %v1973_v26 = vrot.slane %v1965_v39, 4  ;;  %3316 = vmatmul.msk.f32.vlgmr.msra.gmra.mxu3 %vm2203_vm14, %v4519_v48  ;;  %v1925_v5 = vsel %vm4112_vm8, %v1917_v41, 0.0  ;;  %v1927_v42 = vsel %vm4112_vm8, %v1919_v46, 0.0  ;;  %v4554_v61 = vpop.f32.mrf.mxu3 }
 0x1be   : > { %2744 = vperm.xlu0 %3462, %v2736_v58   ;;  %1931 = vst [vmem:[#allocation3 + $0x80] sm:$0xf] %v1927_v42  ;;  %v4552_v58 = vpop.f32.mrf.mxu1 }
 0x1bf   : > { %v1976_v35 = vsel %vm1859_vm4, %v1973_v26, %v1975_v13  ;;  %1983 = vst [vmem:[#allocation3 + $0x80] sm:$0xf0] %v1973_v26  ;;  %2728 = vperm.xlu1 %3468, %v2720_v45   ;;  %vm1470_vm4 = vcmask 64512  }
 0x1c0   : > { %1985 = vst [vmem:[#allocation3 + $0x118] sm:$0xff] %v1976_v35  ;;  %v1782_v50 = vpop.permute.xlu0 %1781  ;;  %2223 = vmatpush.msra.mxu1 %v1976_v35  ;;  %v4550_v0 = vpop.permute.xlu2 %2551 }
 0x1c1   : > { %1929 = vst [vmem:[#allocation3 + $0x30] sm:$0xff] %v1925_v5  ;;  %v3465_v29 = vpop.permute.xlu1 %3464 }
 0x1c2   : > { %2480 = vst [vmem:[#allocation3 + $0x30] sm:$0x3f] %v2478_v37  ;;  %v3467_v11 = vunpack.i.h.bf16 %v3465_v29  ;;  %v3466_v9 = vunpack.i.l.bf16 %v3465_v29 }
 0x1c4   : > { %v1831_v39 = vsel %vm897_vm0, %v3467_v11, %v1822_v14  ;;  %v1833_v36 = vsel %vm897_vm0, %v3466_v9, %v4485_v43  ;;  %v1802_v43 = vld [vmem:[%s5102_s18] sm:$0xff] }
 0x1c5   : > { %v1839_v8 = vsel %vm4195_vm12, %v1831_v39, 0.0  ;;  %v1841_v13 = vsel %vm4195_vm12, %v1833_v36, 0.0  ;;  %2262 = vperm.xlu2 %3469, %v1802_v43   ;;  %v1776_v9 = vpop.f32.mrf.mxu3 }
 0x1c6   : > { %1843 = vst [vmem:[#allocation3 + $0xb0] sm:$0xff] %v1839_v8  ;;  %v2183_v46 = vld [vmem:[#allocation3 + $0x80] sm:$0xff]  ;;  %v1756_v11 = vpop.f32.mrf.mxu1 }
 0x1c7   : > { %1845 = vst [vmem:[#allocation3 + $0x10] sm:$0xf] %v1841_v13  ;;  %2224 = vmatpush.msra.mxu1 %v2183_v46  ;;  %v1785_v46 = vmul.f32 %v1782_v50, %v1776_v9 }
 0x1c8   : > { %v2570_v26 = vpop.permute.xlu0 %2569  ;;  %v4565_v35 = vpop.permute.xlu2 %2460 }
 0x1c9   : > { %v2572_v45 = vsel %vm5141_vm1, %v4501_v22, %v2570_v26  ;;  %v2521_v5 = vpop.permute.xlu1 %2520  ;;  %3515 = vmatpush.msk.msra.mxu1 %vm4112_vm8, %v1917_v41  ;;  %v1784_v26 = vmul.f32 %v1782_v50, %v1756_v11  ;;  %v1795_v50 = vld [vmem:[%s5104_s20] sm:$0xff] }
 0x1ca   : > { %v2576_v14 = vsel %vm4009_vm2, %v2572_v45, 0.0  ;;  %v2523_v42 = vsel %vm5142_vm5, %v4487_v51, %v2521_v5 }
 0x1cb   : > { %2578 = vst [vmem:[#allocation3 + $0x38] sm:$0x3f] %v2576_v14  ;;  %v2527_v37 = vsel %vm4073_vm6, %v2523_v42, 0.0  ;;  %2226 = vmatpush.msra.mxu1 %v4478_v56 }
 0x1cc   : > { %v2531_v29 = vrot.slane %v2527_v37, 4 }
 0x1ce   : > { %2535 = vst [vmem:[#allocation3 + $0x110] sm:$0xf0] %v2531_v29  ;;  %v2177_v8 = vld [vmem:[#allocation3 + $0x10] sm:$0xff] }
 0x1cf   : > { %2537 = vst [vmem:[#allocation3 + $0x98] sm:$0x3] %v2531_v29  ;;  %2227 = vmatpush.msra.mxu1 %v2177_v8 }
 0x1d0   : > { %v2493_v36 = vpop.permute.xlu0 %2492 }
 0x1d1   : > { %v2495_v13 = vsel %vm5143_vm7, %v4512_v53, %v2493_v36  ;;  %v2415_v41 = vpop.permute.xlu2 %2414  ;;  %v1789_v14 = vpop.permute.xlu1 %1788  ;;  %3516 = vmatpush.msk.msra.mxu1 %vm4195_vm12, %v1831_v39 }
 0x1d2   : > { %v2499_v45 = vsel %vm4009_vm2, %v2495_v13, 0.0  ;;  %v1791_v56 = vadd.f32 %v1789_v14, %v1784_v26  ;;  %v1792_v5 = vadd.f32 %v1789_v14, %v1785_v46  ;;  %3314 = vmatmul.msk.f32.vlgmr.msra.gmra.mxu1 %vm2203_vm14, %v4519_v48  ;;  %v2593_v29 = vld [vmem:[#allocation3 + $0x38] sm:$0x3f]  ;;  %v1796_v26 = vld [vmem:[%s5104_s20 + $0x8] sm:$0xff] }
 0x1d3   : > { %v2503_v43 = vrot.slane %v2499_v45, 2 }
 0x1d4   : > { %v1793_v42 = vmax.f32 %v1791_v56, 0.0  ;;  %v1794_v37 = vmax.f32 %v1792_v5, 0.0 }
 0x1d5   : > { %2507 = vst [vmem:[#allocation3 + $0x18] sm:$0xc0] %v2503_v43 }
 0x1d6   : > { %2509 = vst [vmem:[#allocation3 + $0x110] sm:$0xf] %v2503_v43  ;;  %2344 = vmatpush.msrb.mxu1 %v1793_v42  ;;  %2367 = vmatpush.msrb.mxu3 %v1794_v37 }
 0x1d7   : > { %3323 = vmatmul.msk.f32.vlgmr.msrb.gmra.mxu3 %vm1470_vm4, %v1795_v50 }
 0x1d8   : > { %v2433_v11 = vpop.permute.xlu0 %2432  ;;  %3327 = vmatpush.msk.msra.mxu3 %vm2598_vm15, %v2593_v29 }
 0x1d9   : > { %v2517_v39 = vpop.permute.xlu2 %2516  ;;  %v2550_v9 = vpop.permute.xlu1 %2549 }
 0x1da   : > { %v2522_v48 = vsel %vm5142_vm5, %v2517_v39, %v4487_v51  ;;  %v2554_v8 = vsel %vm5130_vm3, %v2550_v9, %v4550_v0  ;;  %3321 = vmatmul.msk.f32.vlgmr.msrb.gmra.mxu1 %vm1470_vm4, %v1795_v50 }
 0x1db   : > { %v2526_v36 = vsel %vm4195_vm12, %v2522_v48, 0.0  ;;  %2558 = vst [vmem:[#allocation3 + $0x98] sm:$0xfc] %v2554_v8 }
 0x1dc   : > { %v2530_v13 = vrot.slane %v2526_v36, 4  ;;  %v2587_v39 = vld [vmem:[#allocation3 + $0x18] sm:$0xff] }
 0x1dd   : > { %v2589_v50 = vld [vmem:[#allocation3 + $0x110] sm:$0xff] }
 0x1de   : > { %2534 = vst [vmem:[#allocation3 + $0x80] sm:$0xf0] %v2530_v13 }
 0x1df   : > { %2536 = vst [vmem:[#allocation3 + $0x118] sm:$0x3] %v2530_v13  ;;  %3324 = vmatmul.msk.f32.gmra.mxu3 %vm1470_vm4, %v1796_v26 }
 0x1e0   : > { %v2463_v51 = vpop.permute.xlu0 %2462 }
 0x1e1   : > { %v2548_v46 = vpop.permute.xlu2 %2547  ;;  %v2465_v45 = vsel %vm1096_vm9, %v4565_v35, %v2463_v51  ;;  %v2435_v14 = vpop.permute.xlu1 %2434 }
 0x1e2   : > { %v2553_v43 = vsel %vm5130_vm3, %v2548_v46, %v2550_v9  ;;  %v2469_v0 = vsel %vm4073_vm6, %v2465_v45, 0.0  ;;  %v2437_v5 = vsel %vm1055_vm10, %v2433_v11, %v2435_v14  ;;  %v2591_v42 = vld [vmem:[#allocation3 + $0x98] sm:$0xff]  ;;  %3322 = vmatmul.msk.f32.gmra.mxu1 %vm1470_vm4, %v1796_v26 }
 0x1e3   : > { %2557 = vst [vmem:[#allocation3 + $0x118] sm:$0xfc] %v2553_v43  ;;  %v2473_v56 = vrot.slane %v2469_v0, 6  ;;  %v2441_v37 = vsel %vm4009_vm2, %v2437_v5, 0.0  ;;  %2635 = vmatpush.msra.mxu3 %v2591_v42 }
 0x1e4   : > { %v2445_v29 = vrot.slane %v2441_v37, 4 }
 0x1e5   : > { %2477 = vst [vmem:[#allocation3 + $0x68] sm:$0xfc] %v2473_v56  ;;  %2636 = vmatpush.msra.mxu3 %v2589_v50 }
 0x1e6   : > { %2449 = vst [vmem:[#allocation3 + $0x48] sm:$0xf0] %v2445_v29 }
 0x1e7   : > { %2451 = vst [vmem:[#allocation3 + $0x68] sm:$0x3] %v2445_v29  ;;  %2637 = vmatpush.msra.mxu3 %v2587_v39  ;;  %v2579_v39 = vld [vmem:[%s5190_s13] sm:$0xff] }
 0x1e8   : > { %v2390_v48 = vpop.permute.xlu0 %2389 }
 0x1e9   : > { %v2411_v9 = vpop.permute.xlu2 %2410  ;;  %v2413_v36 = vpop.permute.xlu1 %2412 }
 0x1ea   : > { %v2416_v8 = vsel %vm1014_vm11, %v2411_v9, %v2413_v36  ;;  %v2417_v13 = vsel %vm1014_vm11, %v2413_v36, %v2415_v41  ;;  %v2590_v9 = vld [vmem:[#allocation3 + $0x118] sm:$0xff] }
 0x1eb   : > { %2420 = vst [vmem:[#allocation3 + $0xb0] sm:$0xc0] %v2416_v8 }
 0x1ec   : > { %2421 = vst [vmem:[#allocation3 + $0xd0] sm:$0xc0] %v2417_v13 }
 0x1ed   : > { %2422 = vst [vmem:[#allocation3 + $0x10] sm:$0xf] %v2416_v8 }
 0x1ee   : > { %2423 = vst [vmem:[#allocation3 + $0x48] sm:$0xf] %v2417_v13  ;;  %v2585_v26 = vld [vmem:[#allocation3 + $0x68] sm:$0xff] }
 0x1ef   : > { %2638 = vmatpush.msra.mxu3 %v2585_v26 }
 0x1f0   : > { %v2566_v51 = vpop.permute.xlu0 %2565 }
 0x1f1   : > { %v2571_v46 = vsel %vm5141_vm1, %v2566_v51, %v4501_v22  ;;  %v2392_v43 = vpop.permute.xlu1 %2391  ;;  %v1226_v13 = vpop.permute.xlu2 %1225 }
 0x1f2   : > { %v2575_v45 = vsel %vm4112_vm8, %v2571_v46, 0.0  ;;  %v2394_v0 = vsel %vm897_vm0, %v2390_v48, %v2392_v43 }
 0x1f3   : > { %2577 = vst [vmem:[#allocation3 + $0xf8] sm:$0x3f] %v2575_v45  ;;  %v2398_v41 = vsel %vm4073_vm6, %v2394_v0, 0.0 }
 0x1f4   : > { %2400 = vst [vmem:[#allocation3 + $0xd0] sm:$0x3f] %v2398_v41 }
 0x1f5   : > { %v2583_v14 = vld [vmem:[#allocation3 + $0x48] sm:$0xff] }
 0x1f6   : > { %2639 = vmatpush.msra.mxu3 %v2583_v14 }
 0x1f8   : > { %v2431_v56 = vpop.permute.xlu0 %2430 }
 0x1f9   : > { %v2436_v5 = vsel %vm1055_vm10, %v2431_v56, %v2433_v11  ;;  %v2489_v37 = vpop.permute.xlu1 %2488  ;;  %v1222_v56 = vpop.permute.xlu2 %1221 }
 0x1fa   : > { %v2440_v42 = vsel %vm4112_vm8, %v2436_v5, 0.0  ;;  %v2592_v22 = vld [vmem:[#allocation3 + $0xf8] sm:$0x3f]  ;;  %v2494_v50 = vsel %vm5143_vm7, %v2489_v37, %v4512_v53 }
 0x1fb   : > { %v2444_v29 = vrot.slane %v2440_v42, 4  ;;  %3325 = vmatpush.msk.msra.mxu1 %vm2598_vm15, %v2592_v22  ;;  %v2498_v11 = vsel %vm4112_vm8, %v2494_v50, 0.0  ;;  %v2581_v36 = vld [vmem:[#allocation3 + $0xd0] sm:$0xff] }
 0x1fc   : > { %v2502_v8 = vrot.slane %v2498_v11, 2  ;;  %2640 = vmatpush.msra.mxu3 %v2581_v36 }
 0x1fd   : > { %2448 = vst [vmem:[#allocation3 + $0x10] sm:$0xf0] %v2444_v29  ;;  %2615 = vmatpush.msra.mxu1 %v2590_v9  ;;  %3328 = vmatmul.msk.f32.vlgmr.msra.gmra.mxu3 %vm2594_vm13, %v2579_v39 }
 0x1fe   : > { %2450 = vst [vmem:[#allocation3 + $0x108] sm:$0x3] %v2444_v29 }
 0x1ff   : > { %2506 = vst [vmem:[#allocation3 + $0x30] sm:$0xc0] %v2502_v8 }
 0x200   : > { %v2388_v53 = vpop.permute.xlu0 %2387  ;;  %2508 = vst [vmem:[#allocation3 + $0x80] sm:$0xf] %v2502_v8  ;;  %v3430_v8 = vunpack.i.l.bf16 %v4087_v63 }
 0x201   : > { %v2393_v26 = vsel %vm897_vm0, %v2388_v53, %v2390_v48  ;;  %v2459_v46 = vpop.permute.xlu1 %2458 }
 0x202   : > { %v2397_v51 = vsel %vm4195_vm12, %v2393_v26, 0.0  ;;  %v2464_v45 = vsel %vm1096_vm9, %v2459_v46, %v4565_v35  ;;  %v2270_v46 = vld [vmem:[%s5105_s21 + $0x8] sm:$0xff] }
 0x203   : > { %2399 = vst [vmem:[#allocation3 + $0xb0] sm:$0x3f] %v2397_v51  ;;  %v2468_v43 = vsel %vm4195_vm12, %v2464_v45, 0.0  ;;  %v2269_v51 = vld [vmem:[%s5105_s21] sm:$0xff] }
 0x204   : > { %v2472_v0 = vrot.slane %v2468_v43, 6  ;;  %v2582_v29 = vld [vmem:[#allocation3 + $0x10] sm:$0xff] }
 0x206   : > { %2476 = vst [vmem:[#allocation3 + $0x108] sm:$0xfc] %v2472_v0  ;;  %v2586_v5 = vld [vmem:[#allocation3 + $0x30] sm:$0xff] }
 0x207   : > { %v2588_v41 = vld [vmem:[#allocation3 + $0x80] sm:$0xff] }
 0x208   : > { %v1218_v14 = vpop.permute.xlu0 %1217  ;;  %2616 = vmatpush.msra.mxu1 %v2588_v41 }
 0x209   : > { %v1224_v48 = vpop.permute.xlu1 %1223 }
 0x20a   : > { %2617 = vmatpush.msra.mxu1 %v2586_v5  ;;  %v1230_v42 = vsel %vm5130_vm3, %v1222_v56, %v1224_v48  ;;  %v1231_v22 = vsel %vm5130_vm3, %v1224_v48, %v1226_v13  ;;  %v2580_v11 = vld [vmem:[#allocation3 + $0xb0] sm:$0xff]  ;;  %v1016_v13 = vsel %vm1014_vm11, %v4025_v34, %v4083_v62 }
 0x20b   : > { %1327 = vmatpush.msra.mxu0 %v1230_v42  ;;  %1373 = vmatpush.msra.mxu2 %v1231_v22 }
 0x20d   : > { %v2584_v37 = vld [vmem:[#allocation3 + $0x108] sm:$0xff] }
 0x20e   : > { %2618 = vmatpush.msra.mxu1 %v2584_v37 }
 0x210   : > { %v1216_v35 = vpop.permute.xlu0 %1215  ;;  %2619 = vmatpush.msra.mxu1 %v2582_v29 }
 0x211   : > { %v1228_v50 = vsel %vm5130_vm3, %v1216_v35, %v1218_v14  ;;  %v1220_v9 = vpop.permute.xlu1 %1219 }
 0x212   : > { %1328 = vmatpush.msra.mxu0 %v1228_v50  ;;  %v1229_v36 = vsel %vm5130_vm3, %v1218_v14, %v1220_v9  ;;  %2620 = vmatpush.msra.mxu1 %v2580_v11  ;;  %v2661_v50 = vld [vmem:[%s5106_s22] sm:$0xff]  ;;  %v2662_v11 = vld [vmem:[%s5106_s22 + $0x8] sm:$0xff]  ;;  %vm2800_vm3 = vcmp.lt.s32.totalorder %v903_v21, 256 }
 0x213   : > { %3326 = vmatmul.msk.f32.vlgmr.msra.gmra.mxu1 %vm2594_vm13, %v2579_v39  ;;  %1374 = vmatpush.msra.mxu2 %v1229_v36  ;;  %v977_v39 = vsel %vm897_vm0, %v4089_v6, %v4041_v38  ;;  %v1283_v38 = vld [vmem:[%s5182_s25 + $0x10] sm:$0xff]  ;;  %vm2795_vm13 = vcmask 1040384   ;;  %v1467_v21 = vld [vmem:[%s5191_s29 + $0x8] sm:$0xff] }
 0x214   : > { %3517 = vmatpush.msk.msra.mxu0 %vm4195_vm12, %v4324_v60  ;;  %v3431_v60 = vunpack.i.h.bf16 %v4087_v63 }
 0x215   : > { %3519 = vmatpush.msk.msra.mxu2 %vm4073_vm6, %v4254_v12  ;;  %v3435_v12 = vunpack.i.l.bf16 %v4160_v54 }
 0x216   : > { %3518 = vmatpush.msk.msra.mxu0 %vm4195_vm12, %v4374_v55  ;;  %v1099_v55 = vsel %vm1096_vm9, %v3430_v8, %v3979_v18  ;;  %v1097_v63 = vsel %vm1096_vm9, %v3431_v60, %v3983_v20 }
 0x217   : > { %3521 = vmatpush.msk.msra.mxu2 %vm4073_vm6, %v4265_v3  ;;  %v3436_v3 = vunpack.i.h.bf16 %v4160_v54 }
 0x218   : > { %3520 = vmatpush.msk.msra.mxu0 %vm4112_vm8, %v4387_v19  ;;  %v2648_v48 = vpop.permute.xlu0 %2647 }
 0x219   : > { %3523 = vmatpush.msk.msra.mxu2 %vm4009_vm2, %v4277_v57  ;;  %v1100_v57 = vsel %vm1096_vm9, %v3979_v18, %v3992_v23  ;;  %v1056_v54 = vsel %vm1055_vm10, %v3436_v3, %v3973_v17  ;;  %v3440_v18 = vunpack.i.l.bf16 %v4135_v28  ;;  %v3445_v23 = vunpack.i.l.bf16 %v4149_v49 }
 0x21a   : > { %3522 = vmatpush.msk.msra.mxu0 %vm4112_vm8, %v4338_v2  ;;  %v3492_v2 = vld [vmem:[%s3842_s10 + $0x8] sm:$0xff]  ;;  %s3335_s10 = sld [smem:[#allocation5 + $0x81]] }
 0x21b   : > { %3524 = vmatpush.msk.msra.mxu2 %vm4009_vm2, %v4289_v10  ;;  %v1098_v10 = vsel %vm1096_vm9, %v3983_v20, %v3998_v25  ;;  %v938_v20 = vld [vmem:[%s5187_s11] sm:$0xff]  ;;  %v1057_v25 = vsel %vm1055_vm10, %v3973_v17, %v4021_v33  ;;  %v1017_v19 = vsel %vm1014_vm11, %v3440_v18, %v3996_v24  ;;  %v941_v33 = vld [vmem:[%s5188_s1 + $0x8] sm:$0xff]  ;;  %s5199_s1 = smov 127  }
 0x21c   : > { %1333 = vmatpush.msra.mxu0 %v3845_v1  ;;  %v1058_v1 = vsel %vm1055_vm10, %v3435_v12, %v3957_v15  ;;  %1421 = vperm.xlu2 %3469, %v938_v20  }
 0x21d   : > { %1379 = vmatpush.msra.mxu2 %v3864_v4  ;;  %v1059_v4 = vsel %vm1055_vm10, %v3957_v15, %v3965_v16  ;;  %v3441_v15 = vunpack.i.h.bf16 %v4135_v28  ;;  %v3446_v16 = vunpack.i.h.bf16 %v4149_v49  ;;  %v1018_v28 = vsel %vm1014_vm11, %v3996_v24, %v4050_v44  ;;  %v1281_v24 = vld [vmem:[%s5182_s25] sm:$0xff] }
 0x21e   : > { %1334 = vmatpush.msra.mxu0 %v4460_v7  ;;  %v976_v7 = vsel %vm897_vm0, %v3445_v23, %v4089_v6  ;;  %v975_v44 = vsel %vm897_vm0, %v4056_v47, %v4108_v30 }
 0x21f   : > { %1380 = vmatpush.msra.mxu2 %v3492_v2  ;;  %v1015_v17 = vsel %vm1014_vm11, %v3441_v15, %v4025_v34  ;;  %v974_v49 = vsel %vm897_vm0, %v3446_v16, %v4056_v47  ;;  %v2735_v34 = vld [vmem:[%s5108_s24] sm:$0xff]  ;;  %v2256_v47 = vpop.permute.xlu1 %2255  ;;  %v2263_v6 = vpop.permute.xlu2 %2262 }
 0x220   : > { %3525 = vmatpush.msk.msra.mxu0 %vm4195_vm12, %v1099_v55 }
 0x221   : > { %3527 = vmatpush.msk.msra.mxu2 %vm4073_vm6, %v1100_v57 }
 0x222   : > { %3526 = vmatpush.msk.msra.mxu0 %vm4195_vm12, %v1097_v63 }
 0x223   : > { %3529 = vmatpush.msk.msra.mxu2 %vm4073_vm6, %v1098_v10 }
 0x224   : > { %3528 = vmatpush.msk.msra.mxu0 %vm4112_vm8, %v1058_v1  ;;  %1440 = vperm.xlu2 %3469, %v941_v33  }
 0x225   : > { %3531 = vmatpush.msk.msra.mxu2 %vm4009_vm2, %v1059_v4 }
 0x226   : > { %3530 = vmatpush.msk.msra.mxu0 %vm4112_vm8, %v1056_v54 }
 0x227   : > { %3532 = vmatpush.msk.msra.mxu2 %vm4009_vm2, %v1057_v25  ;;  %v2655_v37 = vpop.permute.xlu1 %2654  ;;  %v1427_v25 = vpop.permute.xlu0 %1426 }
 0x228   : > { %1339 = vmatpush.msra.mxu0 %v1017_v19 }
 0x229   : > { %1385 = vmatpush.msra.mxu2 %v1018_v28 }
 0x22a   : > { %1340 = vmatpush.msra.mxu0 %v1015_v17 }
 0x22b   : > { %1386 = vmatpush.msra.mxu2 %v1016_v13 }
 0x22c   : > { %3533 = vmatpush.msk.msra.mxu0 %vm4195_vm12, %v976_v7  ;;  %2739 = vperm.xlu2 %3469, %v2735_v34  }
 0x22d   : > { %3535 = vmatpush.msk.msra.mxu2 %vm4073_vm6, %v977_v39 }
 0x22e   : > { %3534 = vmatpush.msk.msra.mxu0 %vm4195_vm12, %v974_v49 }
 0x22f   : > { %1343 = vmatmul.f32.vlgmr.msra.gmra.mxu0 %v1281_v24  ;;  %3536 = vmatpush.msk.msra.mxu2 %vm4073_vm6, %v975_v44  ;;  %v1436_v54 = vpop.permute.xlu1 %1435  ;;  %v4813_v44 = vstv %s3334_s9  ;;  %s3347_s9 = sld [smem:[#allocation5 + $0x381]] }
 0x230   : > { %1389 = vmatmul.f32.vlgmr.msra.gmra.mxu2 %v1281_v24  ;;  %v2816_v24 = vld [vmem:[#allocation2] sm:$0x3] }
 0x231   : > { %v2854_v34 = vmul.f32 %v4813_v44, %v2816_v24 }
 0x237   : > { %1346 = vmatmul.f32.gmra.mxu0 %v1283_v38 }
 0x238   : > { %1392 = vmatmul.f32.gmra.mxu2 %v1283_v38 }
 0x240   : > { %v2250_v62 = vpop.f32.mrf.mxu3 }
 0x241   : > { %v2259_v30 = vmul.f32 %v2256_v47, %v2250_v62  ;;  %v4817_v62 = vld [vmem:[#allocation2 + $0x18] sm:$0x3] }
 0x243   : > { %v2266_v53 = vadd.f32 %v2263_v6, %v2259_v30 }
 0x245   : > { %v2268_v26 = vmax.f32 %v2266_v53, 0.0  ;;  %v2724_v53 = vpop.permute.xlu0 %2723 }
 0x247   : > { %2315 = vmatpush.msrb.mxu2 %v2268_v26 }
 0x248   : > { %3319 = vmatmul.msk.f32.vlgmr.msrb.gmra.mxu2 %vm1470_vm4, %v2269_v51 }
 0x24f   : > { %v2230_v45 = vpop.f32.mrf.mxu1 }
 0x250   : > { %3320 = vmatmul.msk.f32.gmra.mxu2 %vm1470_vm4, %v2270_v46  ;;  %v2258_v43 = vmul.f32 %v2256_v47, %v2230_v45 }
 0x252   : > { %v2265_v0 = vadd.f32 %v2263_v6, %v2258_v43 }
 0x254   : > { %v2267_v41 = vmax.f32 %v2265_v0, 0.0 }
 0x256   : > { %2292 = vmatpush.msrb.mxu0 %v2267_v41 }
 0x257   : > { %3317 = vmatmul.msk.f32.vlgmr.msrb.gmra.mxu0 %vm1470_vm4, %v2269_v51  ;;  %v4774_v5 = vpop.f32.mrf.mxu1  ;;  %v4823_v51 = vstv %s3335_s10  ;;  %s3346_s10 = sld [smem:[#allocation5 + $0x380]] }
 0x258   : > { %v2874_v45 = vmul.f32 %v4823_v51, %v2816_v24 }
 0x25a   : > { %v4770_v14 = vpop.f32.mrf.mxu3  ;;  %v2880_v43 = vrot.slane %v2874_v45, 1 }
 0x25f   : > { %3318 = vmatmul.msk.f32.gmra.mxu0 %vm1470_vm4, %v2270_v46  ;;  %v4779_v9 = vpop.f32.mrf.mxu1 }
 0x262   : > { %v4772_v56 = vpop.f32.mrf.mxu3 }
 0x276   : > { %v1422_v3 = vpop.permute.xlu2 %1421 }
 0x27e   : > { %v1441_v17 = vpop.permute.xlu2 %1440 }
 0x280   : > { %v2642_v42 = vpop.f32.mrf.mxu3 }
 0x281   : > { %v2651_v22 = vmul.f32 %v2648_v48, %v2642_v42  ;;  %v2729_v42 = vpop.permute.xlu1 %2728 }
 0x283   : > { %v2658_v35 = vadd.f32 %v2655_v37, %v2651_v22 }
 0x285   : > { %v2660_v29 = vmax.f32 %v2658_v35, 0.0 }
 0x287   : > { %2707 = vmatpush.msra.mxu2 %v2660_v29 }
 0x288   : > { %3331 = vmatmul.msk.f32.vlgmr.msra.gmra.mxu2 %vm1470_vm4, %v2661_v50 }
 0x290   : > { %v2622_v36 = vpop.f32.mrf.mxu1  ;;  %3332 = vmatmul.msk.f32.gmra.mxu2 %vm1470_vm4, %v2662_v11 }
 0x291   : > { %v2650_v8 = vmul.f32 %v2648_v48, %v2622_v36  ;;  %v2745_v36 = vpop.permute.xlu0 %2744 }
 0x293   : > { %v2657_v60 = vadd.f32 %v2655_v37, %v2650_v8  ;;  %v2740_v37 = vpop.permute.xlu2 %2739 }
 0x295   : > { %v2659_v12 = vmax.f32 %v2657_v60, 0.0 }
 0x297   : > { %2684 = vmatpush.msra.mxu0 %v2659_v12 }
 0x298   : > { %3329 = vmatmul.msk.f32.vlgmr.msra.gmra.mxu0 %vm1470_vm4, %v2661_v50 }
 0x2a0   : > { %3330 = vmatmul.msk.f32.gmra.mxu0 %vm1470_vm4, %v2662_v11 }
 0x2ac   : > { %v1344_v55 = vpop.f32.mrf.mxu0 }
 0x2ad   : > { %v1368_v63 = vadd.f32 %v4514_v40, %v1344_v55 }
 0x2af   : > { %v1429_v57 = vmul.f32 %v1422_v3, %v1368_v63  ;;  %v3634_v63 = vmov 256.0  }
 0x2b1   : > { %v4790_v4 = vadd.f32 %v1436_v54, %v1429_v57 }
 0x2b3   : > { %v1390_v1 = vpop.f32.mrf.mxu2  ;;  %v1447_v15 = vmax.f32 %v4790_v4, 0.0 }
 0x2b4   : > { %v1347_v10 = vpop.f32.mrf.mxu0  ;;  %v1414_v2 = vadd.f32 %v4521_v27, %v1390_v1 }
 0x2b5   : > { %v1371_v20 = vadd.f32 %v4552_v58, %v1347_v10 }
 0x2b6   : > { %v1430_v18 = vmul.f32 %v1422_v3, %v1414_v2 }
 0x2b7   : > { %v1431_v40 = vmul.f32 %v1427_v25, %v1371_v20 }
 0x2b8   : > { %v4793_v23 = vadd.f32 %v1436_v54, %v1430_v18 }
 0x2b9   : > { %v4802_v33 = vadd.f32 %v1441_v17, %v1431_v40 }
 0x2ba   : > { %v1448_v16 = vmax.f32 %v4793_v23, 0.0 }
 0x2bb   : > { %v1393_v19 = vpop.f32.mrf.mxu2  ;;  %v1449_v49 = vmax.f32 %v4802_v33, 0.0 }
 0x2bc   : > { %v1417_v7 = vadd.f32 %v4554_v61, %v1393_v19  ;;  %v1451_v27 = vadd.f32 %v1448_v16, %v1447_v15 }
 0x2be   : > { %v1432_v58 = vmul.f32 %v1427_v25, %v1417_v7  ;;  %1452 = vadd.xlane.f32.xlu1 %v1451_v27 }
 0x2c0   : > { %v4804_v28 = vadd.f32 %v1441_v17, %v1432_v58 }
 0x2c2   : > { %v1450_v39 = vmax.f32 %v4804_v28, 0.0 }
 0x2c4   : > { %v1454_v61 = vadd.f32 %v1450_v39, %v1449_v49 }
 0x2c6   : > { %1455 = vadd.xlane.f32.xlu2 %v1454_v61 }
 0x2cb   : > { %v2317_v13 = vpop.f32.mrf.mxu2 }
 0x2cc   : > { %v2370_v30 = vadd.f32 %v4770_v14, %v2317_v13  ;;  %v3633_v14 = vmov 16.0  }
 0x2cd   : > { %3470 = vrcp.f32 %v3633_v14 }
 0x2ce   : > { %3472 = vrcp.f32 %v3634_v63 }
 0x2d3   : > { %v2320_v38 = vpop.f32.mrf.mxu2  ;;  %v3471_v12 = vpop.eup %3470 }
 0x2d4   : > { %v2294_v47 = vpop.f32.mrf.mxu0  ;;  %v2373_v0 = vadd.f32 %v4772_v56, %v2320_v38  ;;  %v2770_v10 = vmul.f32 16.0, %v3471_v12  ;;  %v3473_v25 = vpop.eup %3472  ;;  %vm2774_vm14 = vweird.f32 %v3471_v12 }
 0x2d5   : > { %v2347_v29 = vadd.f32 %v4774_v5, %v2294_v47  ;;  %v1458_v13 = vmul.f32 256.0, %v3473_v25  ;;  %vm1462_vm15 = vweird.f32 %v3473_v25 }
 0x2d6   : > { %v2771_v17 = vsub.f32 1.0, %v2770_v10 }
 0x2d7   : > { %2822 = vrot.lane.b32.xlu1 %v2816_v24, %s5138_s3  ;;  %s5197_s3 = smov 15  }
 0x2d8   : > { %v2772_v47 = vmul.f32 %v3471_v12, %v2771_v17 }
 0x2dc   : > { %v2297_v26 = vpop.f32.mrf.mxu0 }
 0x2dd   : > { %v2350_v3 = vadd.f32 %v4779_v9, %v2297_v26  ;;  %v1459_v26 = vsub.f32 1.0, %v1458_v13 }
 0x2de   : > { %2983 = vrot.lane.b32.xlu2 %v4817_v62, %s5133_s4 }
 0x2df   : > { %2860 = vrot.lane.b32.xlu1 %v2854_v34, %s5131_s0 }
 0x2e6   : > { %3013 = vrot.lane.b32.xlu2 %v4817_v62, %s3629_s2 }
 0x2e7   : > { %2895 = vrot.lane.b32.xlu1 %v2816_v24, %s5136_s7  ;;  %s5194_s7 = sld [smem:[#allocation27_spill]] }
 0x2ef   : > { %2883 = vrot.lane.b32.xlu1 %v2880_v43, %s5131_s0  ;;  %s5193_s0 = smov 112  }
 0x2f7   : > { %2925 = vrot.lane.b32.xlu1 %v2816_v24, %s5134_s6  ;;  %s5196_s6 = smov 17  }
 0x30b   : > { %v2709_v6 = vpop.f32.mrf.mxu2 }
 0x30c   : > { %v2716_v46 = vadd.f32 %v2709_v6, %v2370_v30 }
 0x30e   : > { %v2732_v41 = vmul.f32 %v2724_v53, %v2716_v46 }
 0x310   : > { %v2748_v50 = vadd.f32 %v2740_v37, %v2732_v41 }
 0x312   : > { %v4831_v55 = vmax.f32 %v2748_v50, 0.0 }
 0x313   : > { %v2712_v48 = vpop.f32.mrf.mxu2 }
 0x314   : > { %v2718_v22 = vadd.f32 %v2712_v48, %v2373_v0  ;;  %v2773_v0 = vadd.f32 %v3471_v12, %v2772_v47 }
 0x315   : > { %v2686_v35 = vpop.f32.mrf.mxu0 }
 0x316   : > { %v2734_v11 = vmul.f32 %v2729_v42, %v2718_v22  ;;  %v2715_v60 = vadd.f32 %v2686_v35, %v2347_v29  ;;  %v1460_v22 = vmul.f32 %v3473_v25, %v1459_v26  ;;  %v2775_v29 = vsel %vm2774_vm14, %v3471_v12, %v2773_v0 }
 0x317   : > { %v3040_v26 = vstv %s3346_s10  ;;  %s5195_s10 = smov 111  }
 0x318   : > { %v2750_v8 = vadd.f32 %v2745_v36, %v2734_v11  ;;  %v2731_v1 = vmul.f32 %v2724_v53, %v2715_v60 }
 0x31a   : > { %v4833_v56 = vmax.f32 %v2750_v8, 0.0  ;;  %v2747_v7 = vadd.f32 %v2740_v37, %v2731_v1  ;;  %v1461_v8 = vadd.f32 %v3473_v25, %v1460_v22 }
 0x31c   : > { %v2762_v57 = vadd.f32 %v4833_v56, %v4831_v55  ;;  %v2785_v5 = vmax.f32 %v4831_v55, %v4833_v56  ;;  %v4841_v34 = vmax.f32 %v2747_v7, 0.0  ;;  %v1463_v10 = vsel %vm1462_vm15, %v3473_v25, %v1461_v8 }
 0x31d   : > { %v2689_v2 = vpop.f32.mrf.mxu0 }
 0x31e   : > { %v2763_v54 = vrot.slane %v2762_v57, 4  ;;  %v2786_v18 = vrot.slane %v2785_v5, 4  ;;  %v2717_v20 = vadd.f32 %v2689_v2, %v2350_v3 }
 0x320   : > { %v2764_v40 = vadd.f32 %v2763_v54, %v2762_v57  ;;  %v2787_v19 = vmax.f32 %v2785_v5, %v2786_v18  ;;  %v2733_v27 = vmul.f32 %v2729_v42, %v2717_v20 }
 0x322   : > { %v2765_v58 = vrot.slane %v2764_v40, 2  ;;  %v2788_v9 = vrot.slane %v2787_v19, 2  ;;  %v2749_v61 = vadd.f32 %v2745_v36, %v2733_v27 }
 0x324   : > { %v2766_v24 = vadd.f32 %v2765_v58, %v2764_v40  ;;  %v4843_v38 = vmax.f32 %v2749_v61, 0.0  ;;  %v2789_v6 = vmax.f32 %v2787_v19, %v2788_v9  ;;  %v1466_v19 = vld [vmem:[%s5191_s29] sm:$0xff] }
 0x326   : > { %v2755_v30 = vadd.f32 %v4843_v38, %v4841_v34  ;;  %v2778_v53 = vmax.f32 %v4841_v34, %v4843_v38  ;;  %v2767_v46 = vrot.slane %v2766_v24, 1  ;;  %v2790_v41 = vrot.slane %v2789_v6, 1 }
 0x328   : > { %v2756_v45 = vrot.slane %v2755_v30, 4  ;;  %v2779_v43 = vrot.slane %v2778_v53, 4  ;;  %v2768_v14 = vadd.f32 %v2767_v46, %v2766_v24  ;;  %v2791_v50 = vmax.f32 %v2789_v6, %v2790_v41  ;;  %v1480_v46 = vld [vmem:[%s5192_s8] sm:$0x1]  ;;  %s5201_s8 = sld [smem:[#allocation28_spill]] }
 0x32a   : > { %v2757_v48 = vadd.f32 %v2756_v45, %v2755_v30  ;;  %v2780_v42 = vmax.f32 %v2778_v53, %v2779_v43  ;;  %v2777_v60 = vmul.f32 %v2775_v29, %v2768_v14  ;;  %v2807_v57 = vrot.slane %v2791_v50, 7 }
 0x32b   : > { %v3060_v50 = vstv %s3347_s9  ;;  %s4951_s9 = sld [smem:[#allocation5 + $0x180]] }
 0x32c   : > { %v2758_v37 = vrot.slane %v2757_v48, 2  ;;  %v2781_v35 = vrot.slane %v2780_v42, 2  ;;  %v2794_v54 = vrot.slane %v2777_v60, 7 }
 0x32e   : > { %v2759_v11 = vadd.f32 %v2758_v37, %v2757_v48  ;;  %v2782_v36 = vmax.f32 %v2780_v42, %v2781_v35  ;;  %v1484_v48 = vld [vmem:[%s5194_s7 + $0x8] sm:$0xff]  ;;  %v1483_v42 = vld [vmem:[%s5194_s7] sm:$0xff] }
 0x330   : > { %v2760_v63 = vrot.slane %v2759_v11, 1  ;;  %v2783_v3 = vrot.slane %v2782_v36, 1 }
 0x331   : > { %v1453_v2 = vpop.xlane.xlu1 %1452 }
 0x332   : > { %v2761_v5 = vadd.f32 %v2760_v63, %v2759_v11  ;;  %v2784_v1 = vmax.f32 %v2782_v36, %v2783_v3  ;;  %v1464_v40 = vmul.f32 %v1463_v10, %v1453_v2 }
 0x334   : > { %v2776_v18 = vmul.f32 %v2775_v29, %v2761_v5  ;;  %v2808_v20 = vsel %vm2795_vm13, %v2784_v1, %v2807_v57  ;;  %v1468_v27 = vmul.f32 %v1466_v19, %v1464_v40 }
 0x335   : > { %2811 = vst.msk [vmem:[#allocation2 + $0x9] ss:$8 sm:$0x3] %vm2800_vm3, %v2808_v20 }
 0x336   : > { %v2796_v12 = vsel %vm2795_vm13, %v2776_v18, %v2794_v54  ;;  %v1471_v58 = vsel %vm1470_vm4, %v1468_v27, 0.0  ;;  %v3043_v54 = vmul.f32 %v3040_v26, %v4817_v62 }
 0x337   : > { %2803 = vst.msk [vmem:[#allocation2 + $0x8] ss:$8 sm:$0x3] %vm2800_vm3, %v2796_v12 }
 0x339   : > { %v1456_v7 = vpop.xlane.xlu2 %1455 }
 0x33a   : > { %v1465_v17 = vmul.f32 %v1463_v10, %v1456_v7 }
 0x33c   : > { %v1469_v25 = vmul.f32 %v1467_v21, %v1465_v17  ;;  %v1495_v21 = vld [vmem:[%s5201_s8 + $0x8] sm:$0xff] }
 0x33e   : > { %v2973_v9 = vld [vmem:[#allocation2 + $0x8] sm:$0x3]  ;;  %v1472_v61 = vsel %vm1470_vm4, %v1469_v25, 0.0  ;;  %v4874_v8 = vld [vmem:[#allocation2 + $0x10] sm:$0x3] }
 0x33f   : > { %2979 = vrot.lane.b32.xlu1 %v2973_v9, %s5133_s4  ;;  %v1473_v13 = vadd.f32 %v1472_v61, %v1471_v58  ;;  %v3041_v43 = vmul.f32 %v3040_v26, %v2973_v9  ;;  %v3061_v11 = vmul.f32 %v3060_v50, %v2973_v9  ;;  %v4878_v60 = vld [vmem:[#allocation2 + $0x8] sm:$0x3]  ;;  %s5198_s4 = smov 1   ;;  %v2974_v63 = vld [vmem:[#allocation2 + $0x10] sm:$0x3]  ;;  %v2856_v3 = vmul.f32 %v4813_v44, %v4874_v8 }
 0x340   : > { %v2876_v57 = vmul.f32 %v4823_v51, %v4874_v8  ;;  %v2855_v1 = vmul.f32 %v4813_v44, %v4878_v60  ;;  %v2875_v10 = vmul.f32 %v4823_v51, %v4878_v60  ;;  %v3042_v18 = vmul.f32 %v3040_v26, %v2974_v63 }
 0x341   : > { %v1474_v24 = vrot.slane %v1473_v13, 4  ;;  %v3067_v36 = vrot.slane %v3061_v11, 1  ;;  %v3063_v44 = vmul.f32 %v3060_v50, %v4817_v62  ;;  %v3062_v12 = vmul.f32 %v3060_v50, %v2974_v63  ;;  %v4913_v40 = vpop.permute.xlu2 %2983 }
 0x342   : > { %v2882_v5 = vrot.slane %v2876_v57, 1  ;;  %v2881_v2 = vrot.slane %v2875_v10, 1 }
 0x343   : > { %v1475_v47 = vadd.f32 %v1474_v24, %v1473_v13  ;;  %v3069_v20 = vrot.slane %v3063_v44, 1  ;;  %v3068_v51 = vrot.slane %v3062_v12, 1 }
 0x345   : > { %v1476_v6 = vrot.slane %v1475_v47, 2 }
 0x347   : > { %v1477_v30 = vadd.f32 %v1476_v6, %v1475_v47  ;;  %3009 = vrot.lane.b32.xlu1 %v2973_v9, %s3629_s2 }
 0x349   : > { %v1478_v53 = vrot.slane %v1477_v30, 1  ;;  %v4915_v19 = vpop.permute.xlu2 %3013  ;;  %v2823_v7 = vpop.permute.xlu1 %2822 }
 0x34b   : > { %v1479_v45 = vadd.f32 %v1478_v53, %v1477_v30 }
 0x34d   : > { %v1481_v0 = vadd.f32 %v1480_v46, %v1479_v45 }
 0x34f   : > { %3047 = vrot.lane.b32.xlu1 %v3041_v43, %s5193_s0  ;;  %v1482_v41 = vmax.f32 %v1481_v0, 0.0 }
 0x351   : > { %v1485_v22 = vperm.slane %v1482_v41, 0  ;;  %v4923_v13 = vpop.permute.xlu1 %2860 }
 0x353   : > { %v1487_v14 = vmul.f32 %v1485_v22, %v1484_v48  ;;  %v1486_v37 = vmul.f32 %v1485_v22, %v1483_v42 }
 0x355   : > { %v1491_v35 = vsel %vm1470_vm4, %v1487_v14, 0.0  ;;  %v1488_v29 = vsel %vm1470_vm4, %v1486_v37, 0.0 }
 0x356   : > { %1492 = vadd.xlane.f32.xlu2 %v1491_v35  ;;  %1489 = vadd.xlane.f32.xlu0 %v1488_v29 }
 0x357   : > { %3082 = vrot.lane.b32.xlu1 %v2973_v9, %s5195_s10 }
 0x359   : > { %v2896_v46 = vpop.permute.xlu1 %2895 }
 0x35f   : > { %3070 = vrot.lane.b32.xlu1 %v3067_v36, %s5193_s0 }
 0x36a   : > { %2826 = vrot.lane.b32.xlu0 %v4874_v8, %s5196_s6 }
 0x36e   : > { %2824 = vrot.lane.b32.xlu2 %v4878_v60, %s5196_s6  ;;  %s5202_s6 = smov %s5201_s8  ;;  %s4947_s8 = sld [smem:[#allocation5 + $0x201]] }
 0x372   : > { %2897 = vrot.lane.b32.xlu0 %v4878_v60, %s5197_s3 }
 0x376   : > { %2899 = vrot.lane.b32.xlu2 %v4874_v8, %s5197_s3  ;;  %s4963_s3 = sld [smem:[#allocation5 + $0x200]] }
 0x37a   : > { %2927 = vrot.lane.b32.xlu0 %v4878_v60, %s5198_s4 }
 0x37e   : > { %2929 = vrot.lane.b32.xlu2 %v4874_v8, %s5198_s4  ;;  %s2813_s4 = sld [smem:[#allocation4]] }
 0x382   : > { %2981 = vrot.lane.b32.xlu0 %v2974_v63, %s5199_s1  ;;  %s4939_s1 = sld [smem:[#allocation5 + $0x101]] }
 0x386   : > { %2864 = vrot.lane.b32.xlu2 %v2856_v3, %s5200_s5 }
 0x38a   : > { %3011 = vrot.lane.b32.xlu0 %v2974_v63, %s3629_s2  ;;  %s4941_s2 = sld [smem:[#allocation5 + $0x100]] }
 0x38e   : > { %2887 = vrot.lane.b32.xlu2 %v2882_v5, %s5200_s5  ;;  %v4925_v5 = vpop.permute.xlu1 %2883 }
 0x392   : > { %2862 = vrot.lane.b32.xlu0 %v2855_v1, %s5200_s5 }
 0x396   : > { %3051 = vrot.lane.b32.xlu2 %v3043_v54, %s5193_s0 }
 0x39a   : > { %2885 = vrot.lane.b32.xlu0 %v2881_v2, %s5200_s5 }
 0x39e   : > { %3086 = vrot.lane.b32.xlu2 %v4817_v62, %s5195_s10  ;;  %v1494_v62 = vld [vmem:[%s5202_s6] sm:$0xff]  ;;  %s3572_s6 = scalar_lea.hbm %s5111_s27, 64 }
 0x3a2   : > { %3049 = vrot.lane.b32.xlu0 %v3042_v18, %s5193_s0 }
 0x3a6   : > { %3074 = vrot.lane.b32.xlu2 %v3069_v20, %s5193_s0  ;;  %v2926_v20 = vpop.permute.xlu1 %2925 }
 0x3aa   : > { %3084 = vrot.lane.b32.xlu0 %v2974_v63, %s5195_s10  ;;  %s3333_s10 = sld [smem:[#allocation5 + $0x1]] }
 0x3b2   : > { %3072 = vrot.lane.b32.xlu0 %v3068_v51, %s5193_s0  ;;  %s2834_s0 = sld [smem:[#allocation5]] }
 0x3c9   : > { %v1493_v27 = vpop.xlane.xlu2 %1492  ;;  %v1490_v25 = vpop.xlane.xlu0 %1489 }
 0x3ca   : > { %v1497_v17 = vadd.f32 %v1495_v21, %v1493_v27  ;;  %v1496_v58 = vadd.f32 %v1494_v62, %v1490_v25  ;;  %v4929_v21 = vpop.permute.xlu1 %2979 }
 0x3cc   : > { %v3310_v9 = vmul.f32 -1.442695, %v1497_v17  ;;  %v3309_v61 = vmul.f32 -1.442695, %v1496_v58  ;;  %v2835_v58 = vstv %s2834_s0  ;;  %s4967_s0 = sld [smem:[#allocation5 + $0x281]] }
 0x3ce   : > { %3474 = vpow2.f32 %v3310_v9  ;;  %v2841_v9 = vstv %s3333_s10  ;;  %s4980_s10 = sld [smem:[#allocation5 + $0x280]] }
 0x3cf   : > { %3476 = vpow2.f32 %v3309_v61 }
 0x3d1   : > { %v2825_v43 = vpop.permute.xlu2 %2824 }
 0x3d2   : > { %v2828_v62 = vsel %vm897_vm0, %v2823_v7, %v2825_v43 }
 0x3d3   : > { %v2832_v61 = vsel %vm4195_vm12, %v2828_v62, 0.0 }
 0x3d4   : > { %v3475_v24 = vpop.eup %3474 }
 0x3d5   : > { %v3477_v47 = vpop.eup %3476  ;;  %v1505_v6 = vadd.f32 1.0, %v3475_v24 }
 0x3d6   : > { %v1504_v30 = vadd.f32 1.0, %v3477_v47  ;;  %v2836_v47 = vmul.f32 %v2835_v58, %v2832_v61 }
 0x3d7   : > { %3478 = vrcp.f32 %v1505_v6  ;;  %v1532_v14 = vand.u32 2147483648, %v1505_v6  ;;  %v1530_v37 = vand.u32 2147483647, %v1505_v6  ;;  %vm1526_vm4 = vweird.f32 %v1505_v6 }
 0x3d8   : > { %3480 = vrcp.f32 %v1504_v30  ;;  %v1517_v29 = vand.u32 2147483648, %v1504_v30  ;;  %v1515_v36 = vand.u32 2147483647, %v1504_v30  ;;  %vm1511_vm13 = vweird.f32 %v1504_v30 }
 0x3d9   : > { %v1533_v57 = vor.u32 1.1754944e-38, %v1532_v14  ;;  %vm1531_vm1 = vcmp.eq.f32.partialorder %v1530_v37, 8.507059e+37  ;;  %v2900_v10 = vpop.permute.xlu2 %2899  ;;  %v2914_v37 = vstv %s4939_s1  ;;  %s4992_s1 = sld [smem:[#allocation5 + $0x301]] }
 0x3da   : > { %v1518_v1 = vor.u32 1.1754944e-38, %v1517_v29  ;;  %vm1516_vm7 = vcmp.eq.f32.partialorder %v1515_v36, 8.507059e+37 }
 0x3dc   : > { %v2827_v53 = vpop.permute.xlu0 %2826 }
 0x3dd   : > { %v3479_v26 = vpop.eup %3478  ;;  %v2829_v27 = vsel %vm897_vm0, %v2825_v43, %v2827_v53  ;;  %v2814_v53 = vstv %s2813_s4  ;;  %s4984_s4 = sld [smem:[#allocation5 + $0x300]]  ;;  %vm5203_vm0 = vcmask 1039360  }
 0x3de   : > { %v3481_v45 = vpop.eup %3480  ;;  %v1522_v0 = vmul.f32 %v3479_v26, %v1505_v6  ;;  %vm1527_vm3 = vweird.f32 %v3479_v26  ;;  %v2833_v24 = vsel %vm4073_vm6, %v2829_v27, 0.0  ;;  %v2842_v6 = vmul.f32 %v2841_v9, %v2832_v61 }
 0x3df   : > { %v1507_v41 = vmul.f32 %v3481_v45, %v1504_v30  ;;  %vm1512_vm14 = vweird.f32 %v3481_v45  ;;  %vm1528_vm15 = vmor %vm1526_vm4, %vm1527_vm3  ;;  %v2837_v30 = vmul.f32 %v2835_v58, %v2833_v24  ;;  %v2843_v7 = vmul.f32 %v2841_v9, %v2833_v24 }
 0x3e0   : > { %v1523_v48 = vsub.f32 1.0, %v1522_v0  ;;  %vm1513_vm5 = vmor %vm1511_vm13, %vm1512_vm14  ;;  %v4949_v0 = vpop.permute.xlu1 %3009  ;;  %v2962_v27 = vstv %s4947_s8  ;;  %s871_s8 = sand.u32 1, %s3610_s30  }
 0x3e1   : > { %v1508_v42 = vsub.f32 1.0, %v1507_v41  ;;  %v2930_v12 = vpop.permute.xlu2 %2929  ;;  %v2838_v41 = vadd.f32 %v2836_v47, %v2814_v53  ;;  %v2938_v47 = vstv %s4951_s9  ;;  %s3296_s9 = sshll.u32 %s871_s8, 5 }
 0x3e2   : > { %v1524_v22 = vmul.f32 %v3479_v26, %v1523_v48  ;;  %v2846_v48 = vrot.slane %v2842_v6, 1 }
 0x3e3   : > { %v1509_v35 = vmul.f32 %v3481_v45, %v1508_v42  ;;  %v2839_v42 = vadd.f32 %v2837_v30, %v2814_v53 }
 0x3e4   : > { %v2898_v50 = vpop.permute.xlu0 %2897  ;;  %v1525_v11 = vadd.f32 %v3479_v26, %v1524_v22  ;;  %v2847_v22 = vrot.slane %v2843_v7, 1 }
 0x3e5   : > { %v1510_v63 = vadd.f32 %v3481_v45, %v1509_v35  ;;  %v2902_v43 = vsel %vm1055_vm10, %v2898_v50, %v2900_v10 }
 0x3e6   : > { %v1529_v3 = vsel %vm1528_vm15, %v3479_v26, %v1525_v11 }
 0x3e7   : > { %v1534_v2 = vsel %vm1531_vm1, %v1533_v57, %v1529_v3  ;;  %v1514_v54 = vsel %vm1513_vm5, %v3481_v45, %v1510_v63  ;;  %v2901_v45 = vsel %vm1055_vm10, %v2896_v46, %v2898_v50  ;;  %v2906_v46 = vsel %vm4009_vm2, %v2902_v43, 0.0  ;;  %vm5204_vm1 = vmmov %vm5203_vm0 }
 0x3e8   : > { %1543 = vperm.xlu0 %3462, %v1534_v2   ;;  %v1519_v18 = vsel %vm1516_vm7, %v1518_v1, %v1514_v54  ;;  %v2905_v35 = vsel %vm4112_vm8, %v2901_v45, 0.0  ;;  %v2850_v63 = vadd.f32 %v2846_v48, %v2838_v41  ;;  %v2851_v3 = vadd.f32 %v2847_v22, %v2839_v42  ;;  %v4982_v7 = vpop.permute.xlu1 %3047 }
 0x3e9   : > { %1538 = vperm.xlu1 %3468, %v1519_v18   ;;  %v2865_v17 = vpop.permute.xlu2 %2864  ;;  %v2908_v57 = vstv %s4941_s2  ;;  %v2915_v1 = vmul.f32 %v2914_v37, %v2905_v35  ;;  %v2916_v10 = vmul.f32 %v2914_v37, %v2906_v46  ;;  %v2944_v2 = vstv %s4943_s28  ;;  %s5017_s2 = sld [smem:[#allocation5 + $0x401]] }
 0x3ea   : > { %v2910_v58 = vmul.f32 %v2908_v57, %v2906_v46  ;;  %v2956_v48 = vstv %s4963_s3  ;;  %v2963_v42 = vmul.f32 %v2962_v27, %v4878_v60  ;;  %vm5205_vm5 = vcmask 924672   ;;  %s5019_s28 = sld [smem:[#allocation5 + $0x400]]  ;;  %s3361_s3 = sshll.u32 %s3800_s26, 5 }
 0x3eb   : > { %v2919_v53 = vrot.slane %v2915_v1, 1  ;;  %vm5206_vm7 = vmmov %vm5205_vm5  ;;  %vm5209_vm10 = vcmask 916480   ;;  %s873_s26 = scalar_lea.vmem [#allocation8], %s3296_s9 }
 0x3ec   : > { %v2928_v44 = vpop.permute.xlu0 %2927 }
 0x3ed   : > { %v2931_v29 = vsel %vm1096_vm9, %v2926_v20, %v2928_v44  ;;  %v2932_v50 = vsel %vm1096_vm9, %v2928_v44, %v2930_v12 }
 0x3ee   : > { %v2935_v54 = vsel %vm4195_vm12, %v2931_v29, 0.0 }
 0x3ef   : > { %v2945_v6 = vmul.f32 %v2944_v2, %v2935_v54  ;;  %v2939_v22 = vmul.f32 %v2938_v47, %v2935_v54 }
 0x3f1   : > { %v2888_v14 = vpop.permute.xlu2 %2887  ;;  %v2949_v46 = vrot.slane %v2945_v6, 1 }
 0x3f4   : > { %v4927_v51 = vpop.permute.xlu0 %2981 }
 0x3f5   : > { %v2985_v43 = vsel %vm5203_vm0, %v4929_v21, %v4927_v51  ;;  %v2986_v41 = vsel %vm5204_vm1, %v4927_v51, %v4913_v40 }
 0x3f6   : > { %v2989_v21 = vsel %vm4112_vm8, %v2985_v43, 0.0  ;;  %v2990_v40 = vsel %vm4009_vm2, %v2986_v41, 0.0 }
 0x3f9   : > { %v4977_v24 = vpop.permute.xlu2 %3051 }
 0x3fc   : > { %v4933_v25 = vpop.permute.xlu0 %3011 }
 0x3fd   : > { %v3015_v1 = vsel %vm5205_vm5, %v4949_v0, %v4933_v25 }
 0x404   : > { %v2863_v26 = vpop.permute.xlu0 %2862 }
 0x405   : > { %v2866_v11 = vsel %vm1014_vm11, %v4923_v13, %v2863_v26  ;;  %v2867_v36 = vsel %vm1014_vm11, %v2863_v26, %v2865_v17  ;;  %v2936_v13 = vsel %vm4073_vm6, %v2932_v50, 0.0  ;;  %v2909_v17 = vmul.f32 %v2908_v57, %v2905_v35 }
 0x406   : > { %v2870_v18 = vadd.f32 %v2866_v11, %v2850_v63  ;;  %v2871_v44 = vadd.f32 %v2867_v36, %v2851_v3  ;;  %v2946_v30 = vmul.f32 %v2944_v2, %v2936_v13  ;;  %v2998_v50 = vstv %s4967_s0 }
 0x407   : > { %v2964_v11 = vmul.f32 %v2962_v27, %v4874_v8  ;;  %v2957_v3 = vmul.f32 %v2956_v48, %v4878_v60  ;;  %v2958_v57 = vmul.f32 %v2956_v48, %v4874_v8  ;;  %v3087_v60 = vpop.permute.xlu2 %3086  ;;  %v3028_v8 = vstv %s4992_s1  ;;  %s3177_s1 = sshll.u32 %s873_s26, 4  ;;  %s3178_s1 = int_to_ptr.vmem [resolvable:$true] %s3177_s1 }
 0x408   : > { %v2950_v29 = vrot.slane %v2946_v30, 1 }
 0x409   : > { %v2968_v27 = vrot.slane %v2964_v11, 1 }
 0x40c   : > { %v2886_v20 = vpop.permute.xlu0 %2885 }
 0x40d   : > { %v2889_v12 = vsel %vm1014_vm11, %v4925_v5, %v2886_v20  ;;  %v2890_v62 = vsel %vm1014_vm11, %v2886_v20, %v2888_v14  ;;  %v2920_v5 = vrot.slane %v2916_v10, 1  ;;  %v2940_v14 = vmul.f32 %v2938_v47, %v2936_v13  ;;  %vm5210_vm11 = vmmov %vm5209_vm10 }
 0x40e   : > { %v2893_v9 = vadd.f32 %v2889_v12, %v2870_v18  ;;  %v2894_v61 = vadd.f32 %v2890_v62, %v2871_v44  ;;  %v3016_v10 = vsel %vm5206_vm7, %v4933_v25, %v4915_v19  ;;  %v2992_v13 = vstv %s4980_s10  ;;  %v3083_v19 = vpop.permute.xlu1 %3082 }
 0x40f   : > { %v2999_v18 = vmul.f32 %v2998_v50, %v2989_v21  ;;  %v3000_v44 = vmul.f32 %v2998_v50, %v2990_v40  ;;  %v2967_v62 = vrot.slane %v2963_v42, 1  ;;  %v3020_v0 = vsel %vm4073_vm6, %v3016_v10, 0.0 }
 0x410   : > { %v2911_v26 = vadd.f32 %v2909_v17, %v2893_v9  ;;  %v2912_v45 = vadd.f32 %v2910_v58, %v2894_v61  ;;  %v3022_v17 = vstv %s4984_s4  ;;  %v3019_v58 = vsel %vm4195_vm12, %v3015_v1, 0.0  ;;  %s3176_s4 = scalar_lea.hbm %s5111_s27, %s3361_s3  ;;  %s3165_s3 = scalar_lea.sflag [#allocation6], %s871_s8 }
 0x411   : > { %v2993_v25 = vmul.f32 %v2992_v13, %v2989_v21  ;;  %v2994_v9 = vmul.f32 %v2992_v13, %v2990_v40  ;;  %v3003_v6 = vrot.slane %v2999_v18, 1  ;;  %v3004_v30 = vrot.slane %v3000_v44, 1 }
 0x412   : > { %v2923_v37 = vadd.f32 %v2919_v53, %v2911_v26  ;;  %v2924_v35 = vadd.f32 %v2920_v5, %v2912_v45  ;;  %v3029_v53 = vmul.f32 %v3028_v8, %v3019_v58  ;;  %v3030_v5 = vmul.f32 %v3028_v8, %v3020_v0 }
 0x413   : > { %v3023_v43 = vmul.f32 %v3022_v17, %v3019_v58  ;;  %v3024_v59 = vmul.f32 %v3022_v17, %v3020_v0  ;;  %vm5207_vm6 = vcmask 908288  }
 0x414   : > { %v2941_v51 = vadd.f32 %v2939_v22, %v2923_v37  ;;  %v2942_v36 = vadd.f32 %v2940_v14, %v2924_v35  ;;  %v3050_v63 = vpop.permute.xlu0 %3049  ;;  %vm5208_vm9 = vmmov %vm5207_vm6  ;;  %v3033_v14 = vrot.slane %v3029_v53, 1  ;;  %v3034_v37 = vrot.slane %v3030_v5, 1 }
 0x416   : > { %v2953_v2 = vadd.f32 %v2949_v46, %v2941_v51  ;;  %v2954_v54 = vadd.f32 %v2950_v29, %v2942_v36  ;;  %v3101_v29 = vstv %s5017_s2  ;;  %v3075_v51 = vpop.permute.xlu2 %3074  ;;  %v3053_v36 = vsel %vm5209_vm10, %v4982_v7, %v3050_v63  ;;  %v3071_v1 = vpop.permute.xlu1 %3070 }
 0x418   : > { %v2959_v20 = vadd.f32 %v2957_v3, %v2953_v2  ;;  %v2960_v12 = vadd.f32 %v2958_v57, %v2954_v54  ;;  %v3054_v3 = vsel %vm5210_vm11, %v3050_v63, %v4977_v24  ;;  %v3095_v57 = vstv %s5019_s28  ;;  %s3179_s28 = sshll.u32 %s3176_s4, 4  ;;  %s3180_s28 = int_to_ptr.hbm [resolvable:$true] %s3179_s28 }
 0x419   : > { %s3566_s0 = sshra.s32 %s3180_s28, 4  ;;  %s3567_s0 = int_to_ptr.hbm [resolvable:$true] %s3566_s0 }
 0x41a   : > { %v2971_v61 = vadd.f32 %v2967_v62, %v2959_v20  ;;  %v2972_v47 = vadd.f32 %v2968_v27, %v2960_v12  ;;  %s3568_s9 = scalar_lea.hbm %s3567_s0, 32  ;;  %p3573_p3 = scmp.lt.s32.totalorder %s3567_s0, %s5111_s27 }
 0x41b   : > { %p3569_p0 = scmp.ne.s32.totalorder %s3567_s0, %s3568_s9  ;;  %p3574_p4 = scmp.lt.s32.totalorder %s3572_s6, %s3568_s9 }
 0x41c   : > { %v2995_v26 = vadd.f32 %v2993_v25, %v2971_v61  ;;  %v2996_v52 = vadd.f32 %v2994_v9, %v2972_v47  ;;  %v3085_v45 = vpop.permute.xlu0 %3084 }
 0x41d   : > { %v3088_v42 = vsel %vm5207_vm6, %v3083_v19, %v3085_v45  ;;  %v3089_v22 = vsel %vm5208_vm9, %v3085_v45, %v3087_v60  ;;  %p3570_p1 = pnand %p3569_p0, %p3817_p5  ;;  %p3575_p7 = por %p3574_p4, %p3573_p3 }
 0x41e   : > { %v3007_v41 = vadd.f32 %v3003_v6, %v2995_v26  ;;  %v3008_v48 = vadd.f32 %v3004_v30, %v2996_v52  ;;  %v3092_v50 = vsel %vm4112_vm8, %v3088_v42, 0.0  ;;  %v3093_v11 = vsel %vm4009_vm2, %v3089_v22, 0.0  ;;  %vm5211_vm8 = vmmov %vm5209_vm10 }
 0x41f   : > { %v3102_v54 = vmul.f32 %v3101_v29, %v3092_v50  ;;  %v3103_v13 = vmul.f32 %v3101_v29, %v3093_v11  ;;  %vm5212_vm12 = vmmov %vm5211_vm8  ;;  %v3096_v44 = vmul.f32 %v3095_v57, %v3092_v50  ;;  %v3097_v20 = vmul.f32 %v3095_v57, %v3093_v11  ;;  %p3571_p2 = pneg %p3570_p1 }
 0x420   : > { %v3025_v35 = vadd.f32 %v3023_v43, %v3007_v41  ;;  %v3026_v46 = vadd.f32 %v3024_v59, %v3008_v48 }
 0x421   : > { %v3106_v27 = vrot.slane %v3102_v54, 1  ;;  %v3107_v7 = vrot.slane %v3103_v13, 1  ;;  %p3576_p8 = pnand %p3575_p7, %p3571_p2 }
 0x422   : > { %v3037_v21 = vadd.f32 %v3033_v14, %v3025_v35  ;;  %v3038_v40 = vadd.f32 %v3034_v37, %v3026_v46 }
 0x424   : > { %v3057_v10 = vadd.f32 %v3053_v36, %v3037_v21  ;;  %v3058_v2 = vadd.f32 %v3054_v3, %v3038_v40  ;;  %v3073_v32 = vpop.permute.xlu0 %3072 }
 0x425   : > { %v3076_v18 = vsel %vm5211_vm8, %v3071_v1, %v3073_v32  ;;  %v3077_v31 = vsel %vm5212_vm12, %v3073_v32, %v3075_v51 }
 0x426   : > { %v3080_v12 = vadd.f32 %v3076_v18, %v3057_v10  ;;  %v3081_v62 = vadd.f32 %v3077_v31, %v3058_v2 }
 0x428   : > { %v3098_v60 = vadd.f32 %v3096_v44, %v3080_v12  ;;  %v3099_v17 = vadd.f32 %v3097_v20, %v3081_v62 }
 0x42a   : > { %v3110_v24 = vadd.f32 %v3106_v27, %v3098_v60  ;;  %v3111_v63 = vadd.f32 %v3107_v7, %v3099_v17 }
 0x42c   : > { %v3350_v8 = vmul.f32 -1.442695, %v3110_v24  ;;  %v3351_v58 = vmul.f32 -1.442695, %v3111_v63 }
 0x42e   : > { %3482 = vpow2.f32 %v3350_v8 }
 0x42f   : > { %3484 = vpow2.f32 %v3351_v58 }
 0x434   : > { %v3483_v0 = vpop.eup %3482 }
 0x435   : > { %v3485_v19 = vpop.eup %3484  ;;  %v3118_v25 = vadd.f32 1.0, %v3483_v0 }
 0x436   : > { %v3119_v9 = vadd.f32 1.0, %v3485_v19 }
 0x437   : > { %3486 = vrcp.f32 %v3118_v25  ;;  %v3131_v43 = vand.u32 2147483648, %v3118_v25  ;;  %vm3125_vm4 = vweird.f32 %v3118_v25  ;;  %v3129_v41 = vand.u32 2147483647, %v3118_v25 }
 0x438   : > { %3488 = vrcp.f32 %v3119_v9  ;;  %v3146_v48 = vand.u32 2147483648, %v3119_v9  ;;  %vm3140_vm15 = vweird.f32 %v3119_v9  ;;  %v3144_v42 = vand.u32 2147483647, %v3119_v9 }
 0x439   : > { %v3132_v14 = vor.u32 1.1754944e-38, %v3131_v43  ;;  %vm3130_vm0 = vcmp.eq.f32.partialorder %v3129_v41, 8.507059e+37 }
 0x43a   : > { %v3147_v35 = vor.u32 1.1754944e-38, %v3146_v48  ;;  %vm3145_vm1 = vcmp.eq.f32.partialorder %v3144_v42, 8.507059e+37 }
 0x43d   : > { %v3487_v61 = vpop.eup %3486 }
 0x43e   : > { %v3489_v47 = vpop.eup %3488  ;;  %v3121_v6 = vmul.f32 %v3487_v61, %v3118_v25  ;;  %vm3126_vm2 = vweird.f32 %v3487_v61 }
 0x43f   : > { %v3136_v30 = vmul.f32 %v3489_v47, %v3119_v9  ;;  %vm3141_vm3 = vweird.f32 %v3489_v47  ;;  %vm3127_vm14 = vmor %vm3125_vm4, %vm3126_vm2 }
 0x440   : > { %v3122_v53 = vsub.f32 1.0, %v3121_v6  ;;  %vm3142_vm13 = vmor %vm3140_vm15, %vm3141_vm3 }
 0x441   : > { %v3137_v5 = vsub.f32 1.0, %v3136_v30 }
 0x442   : > { %v3123_v26 = vmul.f32 %v3487_v61, %v3122_v53 }
 0x443   : > { %v3138_v52 = vmul.f32 %v3489_v47, %v3137_v5 }
 0x444   : > { %v3124_v45 = vadd.f32 %v3487_v61, %v3123_v26 }
 0x445   : > { %v3139_v59 = vadd.f32 %v3489_v47, %v3138_v52 }
 0x446   : > { %v3128_v22 = vsel %vm3127_vm14, %v3487_v61, %v3124_v45 }
 0x447   : > { %v3143_v37 = vsel %vm3142_vm13, %v3489_v47, %v3139_v59  ;;  %v3133_v46 = vsel %vm3130_vm0, %v3132_v14, %v3128_v22 }
 0x448   : > { %v3148_v29 = vsel %vm3145_vm1, %v3147_v35, %v3143_v37  ;;  %v3150_v50 = vperm.slane %v3133_v46, 0 }
 0x449   : > { %v3151_v11 = vperm.slane %v3148_v29, 0 }
 0x44a   : > { %v3152_v51 = vmul.f32 %v3150_v50, %v4841_v34  ;;  %v3154_v36 = vmul.f32 %v3150_v50, %v4843_v38 }
 0x44b   : > { %v3153_v2 = vmul.f32 %v3151_v11, %v4831_v55  ;;  %v3155_v34 = vmul.f32 %v3151_v11, %v4833_v56 }
 0x45a   : > { %v1544_v21 = vpop.permute.xlu0 %1543 }
 0x45b   : > { %v1539_v40 = vpop.permute.xlu1 %1538  ;;  %v1548_v3 = vmul.f32 %v1544_v21, %v1449_v49  ;;  %v1549_v57 = vmul.f32 %v1544_v21, %v1450_v39 }
 0x45c   : > { %v1546_v1 = vmul.f32 %v1539_v40, %v1447_v15  ;;  %v1547_v10 = vmul.f32 %v1539_v40, %v1448_v16 }
 0x45d   : > { %v3158_v38 = vadd.f32 %v3154_v36, %v1548_v3  ;;  %v3159_v28 = vadd.f32 %v3155_v34, %v1549_v57 }
 0x45e   : > { %v3156_v33 = vadd.f32 %v3152_v51, %v1546_v1  ;;  %v3157_v49 = vadd.f32 %v3153_v2, %v1547_v10 }
 0x45f   : > { %3162 = vst [vmem:[%s873_s26 + $0x10] sm:$0xff] %v3158_v38 }
 0x460   : > { %3160 = vst [vmem:[%s873_s26] sm:$0xff] %v3156_v33 }
 0x461   : > { %3161 = vst [vmem:[%s873_s26 + $0x8] sm:$0xff] %v3157_v49 }
 0x462   : > { %3163 = vst [vmem:[%s873_s26 + $0x18] sm:$0xff] %v3159_v28 }
 0x463   : > { %3579 = shalt.err (!%p3576_p8)
}
 0x464   : > { %s3635_s8 = smov 256  }
 0x465   : > { %3366 = dma.vmem_to_hbm [thread:$0]  (%p3817_p5), %s3178_s1, 512, %s3180_s28, %s3165_s3, %s3635_s8, %s3635_s8, %s5200_s5  }
 0x466 PF: > { %s5214_s26 = sld [smem:[#allocation13_spill]] }
 0x467   : > { %s5215_s12 = sld [smem:[#allocation11_spill]] }
 0x46c   : > { %p3378_p9 = scmp.ge.s32.totalorder %s5214_s26, 2 }
 0x46d   : > { %s3194_s10 = sand.u32 1, %s5215_s12  }
 0x46e   : > { %p3373_p10 = pnand %p3378_p9, %p3821_p6  ;;  %s3195_s7 = scalar_lea.sflag [#allocation6], %s3194_s10 }
 0x470   : > { %p3374_p11 = pneg %p3373_p10 }
 0x472   : > { %3601 = dma.done.wait (%p3374_p11), %s3195_s7, 512  }
 0x473   : > { %3603 = vsyncadd (%p3374_p11), %s3195_s7, 4294966784  ;;  %s5217_s5 = sld [smem:[#allocation14_spill]]  ;;  %s5220_s8 = smov %s3610_s30 }
 0x474   : > { %s5218_s11 = sld [smem:[#allocation12_spill]] }
 0x475   : > { %s5219_s9 = sld [smem:[#allocation15_spill]] }
 0x479   : > { %p39_p12 = scmp.ge.s32.totalorder %s5217_s5, 4  }
 0x47a   : > { %s5221_s30 = smov %s5218_s11 }
 0x47b   :  { %41 = sbr.rel (!%p39_p12) target bundleno = 21 (0x15), region = 179 }
 0x480   :  { %3201 = vsyncpa [#allocation6], 1 }
 0x481   :  { %3203 = vsyncpa [#allocation6 + $0x1], 1 }
 0x482   :  { %3204 = vsyncpa [#allocation7], 1 }
 0x483   :  { %3206 = vsyncpa [#allocation7 + $0x1], 1 }

</bundles_post_ra>
